<compile_context>
chip_gen: v6e
topology: v6e:2x2x1
jax: 0.10.0
libtpu: 0.0.40
codegen_flags: <defaults>
</compile_context>

<pallas_src>
import functools

import jax
import jax.numpy as jnp
import numpy as np
from jax import lax
from jax.experimental import pallas as pl
from jax.experimental.pallas import tpu as pltpu  # noqa: F401  (kept for completeness)

# Small, module-consistent shapes
RES, PATCH, WIDTH, LAYERS, HEADS, OUTPUT_DIM = 16, 4, 32, 2, 4, 16
BATCH = 2
SEQ = (RES // PATCH) ** 2 + 1            # 17 tokens (cls + 16 patches)
SEQ_PAD = ((SEQ + 7) // 8) * 8           # 24: padded to a sublane multiple
LN_EPS = 1e-5                            # torch.nn.LayerNorm default


def _layernorm(v, g, b):
    v = v.astype(jnp.float32)
    mu = jnp.mean(v, axis=-1, keepdims=True)
    c = v - mu
    var = jnp.mean(c * c, axis=-1, keepdims=True)
    return c * lax.rsqrt(var + LN_EPS) * g + b


def _softmax_rows(s):
    # row softmax; divide replaced by an EUP approximate reciprocal
    s = s - jnp.max(s, axis=-1, keepdims=True)
    p = jnp.exp(s)
    return p * pl.reciprocal(jnp.sum(p, axis=-1, keepdims=True), approx=True)


# ------------------------------ fused kernel -------------------------------

def _fused_vit_kernel(tok_ref, wpatch_ref, pos_ref, mask_ref, vecs_ref,
                      in_w_ref, in_b_ref, out_w_ref,
                      fc1_w_ref, fc1_b_ref, fc2_w_ref, proj_ref,
                      o_ref, *, n_head, n_layer, n_batch, seq_pad):
    bf16 = jnp.bfloat16
    D = wpatch_ref.shape[1]
    hd = D // n_head

    def vrow(r):                                   # [1, D] f32 parameter row
        return vecs_ref[r:r + 1, :]

    # conv1 (stride = kernel = patch) as ONE patch matmul over all batch*seq_pad rows;
    # cls/pad rows of tok_ref are zero, so the cls token comes solely from the pos table.
    emb = jnp.dot(tok_ref[...].astype(bf16), wpatch_ref[...],
                  preferred_element_type=jnp.float32)                    # [BT, D]
    x = _layernorm(emb + pos_ref[...], vrow(0), vrow(1))                 # ln_pre

    mask = mask_ref[...]       # [BT, BT] additive mask: 0 valid / -1e30 pad & cross-image

    for l in range(n_layer):                       # static unroll over residual blocks
        base = 4 + 6 * l

        # ---- multi-head self-attention (pre-LN); q-scale folded into in_w/in_b ----
        h = _layernorm(x, vrow(base + 0), vrow(base + 1))
        qkv = jnp.dot(h.astype(bf16), in_w_ref[l],
                      preferred_element_type=jnp.float32) + in_b_ref[l]  # [BT, 3D]
        ctxs = []
        for hh in range(n_head):                   # per-head scores; contexts stay in vregs
            lo = hh * hd
            q_h = qkv[:, lo:lo + hd].astype(bf16)
            k_h = qkv[:, D + lo:D + lo + hd].astype(bf16)
            v_h = qkv[:, 2 * D + lo:2 * D + lo + hd].astype(bf16)
            s = lax.dot_general(q_h, k_h, (((1,), (1,)), ((), ())),
                                preferred_element_type=jnp.float32)      # [BT, BT]
            p = _softmax_rows(s + mask)
            ctxs.append(jnp.dot(p.astype(bf16), v_h,
                                preferred_element_type=jnp.float32))     # [BT, hd]
        ctx = jnp.concatenate(ctxs, axis=-1)                             # [BT, D]
        x = x + jnp.dot(ctx.astype(bf16), out_w_ref[l],
                        preferred_element_type=jnp.float32) + vrow(base + 4)

        # ---- MLP: c_fc -> QuickGELU -> c_proj (pre-LN) ----
        h = _layernorm(x, vrow(base + 2), vrow(base + 3))
        f = jnp.dot(h.astype(bf16), fc1_w_ref[l],
                    preferred_element_type=jnp.float32) + fc1_b_ref[l]   # [BT, 4D]
        f = f * jax.nn.sigmoid(1.702 * f)
        x = x + jnp.dot(f.astype(bf16), fc2_w_ref[l],
                        preferred_element_type=jnp.float32) + vrow(base + 5)

    # ---- ln_post on the CLS rows (row b*seq_pad) + output projection, ONE store ----
    cls = jnp.concatenate([x[b * seq_pad:b * seq_pad + 1, :] for b in range(n_batch)],
                          axis=0)                                        # [B, D]
    cls = _layernorm(cls, vrow(2), vrow(3))
    o_ref[...] = jnp.dot(cls.astype(bf16), proj_ref[...],
                         preferred_element_type=jnp.float32)


# ----------------------- one-time parameter preparation --------------------

def prepare_params(params, batch):
    """Kernel-layout weight prep, done ONCE outside the traced forward."""
    D, Hn, L = WIDTH, HEADS, LAYERS
    hd = D // Hn
    bf, f32 = jnp.bfloat16, jnp.float32
    BT = batch * SEQ_PAD

    # positional table with the cls token folded into row 0, padded to SEQ_PAD, tiled
    # over the batch so it lines up with the stacked [B*SEQ_PAD, D] token matrix.
    pos_blk = np.zeros((SEQ_PAD, D), np.float32)
    pos_blk[0] = np.asarray(params['cls']) + np.asarray(params['pos'][0])
    pos_blk[1:SEQ] = np.asarray(params['pos'][1:])
    pos = jnp.asarray(np.tile(pos_blk, (batch, 1)))                      # [BT, D]

    # block-diagonal additive attention mask: a query may only attend to the real
    # (unpadded) keys of its own image.  -1e30 keeps exp() at exactly 0 post-softmax.
    idx = np.arange(BT)
    same_img = (idx[:, None] // SEQ_PAD) == (idx[None, :] // SEQ_PAD)
    real_key = (idx[None, :] % SEQ_PAD) < SEQ
    attn_mask = jnp.asarray(np.where(same_img & real_key, 0.0, -1e30).astype(np.float32))

    # all D-wide f32 vectors stacked into one table (fewer kernel inputs / DMAs):
    # rows 0..3: ln_pre_g, ln_pre_b, ln_post_g, ln_post_b
    # per layer l (base = 4+6l): ln1_g, ln1_b, ln2_g, ln2_b, out_b, fc2_b
    rows = [params['ln_pre_g'], params['ln_pre_b'],
            params['ln_post_g'], params['ln_post_b']]
    for lp in params['layers']:
        rows += [lp['ln1_g'], lp['ln1_b'], lp['ln2_g'], lp['ln2_b'],
                 lp['out_b'], lp['fc2_b']]
    vecs = jnp.stack(rows, axis=0).astype(f32)                           # [4+6L, D]

    def stack(fn):
        return jnp.stack([fn(lp) for lp in params['layers']], axis=0)

    # fold 1/sqrt(head_dim) query scale into the q columns of the qkv projection
    qscale = jnp.concatenate([jnp.full((D,), hd ** -0.5, f32),
                              jnp.ones((2 * D,), f32)])
    in_w = stack(lambda lp: lp['in_w'].T) * qscale                       # [L, D, 3D]
    in_b = stack(lambda lp: lp['in_b'].reshape(1, -1)) * qscale          # [L, 1, 3D]

    return dict(
        w_patch=params['conv1_w'].reshape(D, -1).T.astype(bf),           # [CPP, D]
        pos=pos, attn_mask=attn_mask, vecs=vecs,
        in_w=in_w.astype(bf), in_b=in_b.astype(f32),
        out_w=stack(lambda lp: lp['out_w'].T).astype(bf),                # [L, D, D] (unsplit)
        fc1_w=stack(lambda lp: lp['fc1_w'].T).astype(bf),                # [L, D, 4D]
        fc1_b=stack(lambda lp: lp['fc1_b'].reshape(1, -1)).astype(f32),  # [L, 1, 4D]
        fc2_w=stack(lambda lp: lp['fc2_w'].T).astype(bf),                # [L, 4D, D]
        proj=params['proj'].astype(bf),                                  # [D, OUT]
    )


# ------------------------------ model wrapper ------------------------------

def vit_forward(x, kp):
    B, C, H, W = x.shape
    P, D = PATCH, WIDTH
    gh, gw = H // P, W // P
    N = gh * gw
    CPP = C * P * P

    # patchify (pure layout glue) == Conv2d(stride=kernel=patch) + flatten, then scatter
    # into a zero-padded [B*SEQ_PAD, CPP] token-input matrix (cls / pad rows stay zero).
    patches = x.reshape(B, C, gh, P, gw, P).transpose(0, 2, 4, 1, 3, 5).reshape(B, N, CPP)
    tok_in = jnp.zeros((B, SEQ_PAD, CPP), x.dtype).at[:, 1:N + 1, :].set(patches)
    tok_in = tok_in.reshape(B * SEQ_PAD, CPP)

    args = (tok_in, kp['w_patch'], kp['pos'], kp['attn_mask'], kp['vecs'],
            kp['in_w'], kp['in_b'], kp['out_w'],
            kp['fc1_w'], kp['fc1_b'], kp['fc2_w'], kp['proj'])

    # No grid: one kernel invocation; every operand is copied into VMEM exactly once
    # (single-buffered — nothing to pipeline for a single step), output stored once.
    return pl.pallas_call(
        functools.partial(_fused_vit_kernel, n_head=HEADS, n_layer=LAYERS,
                          n_batch=B, seq_pad=SEQ_PAD),
        out_shape=jax.ShapeDtypeStruct((B, OUTPUT_DIM), jnp.float32),
    )(*args)


# ------------------------- params & pure-JAX reference ---------------------

def init_params(key):
    D, P, L = WIDTH, PATCH, LAYERS
    S = (RES // P) ** 2 + 1
    scale = D ** (-0.5)
    keys = jax.random.split(key, 4 + 8 * L)
    params = dict(
        conv1_w=0.02 * jax.random.normal(keys[0], (D, 3, P, P), jnp.float32),
        cls=scale * jax.random.normal(keys[1], (D,), jnp.float32),
        pos=scale * jax.random.normal(keys[2], (S, D), jnp.float32),
        proj=scale * jax.random.normal(keys[3], (D, OUTPUT_DIM), jnp.float32),
        ln_pre_g=jnp.ones((D,), jnp.float32), ln_pre_b=jnp.zeros((D,), jnp.float32),
        ln_post_g=jnp.ones((D,), jnp.float32), ln_post_b=jnp.zeros((D,), jnp.float32),
        layers=[],
    )
    ki = 4
    for _ in range(L):
        lk = keys[ki:ki + 8]
        ki += 8
        params['layers'].append(dict(
            in_w=0.02 * jax.random.normal(lk[0], (3 * D, D), jnp.float32),
            in_b=0.02 * jax.random.normal(lk[1], (3 * D,), jnp.float32),
            out_w=0.02 * jax.random.normal(lk[2], (D, D), jnp.float32),
            out_b=0.02 * jax.random.normal(lk[3], (D,), jnp.float32),
            fc1_w=0.02 * jax.random.normal(lk[4], (4 * D, D), jnp.float32),
            fc1_b=0.02 * jax.random.normal(lk[5], (4 * D,), jnp.float32),
            fc2_w=0.02 * jax.random.normal(lk[6], (D, 4 * D), jnp.float32),
            fc2_b=0.02 * jax.random.normal(lk[7], (D,), jnp.float32),
            ln1_g=jnp.ones((D,), jnp.float32), ln1_b=jnp.zeros((D,), jnp.float32),
            ln2_g=jnp.ones((D,), jnp.float32), ln2_b=jnp.zeros((D,), jnp.float32),
        ))
    return params


def reference_forward(x, params):
    # Pure-JAX f32 mirror of the PyTorch forward (for correctness checking).
    hp = lax.Precision.HIGHEST
    B, C, H, W = x.shape
    P, D, Hn = PATCH, WIDTH, HEADS
    gh = H // P
    patches = x.reshape(B, C, gh, P, gh, P).transpose(0, 2, 4, 1, 3, 5).reshape(B, gh * gh, -1)
    emb = jnp.einsum('bnc,dc->bnd', patches, params['conv1_w'].reshape(D, -1), precision=hp)
    cls = jnp.broadcast_to(params['cls'], (B, 1, D))
    xs = jnp.concatenate([cls, emb], axis=1) + params['pos']
    xs = _layernorm(xs, params['ln_pre_g'], params['ln_pre_b'])
    hd = D // Hn
    for lp in params['layers']:
        h = _layernorm(xs, lp['ln1_g'], lp['ln1_b'])
        qkv = jnp.einsum('bsd,ed->bse', h, lp['in_w'], precision=hp) + lp['in_b']
        q, k, v = jnp.split(qkv, 3, axis=-1)
        q = q.reshape(B, -1, Hn, hd) * hd ** -0.5
        k = k.reshape(B, -1, Hn, hd)
        v = v.reshape(B, -1, Hn, hd)
        s = jnp.einsum('bqhd,bkhd->bhqk', q, k, precision=hp)
        p = jax.nn.softmax(s, axis=-1)
        ctx = jnp.einsum('bhqk,bkhd->bqhd', p, v, precision=hp).reshape(B, -1, D)
        attn = jnp.einsum('bsd,ed->bse', ctx, lp['out_w'], precision=hp) + lp['out_b']
        xs = xs + attn
        h = _layernorm(xs, lp['ln2_g'], lp['ln2_b'])
        f = jnp.einsum('bsd,ed->bse', h, lp['fc1_w'], precision=hp) + lp['fc1_b']
        f = f * jax.nn.sigmoid(1.702 * f)
        f = jnp.einsum('bse,de->bsd', f, lp['fc2_w'], precision=hp) + lp['fc2_b']
        xs = xs + f
    cls_out = _layernorm(xs[:, 0, :], params['ln_post_g'], params['ln_post_b'])
    return jnp.dot(cls_out, params['proj'], precision=hp)


if __name__ == "__main__":
    key = jax.random.PRNGKey(0)
    kx, kparam = jax.random.split(key)
    x = jax.random.normal(kx, (BATCH, 3, RES, RES), jnp.float32)
    params = init_params(kparam)
    kparams = prepare_params(params, BATCH)    # one-time weight prep, not re-traced

    out = jax.jit(vit_forward)(x, kparams)
    out = jax.block_until_ready(out)
    assert out.shape == (BATCH, OUTPUT_DIM)

    ref = reference_forward(x, params)
    np.testing.assert_allclose(np.asarray(out), np.asarray(ref), rtol=2e-2, atol=2e-2)
    print("KERNEL_OK")
</pallas_src>

<mosaic_0001>
module attributes {stable_mosaic.version = 11 : i64} {
  func.func @_fused_vit_kernel(%arg0: memref<48x48xf32, #tpu.memory_space<vmem>>, %arg1: memref<48x32xbf16, #tpu.memory_space<vmem>>, %arg2: memref<48x32xf32, #tpu.memory_space<vmem>>, %arg3: memref<48x48xf32, #tpu.memory_space<vmem>>, %arg4: memref<16x32xf32, #tpu.memory_space<vmem>>, %arg5: memref<2x32x96xbf16, #tpu.memory_space<vmem>>, %arg6: memref<2x1x96xf32, #tpu.memory_space<vmem>>, %arg7: memref<2x32x32xbf16, #tpu.memory_space<vmem>>, %arg8: memref<2x32x128xbf16, #tpu.memory_space<vmem>>, %arg9: memref<2x1x128xf32, #tpu.memory_space<vmem>>, %arg10: memref<2x128x32xbf16, #tpu.memory_space<vmem>>, %arg11: memref<32x16xbf16, #tpu.memory_space<vmem>>, %arg12: memref<2x16xf32, #tpu.memory_space<vmem>>) attributes {dimension_semantics = [], scalar_prefetch = 0 : i64, scratch_operands = 0 : i64, tpu.core_type = #tpu.core_type<tc>} {
    %c0 = arith.constant 0 : index
    %c0_0 = arith.constant 0 : index
    %0 = vector.load %arg0[%c0, %c0_0] : memref<48x48xf32, #tpu.memory_space<vmem>>, vector<48x48xf32>
    %1 = arith.truncf %0 : vector<48x48xf32> to vector<48x48xbf16>
    %c0_1 = arith.constant 0 : index
    %c0_2 = arith.constant 0 : index
    %2 = vector.load %arg1[%c0_1, %c0_2] : memref<48x32xbf16, #tpu.memory_space<vmem>>, vector<48x32xbf16>
    %cst = arith.constant dense<0.000000e+00> : vector<48x32xf32>
    %3 = tpu.matmul %1, %2, %cst {dimension_numbers = #tpu.dot_dimension_numbers<[1], [0], [0], [1], [0, 0, 1, 1], [], []>} : vector<48x48xbf16>, vector<48x32xbf16>, vector<48x32xf32> -> vector<48x32xf32>
    %c0_3 = arith.constant 0 : index
    %c0_4 = arith.constant 0 : index
    %4 = vector.load %arg2[%c0_3, %c0_4] : memref<48x32xf32, #tpu.memory_space<vmem>>, vector<48x32xf32>
    %5 = arith.addf %3, %4 : vector<48x32xf32>
    %c0_5 = arith.constant 0 : index
    %c0_6 = arith.constant 0 : index
    %6 = vector.load %arg4[%c0_5, %c0_6] : memref<16x32xf32, #tpu.memory_space<vmem>>, vector<1x32xf32>
    %c1 = arith.constant 1 : index
    %c0_7 = arith.constant 0 : index
    %7 = vector.load %arg4[%c1, %c0_7] : memref<16x32xf32, #tpu.memory_space<vmem>>, vector<1x32xf32>
    %cst_8 = arith.constant dense<0.000000e+00> : vector<48xf32>
    %8 = vector.multi_reduction <add>, %5, %cst_8 [1] : vector<48x32xf32> to vector<48xf32>
    %9 = vector.shape_cast %8 : vector<48xf32> to vector<48x1xf32>
    %cst_9 = arith.constant 3.200000e+01 : f32
    %10 = vector.broadcast %cst_9 : f32 to vector<48x1xf32>
    %11 = arith.divf %9, %10 : vector<48x1xf32>
    %12 = vector.broadcast %11 : vector<48x1xf32> to vector<48x32xf32>
    %13 = arith.subf %5, %12 : vector<48x32xf32>
    %14 = arith.mulf %13, %13 : vector<48x32xf32>
    %cst_10 = arith.constant dense<0.000000e+00> : vector<48xf32>
    %15 = vector.multi_reduction <add>, %14, %cst_10 [1] : vector<48x32xf32> to vector<48xf32>
    %16 = vector.shape_cast %15 : vector<48xf32> to vector<48x1xf32>
    %cst_11 = arith.constant 3.200000e+01 : f32
    %17 = vector.broadcast %cst_11 : f32 to vector<48x1xf32>
    %18 = arith.divf %16, %17 : vector<48x1xf32>
    %cst_12 = arith.constant 9.99999974E-6 : f32
    %19 = vector.broadcast %cst_12 : f32 to vector<48x1xf32>
    %20 = arith.addf %18, %19 : vector<48x1xf32>
    %21 = math.rsqrt %20 : vector<48x1xf32>
    %22 = vector.broadcast %21 : vector<48x1xf32> to vector<48x32xf32>
    %23 = arith.mulf %13, %22 : vector<48x32xf32>
    %24 = vector.broadcast %6 : vector<1x32xf32> to vector<48x32xf32>
    %25 = arith.mulf %23, %24 : vector<48x32xf32>
    %26 = vector.broadcast %7 : vector<1x32xf32> to vector<48x32xf32>
    %27 = arith.addf %25, %26 : vector<48x32xf32>
    %c0_13 = arith.constant 0 : index
    %c0_14 = arith.constant 0 : index
    %28 = vector.load %arg3[%c0_13, %c0_14] : memref<48x48xf32, #tpu.memory_space<vmem>>, vector<48x48xf32>
    %c4 = arith.constant 4 : index
    %c0_15 = arith.constant 0 : index
    %29 = vector.load %arg4[%c4, %c0_15] : memref<16x32xf32, #tpu.memory_space<vmem>>, vector<1x32xf32>
    %c5 = arith.constant 5 : index
    %c0_16 = arith.constant 0 : index
    %30 = vector.load %arg4[%c5, %c0_16] : memref<16x32xf32, #tpu.memory_space<vmem>>, vector<1x32xf32>
    %cst_17 = arith.constant dense<0.000000e+00> : vector<48xf32>
    %31 = vector.multi_reduction <add>, %27, %cst_17 [1] : vector<48x32xf32> to vector<48xf32>
    %32 = vector.shape_cast %31 : vector<48xf32> to vector<48x1xf32>
    %cst_18 = arith.constant 3.200000e+01 : f32
    %33 = vector.broadcast %cst_18 : f32 to vector<48x1xf32>
    %34 = arith.divf %32, %33 : vector<48x1xf32>
    %35 = vector.broadcast %34 : vector<48x1xf32> to vector<48x32xf32>
    %36 = arith.subf %27, %35 : vector<48x32xf32>
    %37 = arith.mulf %36, %36 : vector<48x32xf32>
    %cst_19 = arith.constant dense<0.000000e+00> : vector<48xf32>
    %38 = vector.multi_reduction <add>, %37, %cst_19 [1] : vector<48x32xf32> to vector<48xf32>
    %39 = vector.shape_cast %38 : vector<48xf32> to vector<48x1xf32>
    %cst_20 = arith.constant 3.200000e+01 : f32
    %40 = vector.broadcast %cst_20 : f32 to vector<48x1xf32>
    %41 = arith.divf %39, %40 : vector<48x1xf32>
    %cst_21 = arith.constant 9.99999974E-6 : f32
    %42 = vector.broadcast %cst_21 : f32 to vector<48x1xf32>
    %43 = arith.addf %41, %42 : vector<48x1xf32>
    %44 = math.rsqrt %43 : vector<48x1xf32>
    %45 = vector.broadcast %44 : vector<48x1xf32> to vector<48x32xf32>
    %46 = arith.mulf %36, %45 : vector<48x32xf32>
    %47 = vector.broadcast %29 : vector<1x32xf32> to vector<48x32xf32>
    %48 = arith.mulf %46, %47 : vector<48x32xf32>
    %49 = vector.broadcast %30 : vector<1x32xf32> to vector<48x32xf32>
    %50 = arith.addf %48, %49 : vector<48x32xf32>
    %51 = arith.truncf %50 : vector<48x32xf32> to vector<48x32xbf16>
    %c0_22 = arith.constant 0 : index
    %c0_23 = arith.constant 0 : index
    %c0_24 = arith.constant 0 : index
    %52 = vector.load %arg5[%c0_22, %c0_23, %c0_24] : memref<2x32x96xbf16, #tpu.memory_space<vmem>>, vector<1x32x96xbf16>
    %53 = vector.shape_cast %52 : vector<1x32x96xbf16> to vector<32x96xbf16>
    %cst_25 = arith.constant dense<0.000000e+00> : vector<48x96xf32>
    %54 = tpu.matmul %51, %53, %cst_25 {dimension_numbers = #tpu.dot_dimension_numbers<[1], [0], [0], [1], [0, 0, 1, 1], [], []>} : vector<48x32xbf16>, vector<32x96xbf16>, vector<48x96xf32> -> vector<48x96xf32>
    %c0_26 = arith.constant 0 : index
    %c0_27 = arith.constant 0 : index
    %c0_28 = arith.constant 0 : index
    %55 = vector.load %arg6[%c0_26, %c0_27, %c0_28] : memref<2x1x96xf32, #tpu.memory_space<vmem>>, vector<1x1x96xf32>
    %56 = vector.shape_cast %55 : vector<1x1x96xf32> to vector<1x96xf32>
    %57 = vector.broadcast %56 : vector<1x96xf32> to vector<48x96xf32>
    %58 = arith.addf %54, %57 : vector<48x96xf32>
    %59 = vector.extract_strided_slice %58 {offsets = [0, 0], sizes = [48, 8], strides = [1, 1]} : vector<48x96xf32> to vector<48x8xf32>
    %60 = arith.truncf %59 : vector<48x8xf32> to vector<48x8xbf16>
    %61 = vector.extract_strided_slice %58 {offsets = [0, 32], sizes = [48, 8], strides = [1, 1]} : vector<48x96xf32> to vector<48x8xf32>
    %62 = arith.truncf %61 : vector<48x8xf32> to vector<48x8xbf16>
    %63 = vector.extract_strided_slice %58 {offsets = [0, 64], sizes = [48, 8], strides = [1, 1]} : vector<48x96xf32> to vector<48x8xf32>
    %64 = arith.truncf %63 : vector<48x8xf32> to vector<48x8xbf16>
    %cst_29 = arith.constant dense<0.000000e+00> : vector<48x48xf32>
    %65 = tpu.matmul %60, %62, %cst_29 {dimension_numbers = #tpu.dot_dimension_numbers<[1], [1], [0], [0], [0, 0, 1, 0], [], []>} : vector<48x8xbf16>, vector<48x8xbf16>, vector<48x48xf32> -> vector<48x48xf32>
    %66 = arith.addf %65, %28 : vector<48x48xf32>
    %cst_30 = arith.constant dense<0xFF800000> : vector<48xf32>
    %67 = vector.multi_reduction <maximumf>, %66, %cst_30 [1] : vector<48x48xf32> to vector<48xf32>
    %68 = vector.shape_cast %67 : vector<48xf32> to vector<48x1xf32>
    %69 = vector.broadcast %68 : vector<48x1xf32> to vector<48x48xf32>
    %70 = arith.subf %66, %69 : vector<48x48xf32>
    %71 = math.exp %70 : vector<48x48xf32>
    %cst_31 = arith.constant dense<0.000000e+00> : vector<48xf32>
    %72 = vector.multi_reduction <add>, %71, %cst_31 [1] : vector<48x48xf32> to vector<48xf32>
    %73 = vector.shape_cast %72 : vector<48xf32> to vector<48x1xf32>
    %74 = tpu.reciprocal %73 {approx = true} : vector<48x1xf32> -> vector<48x1xf32>
    %75 = vector.broadcast %74 : vector<48x1xf32> to vector<48x48xf32>
    %76 = arith.mulf %71, %75 : vector<48x48xf32>
    %77 = arith.truncf %76 : vector<48x48xf32> to vector<48x48xbf16>
    %cst_32 = arith.constant dense<0.000000e+00> : vector<48x8xf32>
    %78 = tpu.matmul %77, %64, %cst_32 {dimension_numbers = #tpu.dot_dimension_numbers<[1], [0], [0], [1], [0, 0, 1, 1], [], []>} : vector<48x48xbf16>, vector<48x8xbf16>, vector<48x8xf32> -> vector<48x8xf32>
    %79 = vector.extract_strided_slice %58 {offsets = [0, 8], sizes = [48, 8], strides = [1, 1]} : vector<48x96xf32> to vector<48x8xf32>
    %80 = arith.truncf %79 : vector<48x8xf32> to vector<48x8xbf16>
    %81 = vector.extract_strided_slice %58 {offsets = [0, 40], sizes = [48, 8], strides = [1, 1]} : vector<48x96xf32> to vector<48x8xf32>
    %82 = arith.truncf %81 : vector<48x8xf32> to vector<48x8xbf16>
    %83 = vector.extract_strided_slice %58 {offsets = [0, 72], sizes = [48, 8], strides = [1, 1]} : vector<48x96xf32> to vector<48x8xf32>
    %84 = arith.truncf %83 : vector<48x8xf32> to vector<48x8xbf16>
    %cst_33 = arith.constant dense<0.000000e+00> : vector<48x48xf32>
    %85 = tpu.matmul %80, %82, %cst_33 {dimension_numbers = #tpu.dot_dimension_numbers<[1], [1], [0], [0], [0, 0, 1, 0], [], []>} : vector<48x8xbf16>, vector<48x8xbf16>, vector<48x48xf32> -> vector<48x48xf32>
    %86 = arith.addf %85, %28 : vector<48x48xf32>
    %cst_34 = arith.constant dense<0xFF800000> : vector<48xf32>
    %87 = vector.multi_reduction <maximumf>, %86, %cst_34 [1] : vector<48x48xf32> to vector<48xf32>
    %88 = vector.shape_cast %87 : vector<48xf32> to vector<48x1xf32>
    %89 = vector.broadcast %88 : vector<48x1xf32> to vector<48x48xf32>
    %90 = arith.subf %86, %89 : vector<48x48xf32>
    %91 = math.exp %90 : vector<48x48xf32>
    %cst_35 = arith.constant dense<0.000000e+00> : vector<48xf32>
    %92 = vector.multi_reduction <add>, %91, %cst_35 [1] : vector<48x48xf32> to vector<48xf32>
    %93 = vector.shape_cast %92 : vector<48xf32> to vector<48x1xf32>
    %94 = tpu.reciprocal %93 {approx = true} : vector<48x1xf32> -> vector<48x1xf32>
    %95 = vector.broadcast %94 : vector<48x1xf32> to vector<48x48xf32>
    %96 = arith.mulf %91, %95 : vector<48x48xf32>
    %97 = arith.truncf %96 : vector<48x48xf32> to vector<48x48xbf16>
    %cst_36 = arith.constant dense<0.000000e+00> : vector<48x8xf32>
    %98 = tpu.matmul %97, %84, %cst_36 {dimension_numbers = #tpu.dot_dimension_numbers<[1], [0], [0], [1], [0, 0, 1, 1], [], []>} : vector<48x48xbf16>, vector<48x8xbf16>, vector<48x8xf32> -> vector<48x8xf32>
    %99 = vector.extract_strided_slice %58 {offsets = [0, 16], sizes = [48, 8], strides = [1, 1]} : vector<48x96xf32> to vector<48x8xf32>
    %100 = arith.truncf %99 : vector<48x8xf32> to vector<48x8xbf16>
    %101 = vector.extract_strided_slice %58 {offsets = [0, 48], sizes = [48, 8], strides = [1, 1]} : vector<48x96xf32> to vector<48x8xf32>
    %102 = arith.truncf %101 : vector<48x8xf32> to vector<48x8xbf16>
    %103 = vector.extract_strided_slice %58 {offsets = [0, 80], sizes = [48, 8], strides = [1, 1]} : vector<48x96xf32> to vector<48x8xf32>
    %104 = arith.truncf %103 : vector<48x8xf32> to vector<48x8xbf16>
    %cst_37 = arith.constant dense<0.000000e+00> : vector<48x48xf32>
    %105 = tpu.matmul %100, %102, %cst_37 {dimension_numbers = #tpu.dot_dimension_numbers<[1], [1], [0], [0], [0, 0, 1, 0], [], []>} : vector<48x8xbf16>, vector<48x8xbf16>, vector<48x48xf32> -> vector<48x48xf32>
    %106 = arith.addf %105, %28 : vector<48x48xf32>
    %cst_38 = arith.constant dense<0xFF800000> : vector<48xf32>
    %107 = vector.multi_reduction <maximumf>, %106, %cst_38 [1] : vector<48x48xf32> to vector<48xf32>
    %108 = vector.shape_cast %107 : vector<48xf32> to vector<48x1xf32>
    %109 = vector.broadcast %108 : vector<48x1xf32> to vector<48x48xf32>
    %110 = arith.subf %106, %109 : vector<48x48xf32>
    %111 = math.exp %110 : vector<48x48xf32>
    %cst_39 = arith.constant dense<0.000000e+00> : vector<48xf32>
    %112 = vector.multi_reduction <add>, %111, %cst_39 [1] : vector<48x48xf32> to vector<48xf32>
    %113 = vector.shape_cast %112 : vector<48xf32> to vector<48x1xf32>
    %114 = tpu.reciprocal %113 {approx = true} : vector<48x1xf32> -> vector<48x1xf32>
    %115 = vector.broadcast %114 : vector<48x1xf32> to vector<48x48xf32>
    %116 = arith.mulf %111, %115 : vector<48x48xf32>
    %117 = arith.truncf %116 : vector<48x48xf32> to vector<48x48xbf16>
    %cst_40 = arith.constant dense<0.000000e+00> : vector<48x8xf32>
    %118 = tpu.matmul %117, %104, %cst_40 {dimension_numbers = #tpu.dot_dimension_numbers<[1], [0], [0], [1], [0, 0, 1, 1], [], []>} : vector<48x48xbf16>, vector<48x8xbf16>, vector<48x8xf32> -> vector<48x8xf32>
    %119 = vector.extract_strided_slice %58 {offsets = [0, 24], sizes = [48, 8], strides = [1, 1]} : vector<48x96xf32> to vector<48x8xf32>
    %120 = arith.truncf %119 : vector<48x8xf32> to vector<48x8xbf16>
    %121 = vector.extract_strided_slice %58 {offsets = [0, 56], sizes = [48, 8], strides = [1, 1]} : vector<48x96xf32> to vector<48x8xf32>
    %122 = arith.truncf %121 : vector<48x8xf32> to vector<48x8xbf16>
    %123 = vector.extract_strided_slice %58 {offsets = [0, 88], sizes = [48, 8], strides = [1, 1]} : vector<48x96xf32> to vector<48x8xf32>
    %124 = arith.truncf %123 : vector<48x8xf32> to vector<48x8xbf16>
    %cst_41 = arith.constant dense<0.000000e+00> : vector<48x48xf32>
    %125 = tpu.matmul %120, %122, %cst_41 {dimension_numbers = #tpu.dot_dimension_numbers<[1], [1], [0], [0], [0, 0, 1, 0], [], []>} : vector<48x8xbf16>, vector<48x8xbf16>, vector<48x48xf32> -> vector<48x48xf32>
    %126 = arith.addf %125, %28 : vector<48x48xf32>
    %cst_42 = arith.constant dense<0xFF800000> : vector<48xf32>
    %127 = vector.multi_reduction <maximumf>, %126, %cst_42 [1] : vector<48x48xf32> to vector<48xf32>
    %128 = vector.shape_cast %127 : vector<48xf32> to vector<48x1xf32>
    %129 = vector.broadcast %128 : vector<48x1xf32> to vector<48x48xf32>
    %130 = arith.subf %126, %129 : vector<48x48xf32>
    %131 = math.exp %130 : vector<48x48xf32>
    %cst_43 = arith.constant dense<0.000000e+00> : vector<48xf32>
    %132 = vector.multi_reduction <add>, %131, %cst_43 [1] : vector<48x48xf32> to vector<48xf32>
    %133 = vector.shape_cast %132 : vector<48xf32> to vector<48x1xf32>
    %134 = tpu.reciprocal %133 {approx = true} : vector<48x1xf32> -> vector<48x1xf32>
    %135 = vector.broadcast %134 : vector<48x1xf32> to vector<48x48xf32>
    %136 = arith.mulf %131, %135 : vector<48x48xf32>
    %137 = arith.truncf %136 : vector<48x48xf32> to vector<48x48xbf16>
    %cst_44 = arith.constant dense<0.000000e+00> : vector<48x8xf32>
    %138 = tpu.matmul %137, %124, %cst_44 {dimension_numbers = #tpu.dot_dimension_numbers<[1], [0], [0], [1], [0, 0, 1, 1], [], []>} : vector<48x48xbf16>, vector<48x8xbf16>, vector<48x8xf32> -> vector<48x8xf32>
    %139 = tpu.concatenate %78, %98, %118, %138 in 1 : vector<48x8xf32>, vector<48x8xf32>, vector<48x8xf32>, vector<48x8xf32> -> vector<48x32xf32>
    %140 = arith.truncf %139 : vector<48x32xf32> to vector<48x32xbf16>
    %c0_45 = arith.constant 0 : index
    %c0_46 = arith.constant 0 : index
    %c0_47 = arith.constant 0 : index
    %141 = vector.load %arg7[%c0_45, %c0_46, %c0_47] : memref<2x32x32xbf16, #tpu.memory_space<vmem>>, vector<1x32x32xbf16>
    %142 = vector.shape_cast %141 : vector<1x32x32xbf16> to vector<32x32xbf16>
    %cst_48 = arith.constant dense<0.000000e+00> : vector<48x32xf32>
    %143 = tpu.matmul %140, %142, %cst_48 {dimension_numbers = #tpu.dot_dimension_numbers<[1], [0], [0], [1], [0, 0, 1, 1], [], []>} : vector<48x32xbf16>, vector<32x32xbf16>, vector<48x32xf32> -> vector<48x32xf32>
    %144 = arith.addf %27, %143 : vector<48x32xf32>
    %c8 = arith.constant 8 : index
    %c0_49 = arith.constant 0 : index
    %145 = vector.load %arg4[%c8, %c0_49] : memref<16x32xf32, #tpu.memory_space<vmem>>, vector<1x32xf32>
    %146 = vector.broadcast %145 : vector<1x32xf32> to vector<48x32xf32>
    %147 = arith.addf %144, %146 : vector<48x32xf32>
    %c6 = arith.constant 6 : index
    %c0_50 = arith.constant 0 : index
    %148 = vector.load %arg4[%c6, %c0_50] : memref<16x32xf32, #tpu.memory_space<vmem>>, vector<1x32xf32>
    %c7 = arith.constant 7 : index
    %c0_51 = arith.constant 0 : index
    %149 = vector.load %arg4[%c7, %c0_51] : memref<16x32xf32, #tpu.memory_space<vmem>>, vector<1x32xf32>
    %cst_52 = arith.constant dense<0.000000e+00> : vector<48xf32>
    %150 = vector.multi_reduction <add>, %147, %cst_52 [1] : vector<48x32xf32> to vector<48xf32>
    %151 = vector.shape_cast %150 : vector<48xf32> to vector<48x1xf32>
    %cst_53 = arith.constant 3.200000e+01 : f32
    %152 = vector.broadcast %cst_53 : f32 to vector<48x1xf32>
    %153 = arith.divf %151, %152 : vector<48x1xf32>
    %154 = vector.broadcast %153 : vector<48x1xf32> to vector<48x32xf32>
    %155 = arith.subf %147, %154 : vector<48x32xf32>
    %156 = arith.mulf %155, %155 : vector<48x32xf32>
    %cst_54 = arith.constant dense<0.000000e+00> : vector<48xf32>
    %157 = vector.multi_reduction <add>, %156, %cst_54 [1] : vector<48x32xf32> to vector<48xf32>
    %158 = vector.shape_cast %157 : vector<48xf32> to vector<48x1xf32>
    %cst_55 = arith.constant 3.200000e+01 : f32
    %159 = vector.broadcast %cst_55 : f32 to vector<48x1xf32>
    %160 = arith.divf %158, %159 : vector<48x1xf32>
    %cst_56 = arith.constant 9.99999974E-6 : f32
    %161 = vector.broadcast %cst_56 : f32 to vector<48x1xf32>
    %162 = arith.addf %160, %161 : vector<48x1xf32>
    %163 = math.rsqrt %162 : vector<48x1xf32>
    %164 = vector.broadcast %163 : vector<48x1xf32> to vector<48x32xf32>
    %165 = arith.mulf %155, %164 : vector<48x32xf32>
    %166 = vector.broadcast %148 : vector<1x32xf32> to vector<48x32xf32>
    %167 = arith.mulf %165, %166 : vector<48x32xf32>
    %168 = vector.broadcast %149 : vector<1x32xf32> to vector<48x32xf32>
    %169 = arith.addf %167, %168 : vector<48x32xf32>
    %170 = arith.truncf %169 : vector<48x32xf32> to vector<48x32xbf16>
    %c0_57 = arith.constant 0 : index
    %c0_58 = arith.constant 0 : index
    %c0_59 = arith.constant 0 : index
    %171 = vector.load %arg8[%c0_57, %c0_58, %c0_59] : memref<2x32x128xbf16, #tpu.memory_space<vmem>>, vector<1x32x128xbf16>
    %172 = vector.shape_cast %171 : vector<1x32x128xbf16> to vector<32x128xbf16>
    %cst_60 = arith.constant dense<0.000000e+00> : vector<48x128xf32>
    %173 = tpu.matmul %170, %172, %cst_60 {dimension_numbers = #tpu.dot_dimension_numbers<[1], [0], [0], [1], [0, 0, 1, 1], [], []>} : vector<48x32xbf16>, vector<32x128xbf16>, vector<48x128xf32> -> vector<48x128xf32>
    %c0_61 = arith.constant 0 : index
    %c0_62 = arith.constant 0 : index
    %c0_63 = arith.constant 0 : index
    %174 = vector.load %arg9[%c0_61, %c0_62, %c0_63] : memref<2x1x128xf32, #tpu.memory_space<vmem>>, vector<1x1x128xf32>
    %175 = vector.shape_cast %174 : vector<1x1x128xf32> to vector<1x128xf32>
    %176 = vector.broadcast %175 : vector<1x128xf32> to vector<48x128xf32>
    %177 = arith.addf %173, %176 : vector<48x128xf32>
    %cst_64 = arith.constant 1.702000e+00 : f32
    %178 = vector.broadcast %cst_64 : f32 to vector<48x128xf32>
    %179 = arith.mulf %178, %177 : vector<48x128xf32>
    %180 = arith.negf %179 : vector<48x128xf32>
    %181 = math.exp %180 : vector<48x128xf32>
    %cst_65 = arith.constant 1.000000e+00 : f32
    %182 = vector.broadcast %cst_65 : f32 to vector<48x128xf32>
    %183 = arith.addf %182, %181 : vector<48x128xf32>
    %184 = arith.divf %182, %183 : vector<48x128xf32>
    %185 = arith.mulf %177, %184 : vector<48x128xf32>
    %186 = arith.truncf %185 : vector<48x128xf32> to vector<48x128xbf16>
    %c0_66 = arith.constant 0 : index
    %c0_67 = arith.constant 0 : index
    %c0_68 = arith.constant 0 : index
    %187 = vector.load %arg10[%c0_66, %c0_67, %c0_68] : memref<2x128x32xbf16, #tpu.memory_space<vmem>>, vector<1x128x32xbf16>
    %188 = vector.shape_cast %187 : vector<1x128x32xbf16> to vector<128x32xbf16>
    %cst_69 = arith.constant dense<0.000000e+00> : vector<48x32xf32>
    %189 = tpu.matmul %186, %188, %cst_69 {dimension_numbers = #tpu.dot_dimension_numbers<[1], [0], [0], [1], [0, 0, 1, 1], [], []>} : vector<48x128xbf16>, vector<128x32xbf16>, vector<48x32xf32> -> vector<48x32xf32>
    %190 = arith.addf %147, %189 : vector<48x32xf32>
    %c9 = arith.constant 9 : index
    %c0_70 = arith.constant 0 : index
    %191 = vector.load %arg4[%c9, %c0_70] : memref<16x32xf32, #tpu.memory_space<vmem>>, vector<1x32xf32>
    %192 = vector.broadcast %191 : vector<1x32xf32> to vector<48x32xf32>
    %193 = arith.addf %190, %192 : vector<48x32xf32>
    %c10 = arith.constant 10 : index
    %c0_71 = arith.constant 0 : index
    %194 = vector.load %arg4[%c10, %c0_71] : memref<16x32xf32, #tpu.memory_space<vmem>>, vector<1x32xf32>
    %c11 = arith.constant 11 : index
    %c0_72 = arith.constant 0 : index
    %195 = vector.load %arg4[%c11, %c0_72] : memref<16x32xf32, #tpu.memory_space<vmem>>, vector<1x32xf32>
    %cst_73 = arith.constant dense<0.000000e+00> : vector<48xf32>
    %196 = vector.multi_reduction <add>, %193, %cst_73 [1] : vector<48x32xf32> to vector<48xf32>
    %197 = vector.shape_cast %196 : vector<48xf32> to vector<48x1xf32>
    %cst_74 = arith.constant 3.200000e+01 : f32
    %198 = vector.broadcast %cst_74 : f32 to vector<48x1xf32>
    %199 = arith.divf %197, %198 : vector<48x1xf32>
    %200 = vector.broadcast %199 : vector<48x1xf32> to vector<48x32xf32>
    %201 = arith.subf %193, %200 : vector<48x32xf32>
    %202 = arith.mulf %201, %201 : vector<48x32xf32>
    %cst_75 = arith.constant dense<0.000000e+00> : vector<48xf32>
    %203 = vector.multi_reduction <add>, %202, %cst_75 [1] : vector<48x32xf32> to vector<48xf32>
    %204 = vector.shape_cast %203 : vector<48xf32> to vector<48x1xf32>
    %cst_76 = arith.constant 3.200000e+01 : f32
    %205 = vector.broadcast %cst_76 : f32 to vector<48x1xf32>
    %206 = arith.divf %204, %205 : vector<48x1xf32>
    %cst_77 = arith.constant 9.99999974E-6 : f32
    %207 = vector.broadcast %cst_77 : f32 to vector<48x1xf32>
    %208 = arith.addf %206, %207 : vector<48x1xf32>
    %209 = math.rsqrt %208 : vector<48x1xf32>
    %210 = vector.broadcast %209 : vector<48x1xf32> to vector<48x32xf32>
    %211 = arith.mulf %201, %210 : vector<48x32xf32>
    %212 = vector.broadcast %194 : vector<1x32xf32> to vector<48x32xf32>
    %213 = arith.mulf %211, %212 : vector<48x32xf32>
    %214 = vector.broadcast %195 : vector<1x32xf32> to vector<48x32xf32>
    %215 = arith.addf %213, %214 : vector<48x32xf32>
    %216 = arith.truncf %215 : vector<48x32xf32> to vector<48x32xbf16>
    %c1_78 = arith.constant 1 : index
    %c0_79 = arith.constant 0 : index
    %c0_80 = arith.constant 0 : index
    %217 = vector.load %arg5[%c1_78, %c0_79, %c0_80] : memref<2x32x96xbf16, #tpu.memory_space<vmem>>, vector<1x32x96xbf16>
    %218 = vector.shape_cast %217 : vector<1x32x96xbf16> to vector<32x96xbf16>
    %cst_81 = arith.constant dense<0.000000e+00> : vector<48x96xf32>
    %219 = tpu.matmul %216, %218, %cst_81 {dimension_numbers = #tpu.dot_dimension_numbers<[1], [0], [0], [1], [0, 0, 1, 1], [], []>} : vector<48x32xbf16>, vector<32x96xbf16>, vector<48x96xf32> -> vector<48x96xf32>
    %c1_82 = arith.constant 1 : index
    %c0_83 = arith.constant 0 : index
    %c0_84 = arith.constant 0 : index
    %220 = vector.load %arg6[%c1_82, %c0_83, %c0_84] : memref<2x1x96xf32, #tpu.memory_space<vmem>>, vector<1x1x96xf32>
    %221 = vector.shape_cast %220 : vector<1x1x96xf32> to vector<1x96xf32>
    %222 = vector.broadcast %221 : vector<1x96xf32> to vector<48x96xf32>
    %223 = arith.addf %219, %222 : vector<48x96xf32>
    %224 = vector.extract_strided_slice %223 {offsets = [0, 0], sizes = [48, 8], strides = [1, 1]} : vector<48x96xf32> to vector<48x8xf32>
    %225 = arith.truncf %224 : vector<48x8xf32> to vector<48x8xbf16>
    %226 = vector.extract_strided_slice %223 {offsets = [0, 32], sizes = [48, 8], strides = [1, 1]} : vector<48x96xf32> to vector<48x8xf32>
    %227 = arith.truncf %226 : vector<48x8xf32> to vector<48x8xbf16>
    %228 = vector.extract_strided_slice %223 {offsets = [0, 64], sizes = [48, 8], strides = [1, 1]} : vector<48x96xf32> to vector<48x8xf32>
    %229 = arith.truncf %228 : vector<48x8xf32> to vector<48x8xbf16>
    %cst_85 = arith.constant dense<0.000000e+00> : vector<48x48xf32>
    %230 = tpu.matmul %225, %227, %cst_85 {dimension_numbers = #tpu.dot_dimension_numbers<[1], [1], [0], [0], [0, 0, 1, 0], [], []>} : vector<48x8xbf16>, vector<48x8xbf16>, vector<48x48xf32> -> vector<48x48xf32>
    %231 = arith.addf %230, %28 : vector<48x48xf32>
    %cst_86 = arith.constant dense<0xFF800000> : vector<48xf32>
    %232 = vector.multi_reduction <maximumf>, %231, %cst_86 [1] : vector<48x48xf32> to vector<48xf32>
    %233 = vector.shape_cast %232 : vector<48xf32> to vector<48x1xf32>
    %234 = vector.broadcast %233 : vector<48x1xf32> to vector<48x48xf32>
    %235 = arith.subf %231, %234 : vector<48x48xf32>
    %236 = math.exp %235 : vector<48x48xf32>
    %cst_87 = arith.constant dense<0.000000e+00> : vector<48xf32>
    %237 = vector.multi_reduction <add>, %236, %cst_87 [1] : vector<48x48xf32> to vector<48xf32>
    %238 = vector.shape_cast %237 : vector<48xf32> to vector<48x1xf32>
    %239 = tpu.reciprocal %238 {approx = true} : vector<48x1xf32> -> vector<48x1xf32>
    %240 = vector.broadcast %239 : vector<48x1xf32> to vector<48x48xf32>
    %241 = arith.mulf %236, %240 : vector<48x48xf32>
    %242 = arith.truncf %241 : vector<48x48xf32> to vector<48x48xbf16>
    %cst_88 = arith.constant dense<0.000000e+00> : vector<48x8xf32>
    %243 = tpu.matmul %242, %229, %cst_88 {dimension_numbers = #tpu.dot_dimension_numbers<[1], [0], [0], [1], [0, 0, 1, 1], [], []>} : vector<48x48xbf16>, vector<48x8xbf16>, vector<48x8xf32> -> vector<48x8xf32>
    %244 = vector.extract_strided_slice %223 {offsets = [0, 8], sizes = [48, 8], strides = [1, 1]} : vector<48x96xf32> to vector<48x8xf32>
    %245 = arith.truncf %244 : vector<48x8xf32> to vector<48x8xbf16>
    %246 = vector.extract_strided_slice %223 {offsets = [0, 40], sizes = [48, 8], strides = [1, 1]} : vector<48x96xf32> to vector<48x8xf32>
    %247 = arith.truncf %246 : vector<48x8xf32> to vector<48x8xbf16>
    %248 = vector.extract_strided_slice %223 {offsets = [0, 72], sizes = [48, 8], strides = [1, 1]} : vector<48x96xf32> to vector<48x8xf32>
    %249 = arith.truncf %248 : vector<48x8xf32> to vector<48x8xbf16>
    %cst_89 = arith.constant dense<0.000000e+00> : vector<48x48xf32>
    %250 = tpu.matmul %245, %247, %cst_89 {dimension_numbers = #tpu.dot_dimension_numbers<[1], [1], [0], [0], [0, 0, 1, 0], [], []>} : vector<48x8xbf16>, vector<48x8xbf16>, vector<48x48xf32> -> vector<48x48xf32>
    %251 = arith.addf %250, %28 : vector<48x48xf32>
    %cst_90 = arith.constant dense<0xFF800000> : vector<48xf32>
    %252 = vector.multi_reduction <maximumf>, %251, %cst_90 [1] : vector<48x48xf32> to vector<48xf32>
    %253 = vector.shape_cast %252 : vector<48xf32> to vector<48x1xf32>
    %254 = vector.broadcast %253 : vector<48x1xf32> to vector<48x48xf32>
    %255 = arith.subf %251, %254 : vector<48x48xf32>
    %256 = math.exp %255 : vector<48x48xf32>
    %cst_91 = arith.constant dense<0.000000e+00> : vector<48xf32>
    %257 = vector.multi_reduction <add>, %256, %cst_91 [1] : vector<48x48xf32> to vector<48xf32>
    %258 = vector.shape_cast %257 : vector<48xf32> to vector<48x1xf32>
    %259 = tpu.reciprocal %258 {approx = true} : vector<48x1xf32> -> vector<48x1xf32>
    %260 = vector.broadcast %259 : vector<48x1xf32> to vector<48x48xf32>
    %261 = arith.mulf %256, %260 : vector<48x48xf32>
    %262 = arith.truncf %261 : vector<48x48xf32> to vector<48x48xbf16>
    %cst_92 = arith.constant dense<0.000000e+00> : vector<48x8xf32>
    %263 = tpu.matmul %262, %249, %cst_92 {dimension_numbers = #tpu.dot_dimension_numbers<[1], [0], [0], [1], [0, 0, 1, 1], [], []>} : vector<48x48xbf16>, vector<48x8xbf16>, vector<48x8xf32> -> vector<48x8xf32>
    %264 = vector.extract_strided_slice %223 {offsets = [0, 16], sizes = [48, 8], strides = [1, 1]} : vector<48x96xf32> to vector<48x8xf32>
    %265 = arith.truncf %264 : vector<48x8xf32> to vector<48x8xbf16>
    %266 = vector.extract_strided_slice %223 {offsets = [0, 48], sizes = [48, 8], strides = [1, 1]} : vector<48x96xf32> to vector<48x8xf32>
    %267 = arith.truncf %266 : vector<48x8xf32> to vector<48x8xbf16>
    %268 = vector.extract_strided_slice %223 {offsets = [0, 80], sizes = [48, 8], strides = [1, 1]} : vector<48x96xf32> to vector<48x8xf32>
    %269 = arith.truncf %268 : vector<48x8xf32> to vector<48x8xbf16>
    %cst_93 = arith.constant dense<0.000000e+00> : vector<48x48xf32>
    %270 = tpu.matmul %265, %267, %cst_93 {dimension_numbers = #tpu.dot_dimension_numbers<[1], [1], [0], [0], [0, 0, 1, 0], [], []>} : vector<48x8xbf16>, vector<48x8xbf16>, vector<48x48xf32> -> vector<48x48xf32>
    %271 = arith.addf %270, %28 : vector<48x48xf32>
    %cst_94 = arith.constant dense<0xFF800000> : vector<48xf32>
    %272 = vector.multi_reduction <maximumf>, %271, %cst_94 [1] : vector<48x48xf32> to vector<48xf32>
    %273 = vector.shape_cast %272 : vector<48xf32> to vector<48x1xf32>
    %274 = vector.broadcast %273 : vector<48x1xf32> to vector<48x48xf32>
    %275 = arith.subf %271, %274 : vector<48x48xf32>
    %276 = math.exp %275 : vector<48x48xf32>
    %cst_95 = arith.constant dense<0.000000e+00> : vector<48xf32>
    %277 = vector.multi_reduction <add>, %276, %cst_95 [1] : vector<48x48xf32> to vector<48xf32>
    %278 = vector.shape_cast %277 : vector<48xf32> to vector<48x1xf32>
    %279 = tpu.reciprocal %278 {approx = true} : vector<48x1xf32> -> vector<48x1xf32>
    %280 = vector.broadcast %279 : vector<48x1xf32> to vector<48x48xf32>
    %281 = arith.mulf %276, %280 : vector<48x48xf32>
    %282 = arith.truncf %281 : vector<48x48xf32> to vector<48x48xbf16>
    %cst_96 = arith.constant dense<0.000000e+00> : vector<48x8xf32>
    %283 = tpu.matmul %282, %269, %cst_96 {dimension_numbers = #tpu.dot_dimension_numbers<[1], [0], [0], [1], [0, 0, 1, 1], [], []>} : vector<48x48xbf16>, vector<48x8xbf16>, vector<48x8xf32> -> vector<48x8xf32>
    %284 = vector.extract_strided_slice %223 {offsets = [0, 24], sizes = [48, 8], strides = [1, 1]} : vector<48x96xf32> to vector<48x8xf32>
    %285 = arith.truncf %284 : vector<48x8xf32> to vector<48x8xbf16>
    %286 = vector.extract_strided_slice %223 {offsets = [0, 56], sizes = [48, 8], strides = [1, 1]} : vector<48x96xf32> to vector<48x8xf32>
    %287 = arith.truncf %286 : vector<48x8xf32> to vector<48x8xbf16>
    %288 = vector.extract_strided_slice %223 {offsets = [0, 88], sizes = [48, 8], strides = [1, 1]} : vector<48x96xf32> to vector<48x8xf32>
    %289 = arith.truncf %288 : vector<48x8xf32> to vector<48x8xbf16>
    %cst_97 = arith.constant dense<0.000000e+00> : vector<48x48xf32>
    %290 = tpu.matmul %285, %287, %cst_97 {dimension_numbers = #tpu.dot_dimension_numbers<[1], [1], [0], [0], [0, 0, 1, 0], [], []>} : vector<48x8xbf16>, vector<48x8xbf16>, vector<48x48xf32> -> vector<48x48xf32>
    %291 = arith.addf %290, %28 : vector<48x48xf32>
    %cst_98 = arith.constant dense<0xFF800000> : vector<48xf32>
    %292 = vector.multi_reduction <maximumf>, %291, %cst_98 [1] : vector<48x48xf32> to vector<48xf32>
    %293 = vector.shape_cast %292 : vector<48xf32> to vector<48x1xf32>
    %294 = vector.broadcast %293 : vector<48x1xf32> to vector<48x48xf32>
    %295 = arith.subf %291, %294 : vector<48x48xf32>
    %296 = math.exp %295 : vector<48x48xf32>
    %cst_99 = arith.constant dense<0.000000e+00> : vector<48xf32>
    %297 = vector.multi_reduction <add>, %296, %cst_99 [1] : vector<48x48xf32> to vector<48xf32>
    %298 = vector.shape_cast %297 : vector<48xf32> to vector<48x1xf32>
    %299 = tpu.reciprocal %298 {approx = true} : vector<48x1xf32> -> vector<48x1xf32>
    %300 = vector.broadcast %299 : vector<48x1xf32> to vector<48x48xf32>
    %301 = arith.mulf %296, %300 : vector<48x48xf32>
    %302 = arith.truncf %301 : vector<48x48xf32> to vector<48x48xbf16>
    %cst_100 = arith.constant dense<0.000000e+00> : vector<48x8xf32>
    %303 = tpu.matmul %302, %289, %cst_100 {dimension_numbers = #tpu.dot_dimension_numbers<[1], [0], [0], [1], [0, 0, 1, 1], [], []>} : vector<48x48xbf16>, vector<48x8xbf16>, vector<48x8xf32> -> vector<48x8xf32>
    %304 = tpu.concatenate %243, %263, %283, %303 in 1 : vector<48x8xf32>, vector<48x8xf32>, vector<48x8xf32>, vector<48x8xf32> -> vector<48x32xf32>
    %305 = arith.truncf %304 : vector<48x32xf32> to vector<48x32xbf16>
    %c1_101 = arith.constant 1 : index
    %c0_102 = arith.constant 0 : index
    %c0_103 = arith.constant 0 : index
    %306 = vector.load %arg7[%c1_101, %c0_102, %c0_103] : memref<2x32x32xbf16, #tpu.memory_space<vmem>>, vector<1x32x32xbf16>
    %307 = vector.shape_cast %306 : vector<1x32x32xbf16> to vector<32x32xbf16>
    %cst_104 = arith.constant dense<0.000000e+00> : vector<48x32xf32>
    %308 = tpu.matmul %305, %307, %cst_104 {dimension_numbers = #tpu.dot_dimension_numbers<[1], [0], [0], [1], [0, 0, 1, 1], [], []>} : vector<48x32xbf16>, vector<32x32xbf16>, vector<48x32xf32> -> vector<48x32xf32>
    %309 = arith.addf %193, %308 : vector<48x32xf32>
    %c14 = arith.constant 14 : index
    %c0_105 = arith.constant 0 : index
    %310 = vector.load %arg4[%c14, %c0_105] : memref<16x32xf32, #tpu.memory_space<vmem>>, vector<1x32xf32>
    %311 = vector.broadcast %310 : vector<1x32xf32> to vector<48x32xf32>
    %312 = arith.addf %309, %311 : vector<48x32xf32>
    %c12 = arith.constant 12 : index
    %c0_106 = arith.constant 0 : index
    %313 = vector.load %arg4[%c12, %c0_106] : memref<16x32xf32, #tpu.memory_space<vmem>>, vector<1x32xf32>
    %c13 = arith.constant 13 : index
    %c0_107 = arith.constant 0 : index
    %314 = vector.load %arg4[%c13, %c0_107] : memref<16x32xf32, #tpu.memory_space<vmem>>, vector<1x32xf32>
    %cst_108 = arith.constant dense<0.000000e+00> : vector<48xf32>
    %315 = vector.multi_reduction <add>, %312, %cst_108 [1] : vector<48x32xf32> to vector<48xf32>
    %316 = vector.shape_cast %315 : vector<48xf32> to vector<48x1xf32>
    %cst_109 = arith.constant 3.200000e+01 : f32
    %317 = vector.broadcast %cst_109 : f32 to vector<48x1xf32>
    %318 = arith.divf %316, %317 : vector<48x1xf32>
    %319 = vector.broadcast %318 : vector<48x1xf32> to vector<48x32xf32>
    %320 = arith.subf %312, %319 : vector<48x32xf32>
    %321 = arith.mulf %320, %320 : vector<48x32xf32>
    %cst_110 = arith.constant dense<0.000000e+00> : vector<48xf32>
    %322 = vector.multi_reduction <add>, %321, %cst_110 [1] : vector<48x32xf32> to vector<48xf32>
    %323 = vector.shape_cast %322 : vector<48xf32> to vector<48x1xf32>
    %cst_111 = arith.constant 3.200000e+01 : f32
    %324 = vector.broadcast %cst_111 : f32 to vector<48x1xf32>
    %325 = arith.divf %323, %324 : vector<48x1xf32>
    %cst_112 = arith.constant 9.99999974E-6 : f32
    %326 = vector.broadcast %cst_112 : f32 to vector<48x1xf32>
    %327 = arith.addf %325, %326 : vector<48x1xf32>
    %328 = math.rsqrt %327 : vector<48x1xf32>
    %329 = vector.broadcast %328 : vector<48x1xf32> to vector<48x32xf32>
    %330 = arith.mulf %320, %329 : vector<48x32xf32>
    %331 = vector.broadcast %313 : vector<1x32xf32> to vector<48x32xf32>
    %332 = arith.mulf %330, %331 : vector<48x32xf32>
    %333 = vector.broadcast %314 : vector<1x32xf32> to vector<48x32xf32>
    %334 = arith.addf %332, %333 : vector<48x32xf32>
    %335 = arith.truncf %334 : vector<48x32xf32> to vector<48x32xbf16>
    %c1_113 = arith.constant 1 : index
    %c0_114 = arith.constant 0 : index
    %c0_115 = arith.constant 0 : index
    %336 = vector.load %arg8[%c1_113, %c0_114, %c0_115] : memref<2x32x128xbf16, #tpu.memory_space<vmem>>, vector<1x32x128xbf16>
    %337 = vector.shape_cast %336 : vector<1x32x128xbf16> to vector<32x128xbf16>
    %cst_116 = arith.constant dense<0.000000e+00> : vector<48x128xf32>
    %338 = tpu.matmul %335, %337, %cst_116 {dimension_numbers = #tpu.dot_dimension_numbers<[1], [0], [0], [1], [0, 0, 1, 1], [], []>} : vector<48x32xbf16>, vector<32x128xbf16>, vector<48x128xf32> -> vector<48x128xf32>
    %c1_117 = arith.constant 1 : index
    %c0_118 = arith.constant 0 : index
    %c0_119 = arith.constant 0 : index
    %339 = vector.load %arg9[%c1_117, %c0_118, %c0_119] : memref<2x1x128xf32, #tpu.memory_space<vmem>>, vector<1x1x128xf32>
    %340 = vector.shape_cast %339 : vector<1x1x128xf32> to vector<1x128xf32>
    %341 = vector.broadcast %340 : vector<1x128xf32> to vector<48x128xf32>
    %342 = arith.addf %338, %341 : vector<48x128xf32>
    %cst_120 = arith.constant 1.702000e+00 : f32
    %343 = vector.broadcast %cst_120 : f32 to vector<48x128xf32>
    %344 = arith.mulf %343, %342 : vector<48x128xf32>
    %345 = arith.negf %344 : vector<48x128xf32>
    %346 = math.exp %345 : vector<48x128xf32>
    %cst_121 = arith.constant 1.000000e+00 : f32
    %347 = vector.broadcast %cst_121 : f32 to vector<48x128xf32>
    %348 = arith.addf %347, %346 : vector<48x128xf32>
    %349 = arith.divf %347, %348 : vector<48x128xf32>
    %350 = arith.mulf %342, %349 : vector<48x128xf32>
    %351 = arith.truncf %350 : vector<48x128xf32> to vector<48x128xbf16>
    %c1_122 = arith.constant 1 : index
    %c0_123 = arith.constant 0 : index
    %c0_124 = arith.constant 0 : index
    %352 = vector.load %arg10[%c1_122, %c0_123, %c0_124] : memref<2x128x32xbf16, #tpu.memory_space<vmem>>, vector<1x128x32xbf16>
    %353 = vector.shape_cast %352 : vector<1x128x32xbf16> to vector<128x32xbf16>
    %cst_125 = arith.constant dense<0.000000e+00> : vector<48x32xf32>
    %354 = tpu.matmul %351, %353, %cst_125 {dimension_numbers = #tpu.dot_dimension_numbers<[1], [0], [0], [1], [0, 0, 1, 1], [], []>} : vector<48x128xbf16>, vector<128x32xbf16>, vector<48x32xf32> -> vector<48x32xf32>
    %355 = arith.addf %312, %354 : vector<48x32xf32>
    %c15 = arith.constant 15 : index
    %c0_126 = arith.constant 0 : index
    %356 = vector.load %arg4[%c15, %c0_126] : memref<16x32xf32, #tpu.memory_space<vmem>>, vector<1x32xf32>
    %357 = vector.broadcast %356 : vector<1x32xf32> to vector<48x32xf32>
    %358 = arith.addf %355, %357 : vector<48x32xf32>
    %359 = vector.extract_strided_slice %358 {offsets = [0, 0], sizes = [1, 32], strides = [1, 1]} : vector<48x32xf32> to vector<1x32xf32>
    %360 = vector.extract_strided_slice %358 {offsets = [24, 0], sizes = [1, 32], strides = [1, 1]} : vector<48x32xf32> to vector<1x32xf32>
    %361 = tpu.concatenate %359, %360 in 0 : vector<1x32xf32>, vector<1x32xf32> -> vector<2x32xf32>
    %c2 = arith.constant 2 : index
    %c0_127 = arith.constant 0 : index
    %362 = vector.load %arg4[%c2, %c0_127] : memref<16x32xf32, #tpu.memory_space<vmem>>, vector<1x32xf32>
    %c3 = arith.constant 3 : index
    %c0_128 = arith.constant 0 : index
    %363 = vector.load %arg4[%c3, %c0_128] : memref<16x32xf32, #tpu.memory_space<vmem>>, vector<1x32xf32>
    %cst_129 = arith.constant dense<0.000000e+00> : vector<2xf32>
    %364 = vector.multi_reduction <add>, %361, %cst_129 [1] : vector<2x32xf32> to vector<2xf32>
    %365 = vector.shape_cast %364 : vector<2xf32> to vector<2x1xf32>
    %cst_130 = arith.constant 3.200000e+01 : f32
    %366 = vector.broadcast %cst_130 : f32 to vector<2x1xf32>
    %367 = arith.divf %365, %366 : vector<2x1xf32>
    %368 = vector.broadcast %367 : vector<2x1xf32> to vector<2x32xf32>
    %369 = arith.subf %361, %368 : vector<2x32xf32>
    %370 = arith.mulf %369, %369 : vector<2x32xf32>
    %cst_131 = arith.constant dense<0.000000e+00> : vector<2xf32>
    %371 = vector.multi_reduction <add>, %370, %cst_131 [1] : vector<2x32xf32> to vector<2xf32>
    %372 = vector.shape_cast %371 : vector<2xf32> to vector<2x1xf32>
    %cst_132 = arith.constant 3.200000e+01 : f32
    %373 = vector.broadcast %cst_132 : f32 to vector<2x1xf32>
    %374 = arith.divf %372, %373 : vector<2x1xf32>
    %cst_133 = arith.constant 9.99999974E-6 : f32
    %375 = vector.broadcast %cst_133 : f32 to vector<2x1xf32>
    %376 = arith.addf %374, %375 : vector<2x1xf32>
    %377 = math.rsqrt %376 : vector<2x1xf32>
    %378 = vector.broadcast %377 : vector<2x1xf32> to vector<2x32xf32>
    %379 = arith.mulf %369, %378 : vector<2x32xf32>
    %380 = vector.broadcast %362 : vector<1x32xf32> to vector<2x32xf32>
    %381 = arith.mulf %379, %380 : vector<2x32xf32>
    %382 = vector.broadcast %363 : vector<1x32xf32> to vector<2x32xf32>
    %383 = arith.addf %381, %382 : vector<2x32xf32>
    %384 = arith.truncf %383 : vector<2x32xf32> to vector<2x32xbf16>
    %c0_134 = arith.constant 0 : index
    %c0_135 = arith.constant 0 : index
    %385 = vector.load %arg11[%c0_134, %c0_135] : memref<32x16xbf16, #tpu.memory_space<vmem>>, vector<32x16xbf16>
    %cst_136 = arith.constant dense<0.000000e+00> : vector<2x16xf32>
    %386 = tpu.matmul %384, %385, %cst_136 {dimension_numbers = #tpu.dot_dimension_numbers<[1], [0], [0], [1], [0, 0, 1, 1], [], []>} : vector<2x32xbf16>, vector<32x16xbf16>, vector<2x16xf32> -> vector<2x16xf32>
    %c0_137 = arith.constant 0 : index
    %c0_138 = arith.constant 0 : index
    %387 = vector.load %arg12[%c0_137, %c0_138] : memref<2x16xf32, #tpu.memory_space<vmem>>, vector<2x16xf32>
    tpu.vector_store %arg12[%c0_137, %c0_138], %386 {strides = array<i32>} : memref<2x16xf32, #tpu.memory_space<vmem>>, vector<2x16xf32>,
    return
  }
}

</mosaic_0001>

<bundles_post_ra>
// kernel: vit_forward.1
= control target key start
LH: loop header
LB: loop body
LE: loop exit
PB: predicated region body
PF: predicated region fallthrough
CT: control target
= control target key end

     0   :  { %v5003_v1 = vmov 0.0   ;;  %vm5004_vm0 = vmmov 0   ;;  %vm82_vm1 = vcmask 392192   ;;  %s6735_s0 = inlined_call_operand.vmem [shape: f32[48,48], index: 0, kind: input, shape index: {}]   ;;  %s6736_s1 = inlined_call_operand.vmem [shape: bf16[48,32], index: 1, kind: input, shape index: {}]   ;;  %s6737_s2 = inlined_call_operand.vmem [shape: f32[48,32], index: 2, kind: input, shape index: {}]   ;;  %s6738_s3 = inlined_call_operand.vmem [shape: f32[48,48], index: 3, kind: input, shape index: {}]   ;;  %s6739_s4 = inlined_call_operand.vmem [shape: f32[16,32], index: 4, kind: input, shape index: {}]   ;;  %s6740_s5 = inlined_call_operand.vmem [shape: bf16[2,32,96], index: 5, kind: input, shape index: {}]   ;;  %s6741_s6 = inlined_call_operand.vmem [shape: f32[2,1,96], index: 6, kind: input, shape index: {}]   ;;  %s6742_s7 = inlined_call_operand.vmem [shape: bf16[2,32,32], index: 7, kind: input, shape index: {}]   ;;  %s6743_s8 = inlined_call_operand.vmem [shape: bf16[2,32,128], index: 8, kind: input, shape index: {}]   ;;  %s6744_s9 = inlined_call_operand.vmem [shape: f32[2,1,128], index: 9, kind: input, shape index: {}]   ;;  %s6745_s10 = inlined_call_operand.vmem [shape: bf16[2,128,32], index: 10, kind: input, shape index: {}]   ;;  %s6746_s11 = inlined_call_operand.vmem [shape: bf16[32,16], index: 11, kind: input, shape index: {}]   ;;  %s6747_s12 = inlined_call_operand.hbm [shape: f32[2,16], index: 12, kind: output, shape index: {}]  }
   0x1   :  { %v4640_v0 = vld [vmem:[%s6736_s1 + $0x10] sm:$0xff]   ;;  %4061 = vmatprep.subr.bf16.mxu0 %v5003_v1  ;;  %4527 = vmatprep.subr.bf16.mxu1 %v5003_v1  ;;  %v4641_v2 = vld [vmem:[%s6736_s1 + $0x8] sm:$0xff]   ;;  %v4642_v3 = vld [vmem:[%s6736_s1] sm:$0xff]  }
   0x2   :  { %4062 = vmatpush3.bf16.msra.mxu0 %v4640_v0  ;;  %4530 = vmatpush3.bf16.msra.mxu1 %v4640_v0  ;;  %v43_v4 = vld [vmem:[%s6735_s0] sm:$0xff]  ;;  %v44_v5 = vld [vmem:[%s6735_s0 + $0x8] sm:$0xff]  ;;  %v45_v10 = vld [vmem:[%s6735_s0 + $0x10] sm:$0xff] }
   0x3   :  { %4063 = vmatprep.subr.bf16.mxu0 %v5003_v1  ;;  %4067 = vmatprep.mubr.msk.bf16.mxu0 %vm5004_vm0, %v5003_v1  ;;  %v47_v6 = vld [vmem:[%s6735_s0 + $0x20] sm:$0xff]  ;;  %v48_v7 = vld [vmem:[%s6735_s0 + $0x28] sm:$0xff]  ;;  %v49_v8 = vpack.c.bf16 %v44_v5, %v43_v4  ;;  %v46_v11 = vld [vmem:[%s6735_s0 + $0x18] sm:$0xff] }
   0x4   :  { %4528 = vmatprep.subr.bf16.mxu1 %v5003_v1  ;;  %4075 = vmatprep.mubr.msk.bf16.mxu1 %vm5004_vm0, %v5003_v1  ;;  %v51_v9 = vpack.c.bf16 %v48_v7, %v47_v6  ;;  %v50_v12 = vpack.c.bf16 %v46_v11, %v45_v10 }
   0x6   :  { %4064 = vmatpush3.bf16.msra.mxu0 %v4641_v2  ;;  %4531 = vmatpush3.bf16.msra.mxu1 %v4641_v2 }
   0x7   :  { %4065 = vmatprep.subr.bf16.mxu0 %v5003_v1  ;;  %4529 = vmatprep.subr.bf16.mxu1 %v5003_v1 }
   0xa   :  { %4066 = vmatpush3.bf16.msra.mxu0 %v4642_v3  ;;  %4532 = vmatpush3.bf16.msra.mxu1 %v4642_v3 }
   0xb   :  { %4079 = vmatprep.subr.bf16.mxu1 %v5003_v1  ;;  %4113 = vmatprep.subr.bf16.mxu0 %v5003_v1 }
   0xd   :  { %4068 = vmatmul.mubr.msk.bf16.vlgmr.msra.gmra.mxu0 %vm82_vm1, %v49_v8  ;;  %4076 = vmatmul.mubr.msk.bf16.vlgmr.msra.gmra.mxu1 %vm82_vm1, %v51_v9 }
   0xe   :  { %4071 = vmatprep.mubr.msk.bf16.mxu0 %vm5004_vm0, %v5003_v1  ;;  %4083 = vmatprep.mubr.msk.bf16.mxu1 %vm5004_vm0, %v5003_v1 }
  0x15   :  { %4072 = vmatmul.mubr.msk.bf16.gmra.mxu0 %vm82_vm1, %v50_v12 }
  0x16   :  { %4119 = vmatprep.mubr.msk.bf16.mxu0 %vm5004_vm0, %v5003_v1 }
  0x17   :  { %17 = vsyncpa [#allocation3], 0  ;;  %v58_v13 = vld [vmem:[%s6737_s2] sm:$0xff]  ;;  %vm151_vm2 = vcmask 261120   ;;  %v59_v18 = vld [vmem:[%s6737_s2 + $0x8] sm:$0xff]  ;;  %s5005_s24 = smov 96  }
  0x18   :  { %v62_v19 = vld [vmem:[%s6737_s2 + $0x20] sm:$0xff]  ;;  %v60_v27 = vld [vmem:[%s6737_s2 + $0x10] sm:$0xff]  ;;  %v61_v34 = vld [vmem:[%s6737_s2 + $0x18] sm:$0xff]  ;;  %s5006_s25 = smov 88   ;;  %s5007_s26 = smov 80   ;;  %vm461_vm3 = vcmask 64512  }
  0x19   :  { %v63_v35 = vld [vmem:[%s6737_s2 + $0x28] sm:$0xff]  ;;  %s5008_s27 = smov 120   ;;  %s5009_s28 = smov 72   ;;  %vm1452_vm4 = vcmask 130048   ;;  %vm1459_vm5 = vcmask 195584   ;;  %vm3635_vm6 = vcmask 1040384  }
  0x1a   :  { %s5010_s29 = smov 112   ;;  %s5011_s30 = smov 104   ;;  %vm3639_vm7 = vcmask 254976   ;;  %vm3723_vm8 = vcmask 123904  }
  0x1b   :  { %s5012_s2 = smov 64   ;;  %s5013_s13 = smov 56  }
  0x1c   :  { %s5014_s14 = smov 48   ;;  %s5015_s15 = smov 40  }
  0x1d   :  { %s5016_s1 = smov 8   ;;  %s5017_s20 = smov 16  }
  0x1e   :  { %s5018_s21 = smov 24  }
  0xcd   :  { %v126_v14 = vpop.f32.mrf.mxu0  ;;  %v142_v15 = vpop.f32.mrf.mxu1 }
  0xce   :  { %v127_v16 = vadd.f32 %v126_v14, %v58_v13  ;;  %v143_v25 = vadd.f32 %v142_v15, %v62_v19 }
  0xcf   :  { %v4069_v17 = vpop.f32.mrf.mxu0  ;;  %v4077_v20 = vpop.f32.mrf.mxu1 }
  0xd0   :  { %v152_v21 = vsel %vm151_vm2, %v127_v16, 0.0  ;;  %v164_v32 = vsel %vm151_vm2, %v143_v25, 0.0 }
  0xd1   :  { %153 = vadd.xlane.f32.xlu0 %v152_v21  ;;  %v129_v22 = vpop.f32.mrf.mxu0  ;;  %v145_v23 = vpop.f32.mrf.mxu1 }
  0xd2   :  { %v130_v24 = vadd.f32 %v129_v22, %v59_v18  ;;  %v146_v39 = vadd.f32 %v145_v23, %v63_v35 }
  0xd3   :  { %v4070_v26 = vpop.f32.mrf.mxu0  ;;  %v4078_v28 = vpop.f32.mrf.mxu1 }
  0xd4   :  { %v155_v29 = vsel %vm151_vm2, %v130_v24, 0.0  ;;  %v167_v42 = vsel %vm151_vm2, %v146_v39, 0.0  ;;  %v3745_v28 = vld [vmem:[%s6739_s4] ss:$0 sm:$0xff] }
  0xd5   :  { %156 = vadd.xlane.f32.xlu0 %v155_v29  ;;  %v134_v30 = vpop.f32.mrf.mxu0 }
  0xd6   :  { %v135_v31 = vadd.f32 %v134_v30, %v60_v27 }
  0xd7   :  { %v4073_v33 = vpop.f32.mrf.mxu0 }
  0xd8   :  { %v158_v36 = vsel %vm151_vm2, %v135_v31, 0.0 }
  0xd9   :  { %165 = vadd.xlane.f32.xlu0 %v164_v32  ;;  %159 = vadd.xlane.f32.xlu1 %v158_v36  ;;  %v137_v37 = vpop.f32.mrf.mxu0 }
  0xda   :  { %v138_v38 = vadd.f32 %v137_v37, %v61_v34 }
  0xdb   :  { %v4074_v40 = vpop.f32.mrf.mxu0 }
  0xdc   :  { %v161_v41 = vsel %vm151_vm2, %v138_v38, 0.0 }
  0xdd   :  { %162 = vadd.xlane.f32.xlu1 %v161_v41 }
  0xe1   :  { %168 = vadd.xlane.f32.xlu1 %v167_v42 }
 0x15a   :  { %v154_v43 = vpop.xlane.xlu0 %153 }
 0x15b   :  { %v171_v44 = vmul.f32 0.03125, %v154_v43 }
 0x15d   :  { %v177_v45 = vsub.f32 %v127_v16, %v171_v44 }
 0x15e   :  { %v157_v46 = vpop.xlane.xlu0 %156 }
 0x15f   :  { %v172_v47 = vmul.f32 0.03125, %v157_v46  ;;  %v183_v48 = vmul.f32 %v177_v45, %v177_v45 }
 0x161   :  { %v178_v49 = vsub.f32 %v130_v24, %v172_v47  ;;  %v189_v50 = vsel %vm151_vm2, %v183_v48, 0.0 }
 0x162   :  { %190 = vadd.xlane.f32.xlu0 %v189_v50  ;;  %v166_v51 = vpop.xlane.xlu0 %165  ;;  %v160_v52 = vpop.xlane.xlu1 %159 }
 0x163   :  { %v175_v53 = vmul.f32 0.03125, %v166_v51  ;;  %v173_v54 = vmul.f32 0.03125, %v160_v52  ;;  %v184_v55 = vmul.f32 %v178_v49, %v178_v49 }
 0x165   :  { %v5158_v56 = vsub.f32 %v143_v25, %v175_v53  ;;  %v179_v57 = vsub.f32 %v135_v31, %v173_v54  ;;  %v192_v58 = vsel %vm151_vm2, %v184_v55, 0.0  ;;  %v3746_v31 = vld [vmem:[%s6739_s4 + $0x1] ss:$0 sm:$0xff] }
 0x166   :  { %193 = vadd.xlane.f32.xlu1 %v192_v58  ;;  %v163_v59 = vpop.xlane.xlu1 %162 }
 0x167   :  { %v174_v60 = vmul.f32 0.03125, %v163_v59  ;;  %v185_v61 = vmul.f32 %v179_v57, %v179_v57  ;;  %v187_v0 = vmul.f32 %v5158_v56, %v5158_v56 }
 0x169   :  { %v180_v62 = vsub.f32 %v138_v38, %v174_v60  ;;  %v195_v63 = vsel %vm151_vm2, %v185_v61, 0.0  ;;  %v201_v6 = vsel %vm151_vm2, %v187_v0, 0.0 }
 0x16a   :  { %196 = vadd.xlane.f32.xlu0 %v195_v63  ;;  %v169_v2 = vpop.xlane.xlu1 %168 }
 0x16b   :  { %v176_v3 = vmul.f32 0.03125, %v169_v2  ;;  %v186_v4 = vmul.f32 %v180_v62, %v180_v62 }
 0x16d   :  { %v182_v5 = vsub.f32 %v146_v39, %v176_v3  ;;  %v198_v7 = vsel %vm151_vm2, %v186_v4, 0.0 }
 0x16e   :  { %202 = vadd.xlane.f32.xlu0 %v201_v6  ;;  %199 = vadd.xlane.f32.xlu1 %v198_v7 }
 0x16f   :  { %v188_v8 = vmul.f32 %v182_v5, %v182_v5 }
 0x171   :  { %v204_v9 = vsel %vm151_vm2, %v188_v8, 0.0 }
 0x172   :  { %205 = vadd.xlane.f32.xlu1 %v204_v9 }
 0x1eb   :  { %v191_v10 = vpop.xlane.xlu0 %190 }
 0x1ec   :  { %v207_v11 = vmul.f32 0.03125, %v191_v10 }
 0x1ee   :  { %v213_v12 = vadd.f32 1e-05, %v207_v11 }
 0x1ef   :  { %v194_v13 = vpop.xlane.xlu1 %193 }
 0x1f0   :  { %4673 = vrsqrt.f32 %v213_v12  ;;  %v208_v14 = vmul.f32 0.03125, %v194_v13 }
 0x1f2   :  { %v214_v15 = vadd.f32 1e-05, %v208_v14 }
 0x1f3   :  { %v197_v16 = vpop.xlane.xlu0 %196 }
 0x1f4   :  { %4675 = vrsqrt.f32 %v214_v15  ;;  %v209_v17 = vmul.f32 0.03125, %v197_v16 }
 0x1f6   :  { %v215_v18 = vadd.f32 1e-05, %v209_v17 }
 0x1f7   :  { %v203_v19 = vpop.xlane.xlu0 %202  ;;  %v200_v20 = vpop.xlane.xlu1 %199 }
 0x1f8   :  { %4677 = vrsqrt.f32 %v215_v18  ;;  %v211_v21 = vmul.f32 0.03125, %v203_v19  ;;  %v210_v22 = vmul.f32 0.03125, %v200_v20 }
 0x1fa   :  { %v217_v23 = vadd.f32 1e-05, %v211_v21  ;;  %v216_v24 = vadd.f32 1e-05, %v210_v22 }
 0x1fb   :  { %v206_v25 = vpop.xlane.xlu1 %205 }
 0x1fc   :  { %4679 = vrsqrt.f32 %v217_v23  ;;  %v212_v26 = vmul.f32 0.03125, %v206_v25 }
 0x1fd   :  { %v4674_v27 = vpop.eup %4673  ;;  %4681 = vrsqrt.f32 %v216_v24 }
 0x1fe   :  { %v218_v29 = vadd.f32 1e-05, %v212_v26  ;;  %v225_v30 = vmul.f32 %v4674_v27, %v177_v45  ;;  %v4643_v27 = vld [vmem:[%s6740_s5 + $0x8] sm:$0xff]  }
 0x1ff   :  { %4080 = vmatpush3.bf16.msra.mxu1 %v4643_v27 }
 0x200   :  { %4683 = vrsqrt.f32 %v218_v29  ;;  %v235_v32 = vmul.f32 %v3745_v28, %v225_v30  ;;  %4081 = vmatprep.subr.bf16.mxu1 %v5003_v1 }
 0x201   :  { %v4676_v33 = vpop.eup %4675 }
 0x202   :  { %v5173_v34 = vadd.f32 %v3746_v31, %v235_v32  ;;  %v226_v35 = vmul.f32 %v4676_v33, %v178_v49 }
 0x204   :  { %v259_v36 = vsel %vm151_vm2, %v5173_v34, 0.0  ;;  %v236_v37 = vmul.f32 %v3745_v28, %v226_v35 }
 0x205   :  { %v4678_v38 = vpop.eup %4677  ;;  %260 = vadd.xlane.f32.xlu0 %v259_v36 }
 0x206   :  { %v5177_v39 = vadd.f32 %v3746_v31, %v236_v37  ;;  %v227_v40 = vmul.f32 %v4678_v38, %v179_v57 }
 0x208   :  { %v262_v41 = vsel %vm151_vm2, %v5177_v39, 0.0  ;;  %v237_v42 = vmul.f32 %v3745_v28, %v227_v40 }
 0x209   :  { %v4680_v43 = vpop.eup %4679  ;;  %263 = vadd.xlane.f32.xlu1 %v262_v41 }
 0x20a   :  { %v4682_v44 = vpop.eup %4681  ;;  %v5181_v45 = vadd.f32 %v3746_v31, %v237_v42  ;;  %v229_v46 = vmul.f32 %v4680_v43, %v5158_v56 }
 0x20b   :  { %v228_v47 = vmul.f32 %v4682_v44, %v180_v62 }
 0x20c   :  { %v265_v48 = vsel %vm151_vm2, %v5181_v45, 0.0  ;;  %v239_v49 = vmul.f32 %v3745_v28, %v229_v46 }
 0x20d   :  { %v4684_v50 = vpop.eup %4683  ;;  %266 = vadd.xlane.f32.xlu0 %v265_v48  ;;  %v238_v51 = vmul.f32 %v3745_v28, %v228_v47 }
 0x20e   :  { %v5186_v52 = vadd.f32 %v3746_v31, %v239_v49  ;;  %v230_v53 = vmul.f32 %v4684_v50, %v182_v5 }
 0x20f   :  { %v5188_v54 = vadd.f32 %v3746_v31, %v238_v51 }
 0x210   :  { %v271_v55 = vsel %vm151_vm2, %v5186_v52, 0.0  ;;  %v240_v57 = vmul.f32 %v3745_v28, %v230_v53  ;;  %v4644_v28 = vld [vmem:[%s6740_s5] sm:$0xff]  }
 0x211   :  { %272 = vadd.xlane.f32.xlu0 %v271_v55  ;;  %v268_v56 = vsel %vm151_vm2, %v5188_v54, 0.0  ;;  %4082 = vmatpush3.bf16.msra.mxu1 %v4644_v28  ;;  %v3747_v53 = vld [vmem:[%s6739_s4 + $0x4] ss:$0 sm:$0xff] }
 0x212   :  { %269 = vadd.xlane.f32.xlu1 %v268_v56  ;;  %v5194_v58 = vadd.f32 %v3746_v31, %v240_v57  ;;  %4095 = vmatprep.subr.bf16.mxu1 %v5003_v1 }
 0x214   :  { %v274_v59 = vsel %vm151_vm2, %v5194_v58, 0.0 }
 0x216   :  { %275 = vadd.xlane.f32.xlu1 %v274_v59  ;;  %v3748_v59 = vld [vmem:[%s6739_s4 + $0x5] ss:$0 sm:$0xff] }
 0x28e   :  { %v261_v60 = vpop.xlane.xlu0 %260 }
 0x28f   :  { %v277_v61 = vmul.f32 0.03125, %v261_v60 }
 0x291   :  { %v283_v62 = vsub.f32 %v5173_v34, %v277_v61 }
 0x292   :  { %v264_v63 = vpop.xlane.xlu1 %263 }
 0x293   :  { %v278_v0 = vmul.f32 0.03125, %v264_v63  ;;  %v289_v2 = vmul.f32 %v283_v62, %v283_v62 }
 0x295   :  { %v5200_v3 = vsub.f32 %v5177_v39, %v278_v0  ;;  %v295_v4 = vsel %vm151_vm2, %v289_v2, 0.0 }
 0x296   :  { %296 = vadd.xlane.f32.xlu0 %v295_v4  ;;  %v267_v5 = vpop.xlane.xlu0 %266 }
 0x297   :  { %v279_v6 = vmul.f32 0.03125, %v267_v5  ;;  %v290_v7 = vmul.f32 %v5200_v3, %v5200_v3 }
 0x299   :  { %v5206_v8 = vsub.f32 %v5181_v45, %v279_v6  ;;  %v298_v9 = vsel %vm151_vm2, %v290_v7, 0.0 }
 0x29a   :  { %v273_v10 = vpop.xlane.xlu0 %272  ;;  %299 = vadd.xlane.f32.xlu1 %v298_v9 }
 0x29b   :  { %v281_v11 = vmul.f32 0.03125, %v273_v10  ;;  %v270_v12 = vpop.xlane.xlu1 %269  ;;  %v291_v13 = vmul.f32 %v5206_v8, %v5206_v8 }
 0x29c   :  { %v280_v14 = vmul.f32 0.03125, %v270_v12 }
 0x29d   :  { %v5212_v15 = vsub.f32 %v5186_v52, %v281_v11  ;;  %v301_v16 = vsel %vm151_vm2, %v291_v13, 0.0 }
 0x29e   :  { %v286_v17 = vsub.f32 %v5188_v54, %v280_v14  ;;  %302 = vadd.xlane.f32.xlu0 %v301_v16 }
 0x29f   :  { %v276_v18 = vpop.xlane.xlu1 %275  ;;  %v293_v19 = vmul.f32 %v5212_v15, %v5212_v15 }
 0x2a0   :  { %v282_v20 = vmul.f32 0.03125, %v276_v18  ;;  %v292_v21 = vmul.f32 %v286_v17, %v286_v17 }
 0x2a1   :  { %v307_v22 = vsel %vm151_vm2, %v293_v19, 0.0 }
 0x2a2   :  { %v288_v23 = vsub.f32 %v5194_v58, %v282_v20  ;;  %308 = vadd.xlane.f32.xlu0 %v307_v22  ;;  %v304_v24 = vsel %vm151_vm2, %v292_v21, 0.0 }
 0x2a3   :  { %305 = vadd.xlane.f32.xlu1 %v304_v24 }
 0x2a4   :  { %v294_v25 = vmul.f32 %v288_v23, %v288_v23 }
 0x2a6   :  { %v310_v26 = vsel %vm151_vm2, %v294_v25, 0.0  ;;  %v3749_v25 = vld [vmem:[%s6741_s6] ss:$0 sm:$0xff] }
 0x2a7   :  { %311 = vadd.xlane.f32.xlu1 %v310_v26 }
 0x31f   :  { %v297_v29 = vpop.xlane.xlu0 %296 }
 0x320   :  { %v313_v30 = vmul.f32 0.03125, %v297_v29 }
 0x322   :  { %v319_v31 = vadd.f32 1e-05, %v313_v30 }
 0x323   :  { %v300_v32 = vpop.xlane.xlu1 %299 }
 0x324   :  { %4685 = vrsqrt.f32 %v319_v31  ;;  %v314_v33 = vmul.f32 0.03125, %v300_v32 }
 0x326   :  { %v320_v35 = vadd.f32 1e-05, %v314_v33 }
 0x327   :  { %v303_v36 = vpop.xlane.xlu0 %302 }
 0x328   :  { %4687 = vrsqrt.f32 %v320_v35  ;;  %v315_v37 = vmul.f32 0.03125, %v303_v36 }
 0x32a   :  { %v321_v38 = vadd.f32 1e-05, %v315_v37 }
 0x32b   :  { %v309_v40 = vpop.xlane.xlu0 %308 }
 0x32c   :  { %4689 = vrsqrt.f32 %v321_v38  ;;  %v317_v41 = vmul.f32 0.03125, %v309_v40  ;;  %v306_v42 = vpop.xlane.xlu1 %305 }
 0x32d   :  { %v316_v43 = vmul.f32 0.03125, %v306_v42 }
 0x32e   :  { %v323_v44 = vadd.f32 1e-05, %v317_v41 }
 0x32f   :  { %v322_v46 = vadd.f32 1e-05, %v316_v43 }
 0x330   :  { %v312_v47 = vpop.xlane.xlu1 %311 }
 0x331   :  { %v4686_v48 = vpop.eup %4685  ;;  %4691 = vrsqrt.f32 %v322_v46  ;;  %v318_v49 = vmul.f32 0.03125, %v312_v47 }
 0x332   :  { %v331_v50 = vmul.f32 %v4686_v48, %v283_v62  ;;  %4693 = vrsqrt.f32 %v323_v44 }
 0x333   :  { %v324_v51 = vadd.f32 1e-05, %v318_v49 }
 0x334   :  { %v341_v56 = vmul.f32 %v3747_v53, %v331_v50 }
 0x335   :  { %v4688_v55 = vpop.eup %4687  ;;  %4695 = vrsqrt.f32 %v324_v51 }
 0x336   :  { %v332_v57 = vmul.f32 %v4688_v55, %v5200_v3  ;;  %v351_v63 = vadd.f32 %v3748_v59, %v341_v56 }
 0x338   :  { %v342_v60 = vmul.f32 %v3747_v53, %v332_v57 }
 0x339   :  { %v4690_v61 = vpop.eup %4689 }
 0x33a   :  { %v352_v0 = vadd.f32 %v3748_v59, %v342_v60  ;;  %v333_v62 = vmul.f32 %v4690_v61, %v5206_v8 }
 0x33c   :  { %v357_v2 = vpack.c.bf16 %v352_v0, %v351_v63  ;;  %v343_v3 = vmul.f32 %v3747_v53, %v333_v62 }
 0x33e   :  { %v4692_v4 = vpop.eup %4691  ;;  %4084 = vmatmul.mubr.msk.bf16.vlgmr.msra.gmra.mxu1 %vm151_vm2, %v357_v2  ;;  %v353_v10 = vadd.f32 %v3748_v59, %v343_v3 }
 0x33f   :  { %4087 = vmatprep.mubr.msk.bf16.mxu1 %vm5004_vm0, %v5003_v1  ;;  %v334_v5 = vmul.f32 %v4692_v4, %v286_v17  ;;  %v4694_v6 = vpop.eup %4693 }
 0x340   :  { %v335_v12 = vmul.f32 %v4694_v6, %v5212_v15 }
 0x341   :  { %v344_v7 = vmul.f32 %v3747_v53, %v334_v5 }
 0x342   :  { %v4696_v9 = vpop.eup %4695  ;;  %v345_v8 = vmul.f32 %v3747_v53, %v335_v12 }
 0x343   :  { %v354_v11 = vadd.f32 %v3748_v59, %v344_v7  ;;  %v336_v13 = vmul.f32 %v4696_v9, %v288_v23 }
 0x344   :  { %v355_v19 = vadd.f32 %v3748_v59, %v345_v8 }
 0x345   :  { %v358_v14 = vpack.c.bf16 %v354_v11, %v353_v10  ;;  %v346_v16 = vmul.f32 %v3747_v53, %v336_v13 }
 0x347   :  { %4088 = vmatmul.mubr.msk.bf16.gmra.mxu1 %vm151_vm2, %v358_v14  ;;  %v356_v18 = vadd.f32 %v3748_v59, %v346_v16 }
 0x348   :  { %4091 = vmatprep.mubr.msk.bf16.mxu1 %vm5004_vm0, %v5003_v1 }
 0x349   :  { %v359_v17 = vpack.c.bf16 %v356_v18, %v355_v19 }
 0x34f   :  { %4092 = vmatmul.mubr.msk.bf16.gmra.mxu1 %vm151_vm2, %v359_v17 }
 0x350   :  { %4101 = vmatprep.mubr.msk.bf16.mxu1 %vm5004_vm0, %v5003_v1 }
 0x3fe   :  { %v426_v20 = vpop.f32.mrf.mxu1 }
 0x3ff   :  { %v427_v33 = vadd.f32 %v3749_v25, %v426_v20 }
 0x400   :  { %v4085_v21 = vpop.f32.mrf.mxu1 }
 0x401   :  { %v5378_v21 = vld [vmem:[%s6738_s3] sm:$0xff] }
 0x402   :  { %v429_v15 = vpop.f32.mrf.mxu1 }
 0x403   :  { %v430_v30 = vadd.f32 %v3749_v25, %v429_v15 }
 0x404   :  { %v4086_v22 = vpop.f32.mrf.mxu1 }
 0x405   :  { %v5255_v36 = vpack.c.bf16 %v430_v30, %v427_v33 }
 0x407   :  { %v434_v23 = vpop.f32.mrf.mxu1 }
 0x408   :  { %v435_v27 = vadd.f32 %v3749_v25, %v434_v23 }
 0x409   :  { %v4089_v24 = vpop.f32.mrf.mxu1 }
 0x40a   :  { %v5386_v24 = vld [vmem:[%s6738_s3 + $0x8] sm:$0xff] }
 0x40b   :  { %v437_v26 = vpop.f32.mrf.mxu1 }
 0x40c   :  { %v438_v28 = vadd.f32 %v3749_v25, %v437_v26 }
 0x40d   :  { %v4090_v29 = vpop.f32.mrf.mxu1 }
 0x40e   :  { %v5251_v31 = vpack.c.bf16 %v438_v28, %v435_v27  ;;  %v5396_v29 = vld [vmem:[%s6738_s3 + $0x10] sm:$0xff] }
 0x40f   :  { %v442_v32 = vpop.f32.mrf.mxu1 }
 0x410   :  { %457 = vrot.lane.b32.xlu1 %v5251_v31, %s5005_s24  ;;  %v443_v38 = vadd.f32 %v3749_v25, %v442_v32 }
 0x411   :  { %v4093_v35 = vpop.f32.mrf.mxu1 }
 0x413   :  { %v445_v37 = vpop.f32.mrf.mxu1 }
 0x414   :  { %v446_v40 = vadd.f32 %v3749_v25, %v445_v37  ;;  %455 = vrot.lane.b32.xlu1 %v5255_v36, %s5005_s24  ;;  %v5406_v37 = vld [vmem:[%s6738_s3 + $0x18] sm:$0xff] }
 0x415   :  { %v4094_v41 = vpop.f32.mrf.mxu1 }
 0x416   :  { %v5259_v42 = vpack.c.bf16 %v446_v40, %v443_v38 }
 0x418   :  { %691 = vrot.lane.b32.xlu1 %v5259_v42, %s5006_s25  ;;  %459 = vrot.lane.b32.xlu0 %v5259_v42, %s5005_s24 }
 0x41c   :  { %687 = vrot.lane.b32.xlu1 %v5255_v36, %s5006_s25  ;;  %689 = vrot.lane.b32.xlu0 %v5251_v31, %s5006_s25 }
 0x420   :  { %922 = vrot.lane.b32.xlu1 %v5259_v42, %s5007_s26  ;;  %681 = vrot.lane.b32.xlu0 %v5255_v36, %s5008_s27 }
 0x424   :  { %920 = vrot.lane.b32.xlu1 %v5251_v31, %s5007_s26  ;;  %683 = vrot.lane.b32.xlu0 %v5251_v31, %s5008_s27 }
 0x428   :  { %918 = vrot.lane.b32.xlu1 %v5255_v36, %s5007_s26  ;;  %685 = vrot.lane.b32.xlu0 %v5259_v42, %s5008_s27 }
 0x42c   :  { %1153 = vrot.lane.b32.xlu1 %v5259_v42, %s5009_s28  ;;  %912 = vrot.lane.b32.xlu0 %v5255_v36, %s5010_s29 }
 0x430   :  { %1151 = vrot.lane.b32.xlu1 %v5251_v31, %s5009_s28  ;;  %914 = vrot.lane.b32.xlu0 %v5251_v31, %s5010_s29 }
 0x434   :  { %1149 = vrot.lane.b32.xlu1 %v5255_v36, %s5009_s28  ;;  %916 = vrot.lane.b32.xlu0 %v5259_v42, %s5010_s29 }
 0x438   :  { %1145 = vrot.lane.b32.xlu1 %v5251_v31, %s5011_s30  ;;  %1143 = vrot.lane.b32.xlu0 %v5255_v36, %s5011_s30 }
 0x43c   :  { %606 = vrot.lane.b32.xlu1 %v5255_v36, %s5012_s2  ;;  %1147 = vrot.lane.b32.xlu0 %v5259_v42, %s5011_s30 }
 0x440   :  { %610 = vrot.lane.b32.xlu1 %v5259_v42, %s5012_s2  ;;  %608 = vrot.lane.b32.xlu0 %v5251_v31, %s5012_s2 }
 0x444   :  { %841 = vrot.lane.b32.xlu1 %v5259_v42, %s5013_s13  ;;  %839 = vrot.lane.b32.xlu0 %v5251_v31, %s5013_s13 }
 0x482   :  { %v458_v43 = vpop.permute.xlu1 %457 }
 0x483   :  { %v475_v55 = vsel %vm461_vm3, %v458_v43, 0 }
 0x486   :  { %v456_v44 = vpop.permute.xlu1 %455 }
 0x487   :  { %v472_v61 = vsel %vm461_vm3, %v456_v44, 0  ;;  %v5416_v44 = vld [vmem:[%s6738_s3 + $0x20] sm:$0xff] }
 0x48a   :  { %v460_v46 = vpop.permute.xlu0 %459  ;;  %v692_v47 = vpop.permute.xlu1 %691 }
 0x48b   :  { %v478_v48 = vsel %vm461_vm3, %v460_v46, 0  ;;  %v709_v4 = vsel %vm461_vm3, %v692_v47, 0 }
 0x48c   :  { %4096 = vmatpush3.bf16.xpose.msra.mxu1 %v478_v48 }
 0x48d   :  { %4097 = vmatprep.subr.bf16.mxu1 %v5003_v1 }
 0x48e   :  { %v690_v49 = vpop.permute.xlu0 %689  ;;  %v688_v50 = vpop.permute.xlu1 %687 }
 0x48f   :  { %v706_v9 = vsel %vm461_vm3, %v690_v49, 0  ;;  %v703_v13 = vsel %vm461_vm3, %v688_v50, 0  ;;  %v5426_v50 = vld [vmem:[%s6738_s3 + $0x28] sm:$0xff] }
 0x492   :  { %v682_v51 = vpop.permute.xlu0 %681  ;;  %v923_v53 = vpop.permute.xlu1 %922 }
 0x493   :  { %v940_v16 = vsel %vm461_vm3, %v923_v53, 0 }
 0x494   :  { %4098 = vmatpush3.bf16.xpose.msra.mxu1 %v475_v55 }
 0x495   :  { %4099 = vmatprep.subr.bf16.mxu1 %v5003_v1 }
 0x496   :  { %v684_v57 = vpop.permute.xlu0 %683  ;;  %v921_v56 = vpop.permute.xlu1 %920 }
 0x497   :  { %v937_v8 = vsel %vm461_vm3, %v921_v56, 0 }
 0x49a   :  { %v686_v59 = vpop.permute.xlu0 %685  ;;  %v919_v60 = vpop.permute.xlu1 %918 }
 0x49b   :  { %v934_v18 = vsel %vm461_vm3, %v919_v60, 0 }
 0x49c   :  { %4100 = vmatpush3.bf16.xpose.msra.mxu1 %v472_v61 }
 0x49d   :  { %4131 = vmatprep.subr.bf16.mxu1 %v5003_v1 }
 0x49e   :  { %v913_v63 = vpop.permute.xlu0 %912  ;;  %v1154_v0 = vpop.permute.xlu1 %1153 }
 0x49f   :  { %v1171_v19 = vsel %vm461_vm3, %v1154_v0, 0 }
 0x4a2   :  { %v915_v62 = vpop.permute.xlu0 %914  ;;  %v1152_v2 = vpop.permute.xlu1 %1151 }
 0x4a3   :  { %4102 = vmatmul.mubr.msk.bf16.vlgmr.msra.gmra.mxu1 %vm461_vm3, %v5255_v36  ;;  %v1168_v17 = vsel %vm461_vm3, %v1152_v2, 0 }
 0x4a4   :  { %4132 = vmatpush3.bf16.xpose.msra.mxu1 %v709_v4  ;;  %4105 = vmatprep.mubr.msk.bf16.mxu1 %vm5004_vm0, %v5003_v1 }
 0x4a5   :  { %4133 = vmatprep.subr.bf16.mxu1 %v5003_v1 }
 0x4a6   :  { %v917_v5 = vpop.permute.xlu0 %916  ;;  %v1150_v3 = vpop.permute.xlu1 %1149 }
 0x4a7   :  { %v1165_v20 = vsel %vm461_vm3, %v1150_v3, 0 }
 0x4aa   :  { %v1144_v6 = vpop.permute.xlu0 %1143  ;;  %v1146_v7 = vpop.permute.xlu1 %1145 }
 0x4ab   :  { %4106 = vmatmul.mubr.msk.bf16.gmra.mxu1 %vm461_vm3, %v5251_v31 }
 0x4ac   :  { %4134 = vmatpush3.bf16.xpose.msra.mxu1 %v706_v9  ;;  %4109 = vmatprep.mubr.msk.bf16.mxu1 %vm5004_vm0, %v5003_v1 }
 0x4ad   :  { %4135 = vmatprep.subr.bf16.mxu1 %v5003_v1 }
 0x4ae   :  { %v607_v10 = vpop.permute.xlu1 %606  ;;  %v1148_v11 = vpop.permute.xlu0 %1147 }
 0x4b2   :  { %v611_v12 = vpop.permute.xlu1 %610  ;;  %v609_v14 = vpop.permute.xlu0 %608 }
 0x4b3   :  { %4110 = vmatmul.mubr.msk.bf16.gmra.mxu1 %vm461_vm3, %v5259_v42  ;;  %4114 = vmatpush3.bf16.msra.mxu0 %v611_v12 }
 0x4b4   :  { %4136 = vmatpush3.bf16.xpose.msra.mxu1 %v703_v13  ;;  %4115 = vmatprep.subr.bf16.mxu0 %v5003_v1 }
 0x4b5   :  { %4137 = vmatprep.mubr.msk.bf16.mxu1 %vm5004_vm0, %v5003_v1  ;;  %4167 = vmatprep.subr.bf16.mxu1 %v5003_v1 }
 0x4b7   :  { %4116 = vmatpush3.bf16.msra.mxu0 %v609_v14 }
 0x4b8   :  { %4117 = vmatprep.subr.bf16.mxu0 %v5003_v1 }
 0x4bb   :  { %4118 = vmatpush3.bf16.msra.mxu0 %v607_v10  ;;  %4138 = vmatmul.mubr.msk.bf16.vlgmr.msra.gmra.mxu1 %vm461_vm3, %v682_v51 }
 0x4bc   :  { %4168 = vmatpush3.bf16.xpose.msra.mxu1 %v940_v16  ;;  %4141 = vmatprep.mubr.msk.bf16.mxu1 %vm5004_vm0, %v5003_v1 }
 0x4bd   :  { %4169 = vmatprep.subr.bf16.mxu1 %v5003_v1  ;;  %4149 = vmatprep.subr.bf16.mxu0 %v5003_v1 }
 0x4c3   :  { %4142 = vmatmul.mubr.msk.bf16.gmra.mxu1 %vm461_vm3, %v684_v57 }
 0x4c4   :  { %4170 = vmatpush3.bf16.xpose.msra.mxu1 %v937_v8  ;;  %4145 = vmatprep.mubr.msk.bf16.mxu1 %vm5004_vm0, %v5003_v1 }
 0x4c5   :  { %4171 = vmatprep.subr.bf16.mxu1 %v5003_v1 }
 0x4cb   :  { %4146 = vmatmul.mubr.msk.bf16.gmra.mxu1 %vm461_vm3, %v686_v59 }
 0x4cc   :  { %4172 = vmatpush3.bf16.xpose.msra.mxu1 %v934_v18  ;;  %4173 = vmatprep.mubr.msk.bf16.mxu1 %vm5004_vm0, %v5003_v1 }
 0x4cd   :  { %4203 = vmatprep.subr.bf16.mxu1 %v5003_v1 }
 0x4d3   :  { %4174 = vmatmul.mubr.msk.bf16.vlgmr.msra.gmra.mxu1 %vm461_vm3, %v913_v63 }
 0x4d4   :  { %4204 = vmatpush3.bf16.xpose.msra.mxu1 %v1171_v19  ;;  %4177 = vmatprep.mubr.msk.bf16.mxu1 %vm5004_vm0, %v5003_v1 }
 0x4d5   :  { %4205 = vmatprep.subr.bf16.mxu1 %v5003_v1 }
 0x4db   :  { %4178 = vmatmul.mubr.msk.bf16.gmra.mxu1 %vm461_vm3, %v915_v62 }
 0x4dc   :  { %4206 = vmatpush3.bf16.xpose.msra.mxu1 %v1168_v17  ;;  %4181 = vmatprep.mubr.msk.bf16.mxu1 %vm5004_vm0, %v5003_v1 }
 0x4dd   :  { %4207 = vmatprep.subr.bf16.mxu1 %v5003_v1 }
 0x4e3   :  { %4182 = vmatmul.mubr.msk.bf16.gmra.mxu1 %vm461_vm3, %v917_v5 }
 0x4e4   :  { %4208 = vmatpush3.bf16.xpose.msra.mxu1 %v1165_v20  ;;  %4209 = vmatprep.mubr.msk.bf16.mxu1 %vm5004_vm0, %v5003_v1 }
 0x4e5   :  { %4239 = vmatprep.subr.bf16.mxu1 %v5003_v1 }
 0x4eb   :  { %4210 = vmatmul.mubr.msk.bf16.vlgmr.msra.gmra.mxu1 %vm461_vm3, %v1144_v6 }
 0x4ec   :  { %4213 = vmatprep.mubr.msk.bf16.mxu1 %vm5004_vm0, %v5003_v1 }
 0x4f3   :  { %4214 = vmatmul.mubr.msk.bf16.gmra.mxu1 %vm461_vm3, %v1146_v7 }
 0x4f4   :  { %4217 = vmatprep.mubr.msk.bf16.mxu1 %vm5004_vm0, %v5003_v1 }
 0x4fb   :  { %4218 = vmatmul.mubr.msk.bf16.gmra.mxu1 %vm461_vm3, %v1148_v11 }
 0x4fc   :  { %4243 = vmatprep.mubr.msk.bf16.mxu1 %vm5004_vm0, %v5003_v1 }
 0x563   :  { %v514_v15 = vpop.f32.mrf.mxu1 }
 0x564   :  { %v5381_v22 = vadd.f32 %v514_v15, %v5378_v21 }
 0x565   :  { %v4103_v23 = vpop.f32.mrf.mxu1 }
 0x566   :  { %v537_v25 = vsel %vm82_vm1, %v5381_v22, -inf }
 0x567   :  { %538 = vmax.xlane.f32.xlu1 %v537_v25  ;;  %v517_v26 = vpop.f32.mrf.mxu1 }
 0x568   :  { %v5391_v27 = vadd.f32 %v517_v26, %v5386_v24 }
 0x569   :  { %v4104_v28 = vpop.f32.mrf.mxu1 }
 0x56a   :  { %v540_v30 = vsel %vm82_vm1, %v5391_v27, -inf }
 0x56b   :  { %541 = vmax.xlane.f32.xlu0 %v540_v30  ;;  %v522_v32 = vpop.f32.mrf.mxu1 }
 0x56c   :  { %v5401_v33 = vadd.f32 %v522_v32, %v5396_v29 }
 0x56d   :  { %v4107_v35 = vpop.f32.mrf.mxu1 }
 0x56e   :  { %v543_v38 = vsel %vm82_vm1, %v5401_v33, -inf }
 0x56f   :  { %544 = vmax.xlane.f32.xlu0 %v543_v38  ;;  %v525_v40 = vpop.f32.mrf.mxu1 }
 0x570   :  { %v5411_v41 = vadd.f32 %v525_v40, %v5406_v37 }
 0x571   :  { %v4108_v43 = vpop.f32.mrf.mxu1 }
 0x572   :  { %v546_v46 = vsel %vm82_vm1, %v5411_v41, -inf }
 0x573   :  { %547 = vmax.xlane.f32.xlu0 %v546_v46  ;;  %v530_v47 = vpop.f32.mrf.mxu1 }
 0x574   :  { %v5421_v48 = vadd.f32 %v530_v47, %v5416_v44 }
 0x575   :  { %v4111_v49 = vpop.f32.mrf.mxu1 }
 0x576   :  { %v549_v51 = vsel %vm82_vm1, %v5421_v48, -inf }
 0x577   :  { %550 = vmax.xlane.f32.xlu1 %v549_v51  ;;  %v533_v53 = vpop.f32.mrf.mxu1 }
 0x578   :  { %v5431_v55 = vadd.f32 %v533_v53, %v5426_v50 }
 0x579   :  { %v4112_v57 = vpop.f32.mrf.mxu1 }
 0x57a   :  { %v552_v56 = vsel %vm82_vm1, %v5431_v55, -inf }
 0x57b   :  { %553 = vmax.xlane.f32.xlu0 %v552_v56  ;;  %v745_v59 = vpop.f32.mrf.mxu1 }
 0x57c   :  { %v5436_v60 = vadd.f32 %v745_v59, %v5378_v21 }
 0x57d   :  { %v4139_v61 = vpop.f32.mrf.mxu1 }
 0x57e   :  { %v768_v63 = vsel %vm82_vm1, %v5436_v60, -inf }
 0x57f   :  { %769 = vmax.xlane.f32.xlu1 %v768_v63  ;;  %v748_v0 = vpop.f32.mrf.mxu1 }
 0x580   :  { %v5441_v62 = vadd.f32 %v748_v0, %v5386_v24 }
 0x581   :  { %v4140_v2 = vpop.f32.mrf.mxu1 }
 0x582   :  { %v771_v4 = vsel %vm82_vm1, %v5441_v62, -inf }
 0x583   :  { %772 = vmax.xlane.f32.xlu0 %v771_v4  ;;  %v753_v5 = vpop.f32.mrf.mxu1 }
 0x584   :  { %v5446_v3 = vadd.f32 %v753_v5, %v5396_v29 }
 0x585   :  { %v4143_v6 = vpop.f32.mrf.mxu1 }
 0x586   :  { %v774_v7 = vsel %vm82_vm1, %v5446_v3, -inf }
 0x587   :  { %775 = vmax.xlane.f32.xlu1 %v774_v7  ;;  %v756_v9 = vpop.f32.mrf.mxu1 }
 0x588   :  { %v5451_v10 = vadd.f32 %v756_v9, %v5406_v37 }
 0x589   :  { %v4144_v11 = vpop.f32.mrf.mxu1 }
 0x58a   :  { %v777_v12 = vsel %vm82_vm1, %v5451_v10, -inf }
 0x58b   :  { %778 = vmax.xlane.f32.xlu0 %v777_v12  ;;  %v761_v13 = vpop.f32.mrf.mxu1 }
 0x58c   :  { %v5456_v14 = vadd.f32 %v761_v13, %v5416_v44 }
 0x58d   :  { %v4147_v16 = vpop.f32.mrf.mxu1 }
 0x58e   :  { %v780_v8 = vsel %vm82_vm1, %v5456_v14, -inf }
 0x58f   :  { %781 = vmax.xlane.f32.xlu1 %v780_v8  ;;  %v764_v18 = vpop.f32.mrf.mxu1 }
 0x590   :  { %v5467_v63 = vadd.f32 %v764_v18, %v5426_v50 }
 0x591   :  { %v4148_v19 = vpop.f32.mrf.mxu1 }
 0x592   :  { %v783_v7 = vsel %vm82_vm1, %v5467_v63, -inf }
 0x593   :  { %v976_v17 = vpop.f32.mrf.mxu1 }
 0x594   :  { %v5470_v0 = vadd.f32 %v976_v17, %v5378_v21 }
 0x595   :  { %v4175_v20 = vpop.f32.mrf.mxu1 }
 0x596   :  { %v999_v9 = vsel %vm82_vm1, %v5470_v0, -inf }
 0x597   :  { %v979_v15 = vpop.f32.mrf.mxu1 }
 0x598   :  { %v5473_v5 = vadd.f32 %v979_v15, %v5386_v24 }
 0x599   :  { %v4176_v23 = vpop.f32.mrf.mxu1 }
 0x59a   :  { %v1002_v13 = vsel %vm82_vm1, %v5473_v5, -inf }
 0x59b   :  { %v984_v25 = vpop.f32.mrf.mxu1 }
 0x59c   :  { %v5476_v6 = vadd.f32 %v984_v25, %v5396_v29 }
 0x59d   :  { %v4179_v26 = vpop.f32.mrf.mxu1 }
 0x59e   :  { %v1005_v16 = vsel %vm82_vm1, %v5476_v6, -inf }
 0x59f   :  { %v987_v28 = vpop.f32.mrf.mxu1 }
 0x5a0   :  { %837 = vrot.lane.b32.xlu1 %v5255_v36, %s5013_s13  ;;  %v5483_v11 = vadd.f32 %v987_v28, %v5406_v37 }
 0x5a1   :  { %1072 = vrot.lane.b32.xlu0 %v5259_v42, %s5014_s14  ;;  %v4180_v30 = vpop.f32.mrf.mxu1 }
 0x5a2   :  { %v1008_v19 = vsel %vm82_vm1, %v5483_v11, -inf }
 0x5a3   :  { %v992_v32 = vpop.f32.mrf.mxu1 }
 0x5a4   :  { %v5486_v12 = vadd.f32 %v992_v32, %v5416_v44  ;;  %v5531_v32 = vpop.permute.xlu1 %841 }
 0x5a5   :  { %1070 = vrot.lane.b32.xlu0 %v5251_v31, %s5014_s14  ;;  %v4183_v35 = vpop.f32.mrf.mxu1 }
 0x5a6   :  { %v1011_v17 = vsel %vm82_vm1, %v5486_v12, -inf  ;;  %v5533_v35 = vpop.permute.xlu0 %839 }
 0x5a7   :  { %v995_v38 = vpop.f32.mrf.mxu1 }
 0x5a8   :  { %v5493_v8 = vadd.f32 %v995_v38, %v5426_v50 }
 0x5a9   :  { %v4184_v40 = vpop.f32.mrf.mxu1 }
 0x5aa   :  { %v1014_v23 = vsel %vm82_vm1, %v5493_v8, -inf }
 0x5ab   :  { %v1207_v43 = vpop.f32.mrf.mxu1 }
 0x5ac   :  { %v5496_v18 = vadd.f32 %v1207_v43, %v5378_v21 }
 0x5ad   :  { %v4211_v46 = vpop.f32.mrf.mxu1 }
 0x5ae   :  { %v1230_v21 = vsel %vm82_vm1, %v5496_v18, -inf }
 0x5af   :  { %v1210_v47 = vpop.f32.mrf.mxu1 }
 0x5b0   :  { %v5503_v20 = vadd.f32 %v1210_v47, %v5386_v24 }
 0x5b1   :  { %v4212_v49 = vpop.f32.mrf.mxu1 }
 0x5b2   :  { %v1233_v24 = vsel %vm82_vm1, %v5503_v20, -inf }
 0x5b3   :  { %v1215_v51 = vpop.f32.mrf.mxu1 }
 0x5b4   :  { %v5506_v15 = vadd.f32 %v1215_v51, %v5396_v29 }
 0x5b5   :  { %v4215_v53 = vpop.f32.mrf.mxu1 }
 0x5b6   :  { %v1236_v29 = vsel %vm82_vm1, %v5506_v15, -inf }
 0x5b7   :  { %v1218_v57 = vpop.f32.mrf.mxu1 }
 0x5b8   :  { %v5513_v25 = vadd.f32 %v1218_v57, %v5406_v37 }
 0x5b9   :  { %v4216_v56 = vpop.f32.mrf.mxu1 }
 0x5ba   :  { %v1239_v30 = vsel %vm82_vm1, %v5513_v25, -inf }
 0x5bb   :  { %v1223_v59 = vpop.f32.mrf.mxu1 }
 0x5bc   :  { %v5516_v26 = vadd.f32 %v1223_v59, %v5416_v44 }
 0x5bd   :  { %v4219_v61 = vpop.f32.mrf.mxu1 }
 0x5be   :  { %v1242_v37 = vsel %vm82_vm1, %v5516_v26, -inf }
 0x5bf   :  { %v1226_v2 = vpop.f32.mrf.mxu1 }
 0x5c0   :  { %v5523_v28 = vadd.f32 %v1226_v2, %v5426_v50 }
 0x5c1   :  { %v4220_v4 = vpop.f32.mrf.mxu1 }
 0x5c2   :  { %v1245_v44 = vsel %vm82_vm1, %v5523_v28, -inf }
 0x5c4   :  { %784 = vmax.xlane.f32.xlu0 %v783_v7  ;;  %1000 = vmax.xlane.f32.xlu1 %v999_v9 }
 0x5c8   :  { %1003 = vmax.xlane.f32.xlu0 %v1002_v13  ;;  %1006 = vmax.xlane.f32.xlu1 %v1005_v16 }
 0x5cc   :  { %1009 = vmax.xlane.f32.xlu0 %v1008_v19  ;;  %1012 = vmax.xlane.f32.xlu1 %v1011_v17 }
 0x5d0   :  { %1015 = vmax.xlane.f32.xlu0 %v1014_v23  ;;  %1231 = vmax.xlane.f32.xlu1 %v1230_v21 }
 0x5d4   :  { %1234 = vmax.xlane.f32.xlu0 %v1233_v24  ;;  %1237 = vmax.xlane.f32.xlu1 %v1236_v29 }
 0x5d8   :  { %1240 = vmax.xlane.f32.xlu0 %v1239_v30  ;;  %1243 = vmax.xlane.f32.xlu1 %v1242_v37 }
 0x5dc   :  { %1246 = vmax.xlane.f32.xlu0 %v1245_v44 }
 0x5f0   :  { %v539_v38 = vpop.xlane.xlu1 %538 }
 0x5f1   :  { %v555_v50 = vsub.f32 %v5381_v22, %v539_v38 }
 0x5f3   :  { %v561_v40 = vmul.f32 1.442695, %v555_v50 }
 0x5f4   :  { %v542_v43 = vpop.xlane.xlu0 %541 }
 0x5f5   :  { %4697 = vpow2.f32 %v561_v40  ;;  %v556_v46 = vsub.f32 %v5391_v27, %v542_v43 }
 0x5f7   :  { %v563_v47 = vmul.f32 1.442695, %v556_v46 }
 0x5f8   :  { %v545_v49 = vpop.xlane.xlu0 %544 }
 0x5f9   :  { %4699 = vpow2.f32 %v563_v47  ;;  %v557_v51 = vsub.f32 %v5401_v33, %v545_v49 }
 0x5fb   :  { %v565_v53 = vmul.f32 1.442695, %v557_v51 }
 0x5fc   :  { %v548_v57 = vpop.xlane.xlu0 %547 }
 0x5fd   :  { %4701 = vpow2.f32 %v565_v53  ;;  %v558_v56 = vsub.f32 %v5411_v41, %v548_v57 }
 0x5ff   :  { %v567_v59 = vmul.f32 1.442695, %v558_v56 }
 0x600   :  { %v551_v61 = vpop.xlane.xlu1 %550 }
 0x601   :  { %4703 = vpow2.f32 %v567_v59  ;;  %v559_v22 = vsub.f32 %v5421_v48, %v551_v61 }
 0x602   :  { %v5540_v2 = vpop.eup %4697 }
 0x603   :  { %v569_v4 = vmul.f32 1.442695, %v559_v22  ;;  %v573_v27 = vsel %vm82_vm1, %v5540_v2, 0.0 }
 0x604   :  { %v554_v7 = vpop.xlane.xlu0 %553  ;;  %574 = vadd.xlane.f32.xlu1 %v573_v27 }
 0x605   :  { %4705 = vpow2.f32 %v569_v4  ;;  %v560_v33 = vsub.f32 %v5431_v55, %v554_v7 }
 0x606   :  { %v5545_v9 = vpop.eup %4699 }
 0x607   :  { %v571_v13 = vmul.f32 1.442695, %v560_v33  ;;  %v576_v41 = vsel %vm82_vm1, %v5545_v9, 0.0 }
 0x608   :  { %577 = vadd.xlane.f32.xlu0 %v576_v41  ;;  %v770_v16 = vpop.xlane.xlu1 %769 }
 0x609   :  { %4707 = vpow2.f32 %v571_v13  ;;  %v786_v48 = vsub.f32 %v5436_v60, %v770_v16 }
 0x60a   :  { %v5550_v19 = vpop.eup %4701 }
 0x60b   :  { %v792_v17 = vmul.f32 1.442695, %v786_v48  ;;  %v579_v23 = vsel %vm82_vm1, %v5550_v19, 0.0 }
 0x60c   :  { %580 = vadd.xlane.f32.xlu1 %v579_v23  ;;  %v773_v38 = vpop.xlane.xlu0 %772 }
 0x60d   :  { %4709 = vpow2.f32 %v792_v17  ;;  %v787_v50 = vsub.f32 %v5441_v62, %v773_v38 }
 0x60e   :  { %v5554_v55 = vpop.eup %4703 }
 0x60f   :  { %v582_v21 = vsel %vm82_vm1, %v5554_v55, 0.0  ;;  %v794_v43 = vmul.f32 1.442695, %v787_v50 }
 0x610   :  { %583 = vadd.xlane.f32.xlu0 %v582_v21  ;;  %v776_v40 = vpop.xlane.xlu1 %775 }
 0x611   :  { %v788_v46 = vsub.f32 %v5446_v3, %v776_v40  ;;  %4711 = vpow2.f32 %v794_v43 }
 0x612   :  { %v5558_v24 = vpop.eup %4705 }
 0x613   :  { %v585_v29 = vsel %vm82_vm1, %v5558_v24, 0.0  ;;  %v796_v49 = vmul.f32 1.442695, %v788_v46 }
 0x614   :  { %586 = vadd.xlane.f32.xlu1 %v585_v29  ;;  %v779_v47 = vpop.xlane.xlu0 %778 }
 0x615   :  { %v789_v51 = vsub.f32 %v5451_v10, %v779_v47  ;;  %4713 = vpow2.f32 %v796_v49 }
 0x616   :  { %v5562_v60 = vpop.eup %4707 }
 0x617   :  { %v588_v30 = vsel %vm82_vm1, %v5562_v60, 0.0  ;;  %v798_v57 = vmul.f32 1.442695, %v789_v51 }
 0x618   :  { %589 = vadd.xlane.f32.xlu0 %v588_v30  ;;  %v782_v53 = vpop.xlane.xlu1 %781  ;;  %v5578_v59 = vpop.permute.xlu0 %1072 }
 0x619   :  { %v790_v56 = vsub.f32 %v5456_v14, %v782_v53  ;;  %4715 = vpow2.f32 %v798_v57 }
 0x61a   :  { %v5566_v37 = vpop.eup %4709 }
 0x61b   :  { %v804_v44 = vsel %vm82_vm1, %v5566_v37, 0.0 }
 0x61c   :  { %805 = vadd.xlane.f32.xlu1 %v804_v44  ;;  %v5582_v61 = vpop.permute.xlu0 %1070  ;;  %v5584_v3 = vpop.permute.xlu1 %837 }
 0x61e   :  { %v5580_v62 = vpop.eup %4711 }
 0x61f   :  { %v807_v22 = vsel %vm82_vm1, %v5580_v62, 0.0 }
 0x622   :  { %v5588_v10 = vpop.eup %4713 }
 0x623   :  { %v810_v41 = vsel %vm82_vm1, %v5588_v10, 0.0 }
 0x626   :  { %v5594_v16 = vpop.eup %4715 }
 0x62d   :  { %1068 = vrot.lane.b32.xlu1 %v5255_v36, %s5014_s14 }
 0x62e   :  { %1303 = vrot.lane.b32.xlu0 %v5259_v42, %s5015_s15  ;;  %v800_v42 = vmul.f32 1.442695, %v790_v56 }
 0x630   :  { %4717 = vpow2.f32 %v800_v42 }
 0x63d   :  { %v5600_v30 = vpop.eup %4717 }
 0x64d   :  { %v785_v4 = vpop.xlane.xlu0 %784  ;;  %808 = vadd.xlane.f32.xlu0 %v807_v22  ;;  %v1001_v27 = vpop.xlane.xlu1 %1000 }
 0x64e   :  { %v791_v14 = vsub.f32 %v5467_v63, %v785_v4  ;;  %v1017_v7 = vsub.f32 %v5470_v0, %v1001_v27  ;;  %v813_v0 = vsel %vm82_vm1, %v5594_v16, 0.0 }
 0x650   :  { %v802_v33 = vmul.f32 1.442695, %v791_v14  ;;  %v1023_v13 = vmul.f32 1.442695, %v1017_v7 }
 0x651   :  { %v1004_v48 = vpop.xlane.xlu0 %1003  ;;  %811 = vadd.xlane.f32.xlu0 %v810_v41  ;;  %v1007_v17 = vpop.xlane.xlu1 %1006 }
 0x652   :  { %4719 = vpow2.f32 %v802_v33  ;;  %v1018_v23 = vsub.f32 %v5473_v5, %v1004_v48  ;;  %v1019_v21 = vsub.f32 %v5476_v6, %v1007_v17  ;;  %v816_v6 = vsel %vm82_vm1, %v5600_v30, 0.0 }
 0x653   :  { %4721 = vpow2.f32 %v1023_v13 }
 0x654   :  { %v1025_v29 = vmul.f32 1.442695, %v1018_v23  ;;  %v1027_v63 = vmul.f32 1.442695, %v1019_v21 }
 0x655   :  { %v1010_v44 = vpop.xlane.xlu0 %1009  ;;  %814 = vadd.xlane.f32.xlu0 %v813_v0  ;;  %v1013_v38 = vpop.xlane.xlu1 %1012 }
 0x656   :  { %4723 = vpow2.f32 %v1025_v29  ;;  %v1020_v50 = vsub.f32 %v5483_v11, %v1010_v44  ;;  %v1021_v40 = vsub.f32 %v5486_v12, %v1013_v38 }
 0x657   :  { %4725 = vpow2.f32 %v1027_v63 }
 0x658   :  { %v1029_v5 = vmul.f32 1.442695, %v1020_v50  ;;  %v1031_v43 = vmul.f32 1.442695, %v1021_v40 }
 0x659   :  { %v1016_v46 = vpop.xlane.xlu0 %1015  ;;  %817 = vadd.xlane.f32.xlu0 %v816_v6  ;;  %v1232_v47 = vpop.xlane.xlu1 %1231 }
 0x65a   :  { %4727 = vpow2.f32 %v1029_v5  ;;  %v1022_v49 = vsub.f32 %v5493_v8, %v1016_v46  ;;  %v1248_v51 = vsub.f32 %v5496_v18, %v1232_v47 }
 0x65b   :  { %4729 = vpow2.f32 %v1031_v43 }
 0x65c   :  { %v1033_v53 = vmul.f32 1.442695, %v1022_v49  ;;  %v1254_v57 = vmul.f32 1.442695, %v1248_v51 }
 0x65d   :  { %v1235_v11 = vpop.xlane.xlu0 %1234  ;;  %v1238_v56 = vpop.xlane.xlu1 %1237 }
 0x65e   :  { %v1249_v12 = vsub.f32 %v5503_v20, %v1235_v11  ;;  %v1250_v42 = vsub.f32 %v5506_v15, %v1238_v56  ;;  %4731 = vpow2.f32 %v1254_v57 }
 0x65f   :  { %v5610_v22 = vpop.eup %4719  ;;  %4733 = vpow2.f32 %v1033_v53 }
 0x660   :  { %v5612_v4 = vpop.eup %4721  ;;  %v1256_v27 = vmul.f32 1.442695, %v1249_v12  ;;  %v1258_v14 = vmul.f32 1.442695, %v1250_v42  ;;  %v819_v8 = vsel %vm82_vm1, %v5610_v22, 0.0 }
 0x661   :  { %v1241_v18 = vpop.xlane.xlu0 %1240  ;;  %820 = vadd.xlane.f32.xlu0 %v819_v8  ;;  %v1035_v7 = vsel %vm82_vm1, %v5612_v4, 0.0  ;;  %v1244_v33 = vpop.xlane.xlu1 %1243 }
 0x662   :  { %v1251_v20 = vsub.f32 %v5513_v25, %v1241_v18  ;;  %1036 = vadd.xlane.f32.xlu1 %v1035_v7  ;;  %4735 = vpow2.f32 %v1258_v14  ;;  %v1252_v13 = vsub.f32 %v5516_v26, %v1244_v33 }
 0x663   :  { %v5619_v15 = vpop.eup %4723  ;;  %4737 = vpow2.f32 %v1256_v27 }
 0x664   :  { %v1260_v41 = vmul.f32 1.442695, %v1251_v20  ;;  %v1038_v48 = vsel %vm82_vm1, %v5619_v15, 0.0  ;;  %v5624_v17 = vpop.eup %4725  ;;  %v1262_v29 = vmul.f32 1.442695, %v1252_v13 }
 0x665   :  { %v1247_v23 = vpop.xlane.xlu0 %1246  ;;  %1039 = vadd.xlane.f32.xlu0 %v1038_v48  ;;  %v1041_v26 = vsel %vm82_vm1, %v5624_v17, 0.0 }
 0x666   :  { %4739 = vpow2.f32 %v1260_v41  ;;  %v1253_v25 = vsub.f32 %v5523_v28, %v1247_v23 }
 0x667   :  { %v5626_v21 = vpop.eup %4727  ;;  %4741 = vpow2.f32 %v1262_v29 }
 0x668   :  { %v1044_v63 = vsel %vm82_vm1, %v5626_v21, 0.0  ;;  %v5633_v0 = vpop.eup %4729  ;;  %v1264_v38 = vmul.f32 1.442695, %v1253_v25 }
 0x669   :  { %1045 = vadd.xlane.f32.xlu1 %v1044_v63  ;;  %1042 = vadd.xlane.f32.xlu0 %v1041_v26  ;;  %v1047_v50 = vsel %vm82_vm1, %v5633_v0, 0.0 }
 0x66a   :  { %4743 = vpow2.f32 %v1264_v38 }
 0x66b   :  { %v5635_v44 = vpop.eup %4731 }
 0x66c   :  { %v5639_v40 = vpop.eup %4733  ;;  %v1266_v28 = vsel %vm82_vm1, %v5635_v44, 0.0 }
 0x66d   :  { %1048 = vadd.xlane.f32.xlu0 %v1047_v50  ;;  %1267 = vadd.xlane.f32.xlu1 %v1266_v28  ;;  %v1050_v43 = vsel %vm82_vm1, %v5639_v40, 0.0 }
 0x66f   :  { %v5643_v5 = vpop.eup %4735 }
 0x670   :  { %v5647_v6 = vpop.eup %4737  ;;  %v1272_v46 = vsel %vm82_vm1, %v5643_v5, 0.0 }
 0x671   :  { %1051 = vadd.xlane.f32.xlu0 %v1050_v43  ;;  %1273 = vadd.xlane.f32.xlu1 %v1272_v46  ;;  %v1269_v47 = vsel %vm82_vm1, %v5647_v6, 0.0 }
 0x673   :  { %v5653_v49 = vpop.eup %4739 }
 0x674   :  { %v1275_v51 = vsel %vm82_vm1, %v5653_v49, 0.0  ;;  %v5657_v53 = vpop.eup %4741 }
 0x675   :  { %1270 = vadd.xlane.f32.xlu0 %v1269_v47  ;;  %v1278_v57 = vsel %vm82_vm1, %v5657_v53, 0.0 }
 0x677   :  { %v5661_v11 = vpop.eup %4743 }
 0x678   :  { %v1281_v56 = vsel %vm82_vm1, %v5661_v11, 0.0 }
 0x679   :  { %1276 = vadd.xlane.f32.xlu0 %v1275_v51 }
 0x67d   :  { %1279 = vadd.xlane.f32.xlu0 %v1278_v57 }
 0x681   :  { %1282 = vadd.xlane.f32.xlu0 %v1281_v56 }
 0x682   :  { %1301 = vrot.lane.b32.xlu1 %v5251_v31, %s5015_s15 }
 0x68d   :  { %v575_v12 = vpop.xlane.xlu1 %574 }
 0x68e   :  { %4745 = vrcp.f32 %v575_v12 }
 0x691   :  { %v578_v42 = vpop.xlane.xlu0 %577 }
 0x692   :  { %4747 = vrcp.f32 %v578_v42 }
 0x695   :  { %v581_v27 = vpop.xlane.xlu1 %580 }
 0x696   :  { %4749 = vrcp.f32 %v581_v27 }
 0x697   :  { %1299 = vrot.lane.b32.xlu0 %v5255_v36, %s5015_s15 }
 0x699   :  { %v584_v14 = vpop.xlane.xlu0 %583 }
 0x69a   :  { %4751 = vrcp.f32 %v584_v14 }
 0x69b   :  { %v4746_v8 = vpop.eup %4745 }
 0x69c   :  { %v597_v33 = vmul.f32 %v4746_v8, %v5540_v2 }
 0x69d   :  { %v587_v18 = vpop.xlane.xlu1 %586 }
 0x69e   :  { %4753 = vrcp.f32 %v587_v18 }
 0x69f   :  { %v4748_v7 = vpop.eup %4747 }
 0x6a0   :  { %v598_v20 = vmul.f32 %v4748_v7, %v5545_v9 }
 0x6a1   :  { %v590_v31 = vpop.xlane.xlu0 %589 }
 0x6a2   :  { %4755 = vrcp.f32 %v590_v31  ;;  %v603_v13 = vpack.c.bf16 %v598_v20, %v597_v33 }
 0x6a3   :  { %v4750_v41 = vpop.eup %4749 }
 0x6a4   :  { %4120 = vmatmul.mubr.msk.bf16.vlgmr.msra.gmra.mxu0 %vm82_vm1, %v603_v13  ;;  %v599_v48 = vmul.f32 %v4750_v41, %v5550_v19 }
 0x6a5   :  { %4150 = vmatpush3.bf16.msra.mxu0 %v5531_v32  ;;  %4123 = vmatprep.mubr.msk.bf16.mxu0 %vm5004_vm0, %v5003_v1  ;;  %v806_v25 = vpop.xlane.xlu1 %805 }
 0x6a6   :  { %4151 = vmatprep.subr.bf16.mxu0 %v5003_v1  ;;  %4757 = vrcp.f32 %v806_v25 }
 0x6a7   :  { %v4752_v36 = vpop.eup %4751 }
 0x6a8   :  { %v600_v2 = vmul.f32 %v4752_v36, %v5554_v55 }
 0x6a9   :  { %4152 = vmatpush3.bf16.msra.mxu0 %v5533_v35  ;;  %v5690_v35 = vpop.permute.xlu0 %1303  ;;  %v1069_v47 = vpop.permute.xlu1 %1068 }
 0x6aa   :  { %4153 = vmatprep.subr.bf16.mxu0 %v5003_v1  ;;  %v604_v9 = vpack.c.bf16 %v600_v2, %v599_v48 }
 0x6ab   :  { %v4754_v23 = vpop.eup %4753 }
 0x6ac   :  { %4124 = vmatmul.mubr.msk.bf16.gmra.mxu0 %vm82_vm1, %v604_v9  ;;  %v601_v19 = vmul.f32 %v4754_v23, %v5558_v24 }
 0x6ad   :  { %4154 = vmatpush3.bf16.msra.mxu0 %v5584_v3  ;;  %4127 = vmatprep.mubr.msk.bf16.mxu0 %vm5004_vm0, %v5003_v1 }
 0x6ae   :  { %4185 = vmatprep.subr.bf16.mxu0 %v5003_v1 }
 0x6af   :  { %v4756_v32 = vpop.eup %4755 }
 0x6b0   :  { %v602_v55 = vmul.f32 %v4756_v32, %v5562_v60 }
 0x6b2   :  { %v605_v29 = vpack.c.bf16 %v602_v55, %v601_v19 }
 0x6b3   :  { %v4758_v38 = vpop.eup %4757 }
 0x6b4   :  { %4128 = vmatmul.mubr.msk.bf16.gmra.mxu0 %vm82_vm1, %v605_v29  ;;  %v828_v60 = vmul.f32 %v4758_v38, %v5566_v37 }
 0x6b5   :  { %4155 = vmatprep.mubr.msk.bf16.mxu0 %vm5004_vm0, %v5003_v1 }
 0x6d6   :  { %v809_v3 = vpop.xlane.xlu0 %808 }
 0x6d7   :  { %4759 = vrcp.f32 %v809_v3 }
 0x6da   :  { %v812_v63 = vpop.xlane.xlu0 %811 }
 0x6db   :  { %4761 = vrcp.f32 %v812_v63 }
 0x6de   :  { %v815_v26 = vpop.xlane.xlu0 %814 }
 0x6df   :  { %4763 = vrcp.f32 %v815_v26 }
 0x6e2   :  { %v818_v28 = vpop.xlane.xlu0 %817 }
 0x6e3   :  { %4765 = vrcp.f32 %v818_v28 }
 0x6e4   :  { %v4760_v24 = vpop.eup %4759 }
 0x6e5   :  { %v829_v50 = vmul.f32 %v4760_v24, %v5580_v62 }
 0x6e7   :  { %v834_v43 = vpack.c.bf16 %v829_v50, %v828_v60 }
 0x6e8   :  { %v4762_v46 = vpop.eup %4761 }
 0x6e9   :  { %4156 = vmatmul.mubr.msk.bf16.vlgmr.msra.gmra.mxu0 %vm82_vm1, %v834_v43  ;;  %v830_v37 = vmul.f32 %v4762_v46, %v5588_v10 }
 0x6ea   :  { %4186 = vmatpush3.bf16.msra.mxu0 %v5578_v59  ;;  %v821_v51 = vpop.xlane.xlu0 %820  ;;  %4159 = vmatprep.mubr.msk.bf16.mxu0 %vm5004_vm0, %v5003_v1 }
 0x6eb   :  { %4767 = vrcp.f32 %v821_v51  ;;  %4187 = vmatprep.subr.bf16.mxu0 %v5003_v1  ;;  %v1037_v56 = vpop.xlane.xlu1 %1036 }
 0x6ec   :  { %v4764_v57 = vpop.eup %4763 }
 0x6ed   :  { %v831_v62 = vmul.f32 %v4764_v57, %v5594_v16 }
 0x6ee   :  { %4188 = vmatpush3.bf16.msra.mxu0 %v5582_v61  ;;  %v1040_v12 = vpop.xlane.xlu0 %1039 }
 0x6ef   :  { %4769 = vrcp.f32 %v1040_v12  ;;  %4189 = vmatprep.subr.bf16.mxu0 %v5003_v1  ;;  %v835_v59 = vpack.c.bf16 %v831_v62, %v830_v37 }
 0x6f0   :  { %4771 = vrcp.f32 %v1037_v56  ;;  %v4766_v16 = vpop.eup %4765 }
 0x6f1   :  { %4160 = vmatmul.mubr.msk.bf16.gmra.mxu0 %vm82_vm1, %v835_v59  ;;  %v832_v14 = vmul.f32 %v4766_v16, %v5600_v30 }
 0x6f2   :  { %4190 = vmatpush3.bf16.msra.mxu0 %v1069_v47  ;;  %v1043_v42 = vpop.xlane.xlu0 %1042  ;;  %4163 = vmatprep.mubr.msk.bf16.mxu0 %vm5004_vm0, %v5003_v1  ;;  %v1046_v10 = vpop.xlane.xlu1 %1045 }
 0x6f3   :  { %4221 = vmatprep.subr.bf16.mxu0 %v5003_v1  ;;  %4773 = vrcp.f32 %v1043_v42 }
 0x6f4   :  { %4775 = vrcp.f32 %v1046_v10 }
 0x6f6   :  { %v1049_v27 = vpop.xlane.xlu0 %1048  ;;  %v1268_v20 = vpop.xlane.xlu1 %1267 }
 0x6f8   :  { %v4768_v61 = vpop.eup %4767 }
 0x6f9   :  { %v833_v8 = vmul.f32 %v4768_v61, %v5610_v22 }
 0x6fa   :  { %v1052_v18 = vpop.xlane.xlu0 %1051  ;;  %v1274_v22 = vpop.xlane.xlu1 %1273 }
 0x6fb   :  { %v836_v7 = vpack.c.bf16 %v833_v8, %v832_v14  ;;  %4777 = vrcp.f32 %v1052_v18 }
 0x6fc   :  { %v4770_v33 = vpop.eup %4769  ;;  %4779 = vrcp.f32 %v1049_v27 }
 0x6fd   :  { %4164 = vmatmul.mubr.msk.bf16.gmra.mxu0 %vm82_vm1, %v836_v7  ;;  %v4772_v31 = vpop.eup %4771  ;;  %v1060_v41 = vmul.f32 %v4770_v33, %v5619_v15 }
 0x6fe   :  { %v1271_v13 = vpop.xlane.xlu0 %1270  ;;  %4191 = vmatprep.mubr.msk.bf16.mxu0 %vm5004_vm0, %v5003_v1  ;;  %v1059_v36 = vmul.f32 %v4772_v31, %v5612_v4  ;;  %v1302_v32 = vpop.permute.xlu1 %1301 }
 0x6ff   :  { %4781 = vrcp.f32 %v1271_v13 }
 0x700   :  { %v4774_v48 = vpop.eup %4773  ;;  %v1065_v2 = vpack.c.bf16 %v1060_v41, %v1059_v36  ;;  %4783 = vrcp.f32 %v1268_v20 }
 0x701   :  { %v4776_v9 = vpop.eup %4775  ;;  %v1061_v15 = vmul.f32 %v4774_v48, %v5624_v17  ;;  %v4645_v48 = vld [vmem:[%s6742_s7 + $0x8] sm:$0xff]  }
 0x702   :  { %v1277_v30 = vpop.xlane.xlu0 %1276  ;;  %v1062_v4 = vmul.f32 %v4776_v9, %v5626_v21  ;;  %4240 = vmatpush3.bf16.msra.mxu1 %v4645_v48 }
 0x703   :  { %4785 = vrcp.f32 %v1277_v30  ;;  %4241 = vmatprep.subr.bf16.mxu1 %v5003_v1 }
 0x704   :  { %v1066_v55 = vpack.c.bf16 %v1062_v4, %v1061_v15  ;;  %4787 = vrcp.f32 %v1274_v22 }
 0x705   :  { %4192 = vmatmul.mubr.msk.bf16.vlgmr.msra.gmra.mxu0 %vm82_vm1, %v1065_v2  ;;  %v4646_v2 = vld [vmem:[%s6742_s7] sm:$0xff]  }
 0x706   :  { %4222 = vmatpush3.bf16.msra.mxu0 %v5690_v35  ;;  %v1280_v23 = vpop.xlane.xlu0 %1279  ;;  %4195 = vmatprep.mubr.msk.bf16.mxu0 %vm5004_vm0, %v5003_v1 }
 0x707   :  { %4223 = vmatprep.subr.bf16.mxu0 %v5003_v1  ;;  %4242 = vmatpush3.bf16.msra.mxu1 %v4646_v2 }
 0x708   :  { %v4778_v29 = vpop.eup %4777  ;;  %4271 = vmatprep.subr.bf16.mxu1 %v5003_v1 }
 0x709   :  { %v4780_v35 = vpop.eup %4779  ;;  %v1064_v17 = vmul.f32 %v4778_v29, %v5639_v40 }
 0x70a   :  { %4224 = vmatpush3.bf16.msra.mxu0 %v1302_v32  ;;  %v1283_v19 = vpop.xlane.xlu0 %1282  ;;  %v1063_v21 = vmul.f32 %v4780_v35, %v5633_v0 }
 0x70b   :  { %4225 = vmatprep.subr.bf16.mxu0 %v5003_v1  ;;  %4789 = vrcp.f32 %v1283_v19 }
 0x70c   :  { %v1067_v3 = vpack.c.bf16 %v1064_v17, %v1063_v21  ;;  %v4782_v63 = vpop.eup %4781  ;;  %4791 = vrcp.f32 %v1280_v23 }
 0x70d   :  { %4196 = vmatmul.mubr.msk.bf16.gmra.mxu0 %vm82_vm1, %v1066_v55  ;;  %v4784_v26 = vpop.eup %4783  ;;  %v1291_v38 = vmul.f32 %v4782_v63, %v5647_v6 }
 0x70e   :  { %v1300_v25 = vpop.permute.xlu0 %1299  ;;  %4199 = vmatprep.mubr.msk.bf16.mxu0 %vm5004_vm0, %v5003_v1  ;;  %v1290_v24 = vmul.f32 %v4784_v26, %v5635_v44 }
 0x70f   :  { %4226 = vmatpush3.bf16.msra.mxu0 %v1300_v25 }
 0x710   :  { %4255 = vmatprep.subr.bf16.mxu0 %v5003_v1  ;;  %v1296_v40 = vpack.c.bf16 %v1291_v38, %v1290_v24  ;;  %v4786_v60 = vpop.eup %4785 }
 0x711   :  { %v4788_v50 = vpop.eup %4787  ;;  %v1293_v0 = vmul.f32 %v4786_v60, %v5653_v49 }
 0x712   :  { %v1292_v28 = vmul.f32 %v4788_v50, %v5643_v5 }
 0x714   :  { %v1297_v43 = vpack.c.bf16 %v1293_v0, %v1292_v28 }
 0x715   :  { %4200 = vmatmul.mubr.msk.bf16.gmra.mxu0 %vm82_vm1, %v1067_v3 }
 0x716   :  { %4227 = vmatprep.mubr.msk.bf16.mxu0 %vm5004_vm0, %v5003_v1 }
 0x718   :  { %v4790_v46 = vpop.eup %4789 }
 0x719   :  { %v4792_v6 = vpop.eup %4791  ;;  %v1295_v44 = vmul.f32 %v4790_v46, %v5661_v11 }
 0x71a   :  { %v1294_v47 = vmul.f32 %v4792_v6, %v5657_v53 }
 0x71c   :  { %v1298_v51 = vpack.c.bf16 %v1295_v44, %v1294_v47 }
 0x71d   :  { %4228 = vmatmul.mubr.msk.bf16.vlgmr.msra.gmra.mxu0 %vm82_vm1, %v1296_v40 }
 0x71e   :  { %4231 = vmatprep.mubr.msk.bf16.mxu0 %vm5004_vm0, %v5003_v1 }
 0x725   :  { %4232 = vmatmul.mubr.msk.bf16.gmra.mxu0 %vm82_vm1, %v1297_v43 }
 0x726   :  { %4235 = vmatprep.mubr.msk.bf16.mxu0 %vm5004_vm0, %v5003_v1 }
 0x72d   :  { %4236 = vmatmul.mubr.msk.bf16.gmra.mxu0 %vm82_vm1, %v1298_v51 }
 0x72e   :  { %4259 = vmatprep.mubr.msk.bf16.mxu0 %vm5004_vm0, %v5003_v1 }
 0x764   :  { %v5746_v49 = vpop.f32.mrf.mxu0 }
 0x766   :  { %v4121_v5 = vpop.f32.mrf.mxu0 }
 0x768   :  { %v5748_v57 = vpop.f32.mrf.mxu0 }
 0x76a   :  { %v4122_v37 = vpop.f32.mrf.mxu0 }
 0x76c   :  { %v5750_v62 = vpop.f32.mrf.mxu0 }
 0x76e   :  { %v4125_v56 = vpop.f32.mrf.mxu0 }
 0x770   :  { %v5752_v12 = vpop.f32.mrf.mxu0 }
 0x772   :  { %v4126_v11 = vpop.f32.mrf.mxu0 }
 0x774   :  { %v5754_v59 = vpop.f32.mrf.mxu0 }
 0x776   :  { %v4129_v53 = vpop.f32.mrf.mxu0 }
 0x778   :  { %v5756_v42 = vpop.f32.mrf.mxu0 }
 0x77a   :  { %v4130_v10 = vpop.f32.mrf.mxu0 }
 0x7a9   :  { %v889_v16 = vpop.f32.mrf.mxu0 }
 0x7ab   :  { %v4157_v27 = vpop.f32.mrf.mxu0 }
 0x7ad   :  { %v892_v61 = vpop.f32.mrf.mxu0 }
 0x7ae   :  { %v4550_v14 = vpack.i.bf16 %v892_v61, %v889_v16 }
 0x7af   :  { %v4158_v8 = vpop.f32.mrf.mxu0 }
 0x7b0   :  { %4551 = vrot.lane.b32.xlu0 %v4550_v14, %s5016_s1 }
 0x7b1   :  { %v897_v18 = vpop.f32.mrf.mxu0 }
 0x7b3   :  { %v4161_v7 = vpop.f32.mrf.mxu0 }
 0x7b5   :  { %v900_v33 = vpop.f32.mrf.mxu0 }
 0x7b6   :  { %v4565_v32 = vpack.i.bf16 %v900_v33, %v897_v18 }
 0x7b7   :  { %v4162_v20 = vpop.f32.mrf.mxu0 }
 0x7bd   :  { %v905_v31 = vpop.f32.mrf.mxu0 }
 0x7bf   :  { %v4165_v13 = vpop.f32.mrf.mxu0 }
 0x7c1   :  { %v908_v41 = vpop.f32.mrf.mxu0 }
 0x7c2   :  { %v4580_v28 = vpack.i.bf16 %v908_v41, %v905_v31 }
 0x7c3   :  { %v4166_v36 = vpop.f32.mrf.mxu0 }
 0x7c5   :  { %v1120_v30 = vpop.f32.mrf.mxu0 }
 0x7c7   :  { %v4193_v22 = vpop.f32.mrf.mxu0 }
 0x7c9   :  { %v1123_v9 = vpop.f32.mrf.mxu0 }
 0x7ca   :  { %v4555_v23 = vpack.i.bf16 %v1123_v9, %v1120_v30 }
 0x7cb   :  { %v4194_v15 = vpop.f32.mrf.mxu0 }
 0x7cc   :  { %4556 = vrot.lane.b32.xlu0 %v4555_v23, %s5017_s20 }
 0x7cd   :  { %v1128_v4 = vpop.f32.mrf.mxu0 }
 0x7cf   :  { %v4197_v19 = vpop.f32.mrf.mxu0 }
 0x7d0   :  { %4566 = vrot.lane.b32.xlu0 %v4565_v32, %s5016_s1 }
 0x7d1   :  { %v1131_v55 = vpop.f32.mrf.mxu0 }
 0x7d2   :  { %v4570_v60 = vpack.i.bf16 %v1131_v55, %v1128_v4 }
 0x7d3   :  { %v4198_v29 = vpop.f32.mrf.mxu0 }
 0x7d5   :  { %v1136_v35 = vpop.f32.mrf.mxu0 }
 0x7d7   :  { %v4201_v25 = vpop.f32.mrf.mxu0 }
 0x7d9   :  { %v1139_v17 = vpop.f32.mrf.mxu0 }
 0x7da   :  { %v4585_v44 = vpack.i.bf16 %v1139_v17, %v1136_v35 }
 0x7db   :  { %v4202_v21 = vpop.f32.mrf.mxu0 }
 0x7dd   :  { %v1351_v3 = vpop.f32.mrf.mxu0 }
 0x7df   :  { %v4229_v63 = vpop.f32.mrf.mxu0 }
 0x7e1   :  { %v1354_v26 = vpop.f32.mrf.mxu0 }
 0x7e2   :  { %v4560_v38 = vpack.i.bf16 %v1354_v26, %v1351_v3 }
 0x7e3   :  { %v4230_v24 = vpop.f32.mrf.mxu0 }
 0x7e4   :  { %4561 = vrot.lane.b32.xlu1 %v4560_v38, %s5018_s21 }
 0x7e5   :  { %v1359_v40 = vpop.f32.mrf.mxu0 }
 0x7e7   :  { %v4233_v50 = vpop.f32.mrf.mxu0 }
 0x7e8   :  { %4571 = vrot.lane.b32.xlu1 %v4570_v60, %s5017_s20 }
 0x7e9   :  { %v1362_v0 = vpop.f32.mrf.mxu0 }
 0x7ea   :  { %v4575_v43 = vpack.i.bf16 %v1362_v0, %v1359_v40 }
 0x7eb   :  { %v4234_v46 = vpop.f32.mrf.mxu0 }
 0x7ec   :  { %4581 = vrot.lane.b32.xlu1 %v4580_v28, %s5016_s1  ;;  %4576 = vrot.lane.b32.xlu0 %v4575_v43, %s5018_s21 }
 0x7ed   :  { %v1367_v6 = vpop.f32.mrf.mxu0 }
 0x7ef   :  { %v4237_v47 = vpop.f32.mrf.mxu0 }
 0x7f0   :  { %4586 = vrot.lane.b32.xlu0 %v4585_v44, %s5017_s20 }
 0x7f1   :  { %v1370_v51 = vpop.f32.mrf.mxu0 }
 0x7f2   :  { %v4590_v5 = vpack.i.bf16 %v1370_v51, %v1367_v6 }
 0x7f3   :  { %v4238_v37 = vpop.f32.mrf.mxu0 }
 0x7f4   :  { %4591 = vrot.lane.b32.xlu1 %v4590_v5, %s5018_s21 }
 0x822   :  { %v4552_v56 = vpop.permute.xlu0 %4551 }
 0x823   :  { %v4554_v53 = vunpack.i.h.bf16 %v4552_v56  ;;  %v4553_v10 = vunpack.i.l.bf16 %v4552_v56 }
 0x825   :  { %v1447_v14 = vsel %vm461_vm3, %v5748_v57, %v4554_v53  ;;  %v1446_v8 = vsel %vm461_vm3, %v5746_v49, %v4553_v10 }
 0x83e   :  { %v4557_v11 = vpop.permute.xlu0 %4556 }
 0x83f   :  { %v4559_v16 = vunpack.i.h.bf16 %v4557_v11  ;;  %v4558_v27 = vunpack.i.l.bf16 %v4557_v11 }
 0x841   :  { %v1454_v33 = vsel %vm1452_vm4, %v1447_v14, %v4559_v16  ;;  %v1453_v20 = vsel %vm1452_vm4, %v1446_v8, %v4558_v27 }
 0x842   :  { %v4567_v31 = vpop.permute.xlu0 %4566 }
 0x843   :  { %v4569_v48 = vunpack.i.h.bf16 %v4567_v31  ;;  %v4568_v22 = vunpack.i.l.bf16 %v4567_v31 }
 0x845   :  { %v1449_v9 = vsel %vm461_vm3, %v5752_v12, %v4569_v48  ;;  %v1448_v23 = vsel %vm461_vm3, %v5750_v62, %v4568_v22 }
 0x856   :  { %v4562_v61 = vpop.permute.xlu1 %4561 }
 0x857   :  { %v4564_v18 = vunpack.i.h.bf16 %v4562_v61  ;;  %v4563_v7 = vunpack.i.l.bf16 %v4562_v61 }
 0x859   :  { %v1461_v13 = vsel %vm1459_vm5, %v1454_v33, %v4564_v18  ;;  %v1460_v41 = vsel %vm1459_vm5, %v1453_v20, %v4563_v7 }
 0x85a   :  { %v1466_v36 = vpack.c.bf16 %v1461_v13, %v1460_v41  ;;  %v4572_v30 = vpop.permute.xlu1 %4571 }
 0x85b   :  { %v4574_v2 = vunpack.i.h.bf16 %v4572_v30  ;;  %v4573_v57 = vunpack.i.l.bf16 %v4572_v30 }
 0x85c   :  { %4244 = vmatmul.mubr.msk.bf16.vlgmr.msra.gmra.mxu1 %vm151_vm2, %v1466_v36 }
 0x85d   :  { %4247 = vmatprep.mubr.msk.bf16.mxu1 %vm5004_vm0, %v5003_v1  ;;  %v1456_v32 = vsel %vm1452_vm4, %v1449_v9, %v4574_v2  ;;  %v1455_v19 = vsel %vm1452_vm4, %v1448_v23, %v4573_v57 }
 0x85e   :  { %v4577_v49 = vpop.permute.xlu0 %4576  ;;  %v4582_v55 = vpop.permute.xlu1 %4581 }
 0x85f   :  { %v4579_v15 = vunpack.i.h.bf16 %v4577_v49  ;;  %v4578_v4 = vunpack.i.l.bf16 %v4577_v49  ;;  %v4584_v21 = vunpack.i.h.bf16 %v4582_v55  ;;  %v4583_v3 = vunpack.i.l.bf16 %v4582_v55 }
 0x861   :  { %v1463_v29 = vsel %vm1459_vm5, %v1456_v32, %v4579_v15  ;;  %v1462_v35 = vsel %vm1459_vm5, %v1455_v19, %v4578_v4  ;;  %v1451_v26 = vsel %vm461_vm3, %v5756_v42, %v4584_v21  ;;  %v1450_v38 = vsel %vm461_vm3, %v5754_v59, %v4583_v3  ;;  %v3784_v59 = vld [vmem:[%s6739_s4 + $0x8] ss:$0 sm:$0xff] }
 0x862   :  { %v4587_v25 = vpop.permute.xlu0 %4586  ;;  %v1467_v17 = vpack.c.bf16 %v1463_v29, %v1462_v35 }
 0x863   :  { %v4589_v63 = vunpack.i.h.bf16 %v4587_v25  ;;  %v4588_v12 = vunpack.i.l.bf16 %v4587_v25 }
 0x864   :  { %4248 = vmatmul.mubr.msk.bf16.gmra.mxu1 %vm151_vm2, %v1467_v17 }
 0x865   :  { %4251 = vmatprep.mubr.msk.bf16.mxu1 %vm5004_vm0, %v5003_v1  ;;  %v1458_v60 = vsel %vm1452_vm4, %v1451_v26, %v4589_v63  ;;  %v1457_v50 = vsel %vm1452_vm4, %v1450_v38, %v4588_v12 }
 0x866   :  { %v4592_v62 = vpop.permute.xlu1 %4591 }
 0x867   :  { %v4594_v24 = vunpack.i.h.bf16 %v4592_v62  ;;  %v4593_v40 = vunpack.i.l.bf16 %v4592_v62 }
 0x869   :  { %v1465_v0 = vsel %vm1459_vm5, %v1458_v60, %v4594_v24  ;;  %v1464_v28 = vsel %vm1459_vm5, %v1457_v50, %v4593_v40 }
 0x86a   :  { %v1468_v43 = vpack.c.bf16 %v1465_v0, %v1464_v28  ;;  %v4647_v28 = vld [vmem:[%s6743_s8 + $0x8] sm:$0xff]  }
 0x86b   :  { %4256 = vmatpush3.bf16.msra.mxu0 %v4647_v28  ;;  %v3787_v28 = vld [vmem:[%s6744_s9] ss:$0 sm:$0xff] }
 0x86c   :  { %4252 = vmatmul.mubr.msk.bf16.gmra.mxu1 %vm151_vm2, %v1468_v43  ;;  %v4648_v43 = vld [vmem:[%s6743_s8] sm:$0xff]   ;;  %4257 = vmatprep.subr.bf16.mxu0 %v5003_v1 }
 0x86d   :  { %4287 = vmatprep.mubr.msk.bf16.mxu1 %vm5004_vm0, %v5003_v1 }
 0x86f   :  { %4258 = vmatpush3.bf16.msra.mxu0 %v4648_v43 }
 0x870   :  { %4299 = vmatprep.subr.bf16.mxu0 %v5003_v1 }
 0x91c   :  { %v1528_v42 = vpop.f32.mrf.mxu1 }
 0x91d   :  { %v1551_v46 = vadd.f32 %v1528_v42, %v5173_v34 }
 0x91e   :  { %v4245_v6 = vpop.f32.mrf.mxu1 }
 0x91f   :  { %v5812_v44 = vadd.f32 %v3784_v59, %v1551_v46 }
 0x920   :  { %v1531_v47 = vpop.f32.mrf.mxu1 }
 0x921   :  { %v1552_v51 = vadd.f32 %v1531_v47, %v5177_v39  ;;  %v1570_v5 = vsel %vm151_vm2, %v5812_v44, 0.0 }
 0x922   :  { %v4246_v37 = vpop.f32.mrf.mxu1  ;;  %1571 = vadd.xlane.f32.xlu0 %v1570_v5 }
 0x923   :  { %v5817_v56 = vadd.f32 %v3784_v59, %v1552_v51 }
 0x924   :  { %v1536_v11 = vpop.f32.mrf.mxu1 }
 0x925   :  { %v1553_v53 = vadd.f32 %v1536_v11, %v5181_v45  ;;  %v1573_v10 = vsel %vm151_vm2, %v5817_v56, 0.0 }
 0x926   :  { %v4249_v34 = vpop.f32.mrf.mxu1  ;;  %1574 = vadd.xlane.f32.xlu1 %v1573_v10 }
 0x927   :  { %v5822_v16 = vadd.f32 %v3784_v59, %v1553_v53 }
 0x928   :  { %v1539_v27 = vpop.f32.mrf.mxu1 }
 0x929   :  { %v1554_v39 = vadd.f32 %v1539_v27, %v5188_v54  ;;  %v1576_v61 = vsel %vm151_vm2, %v5822_v16, 0.0 }
 0x92a   :  { %1577 = vadd.xlane.f32.xlu0 %v1576_v61  ;;  %v4250_v14 = vpop.f32.mrf.mxu1 }
 0x92b   :  { %v5827_v8 = vadd.f32 %v3784_v59, %v1554_v39 }
 0x92c   :  { %v1544_v18 = vpop.f32.mrf.mxu1 }
 0x92d   :  { %v1555_v45 = vadd.f32 %v1544_v18, %v5186_v52  ;;  %v1579_v7 = vsel %vm151_vm2, %v5827_v8, 0.0 }
 0x92e   :  { %1580 = vadd.xlane.f32.xlu0 %v1579_v7  ;;  %v4253_v33 = vpop.f32.mrf.mxu1 }
 0x92f   :  { %v5832_v20 = vadd.f32 %v3784_v59, %v1555_v45  ;;  %v3785_v45 = vld [vmem:[%s6739_s4 + $0x6] ss:$0 sm:$0xff] }
 0x930   :  { %v1547_v31 = vpop.f32.mrf.mxu1 }
 0x931   :  { %v1556_v54 = vadd.f32 %v1547_v31, %v5194_v58  ;;  %v1582_v13 = vsel %vm151_vm2, %v5832_v20, 0.0 }
 0x932   :  { %1583 = vadd.xlane.f32.xlu1 %v1582_v13  ;;  %v4254_v41 = vpop.f32.mrf.mxu1 }
 0x933   :  { %v5837_v36 = vadd.f32 %v3784_v59, %v1556_v54 }
 0x935   :  { %v1585_v52 = vsel %vm151_vm2, %v5837_v36, 0.0 }
 0x936   :  { %1586 = vadd.xlane.f32.xlu0 %v1585_v52  ;;  %v3786_v52 = vld [vmem:[%s6739_s4 + $0x7] ss:$0 sm:$0xff] }
 0x9ab   :  { %v1572_v30 = vpop.xlane.xlu0 %1571 }
 0x9ac   :  { %v1588_v48 = vmul.f32 0.03125, %v1572_v30 }
 0x9ae   :  { %v1594_v22 = vsub.f32 %v5812_v44, %v1588_v48 }
 0x9af   :  { %v1575_v2 = vpop.xlane.xlu1 %1574 }
 0x9b0   :  { %v1589_v57 = vmul.f32 0.03125, %v1575_v2  ;;  %v1600_v49 = vmul.f32 %v1594_v22, %v1594_v22 }
 0x9b2   :  { %v5843_v58 = vsub.f32 %v5817_v56, %v1589_v57  ;;  %v1606_v9 = vsel %vm151_vm2, %v1600_v49, 0.0 }
 0x9b3   :  { %v1578_v23 = vpop.xlane.xlu0 %1577  ;;  %1607 = vadd.xlane.f32.xlu1 %v1606_v9 }
 0x9b4   :  { %v1590_v15 = vmul.f32 0.03125, %v1578_v23  ;;  %v1601_v4 = vmul.f32 %v5843_v58, %v5843_v58 }
 0x9b6   :  { %v5849_v32 = vsub.f32 %v5822_v16, %v1590_v15  ;;  %v1609_v19 = vsel %vm151_vm2, %v1601_v4, 0.0 }
 0x9b7   :  { %v1581_v55 = vpop.xlane.xlu0 %1580  ;;  %1610 = vadd.xlane.f32.xlu0 %v1609_v19 }
 0x9b8   :  { %v1591_v29 = vmul.f32 0.03125, %v1581_v55  ;;  %v1602_v35 = vmul.f32 %v5849_v32, %v5849_v32 }
 0x9ba   :  { %v5855_v25 = vsub.f32 %v5827_v8, %v1591_v29  ;;  %v1612_v17 = vsel %vm151_vm2, %v1602_v35, 0.0 }
 0x9bb   :  { %1613 = vadd.xlane.f32.xlu1 %v1612_v17  ;;  %v1584_v21 = vpop.xlane.xlu1 %1583 }
 0x9bc   :  { %v1592_v3 = vmul.f32 0.03125, %v1584_v21  ;;  %v1603_v63 = vmul.f32 %v5855_v25, %v5855_v25 }
 0x9be   :  { %v5861_v12 = vsub.f32 %v5832_v20, %v1592_v3  ;;  %v1615_v62 = vsel %vm151_vm2, %v1603_v63, 0.0 }
 0x9bf   :  { %1616 = vadd.xlane.f32.xlu0 %v1615_v62  ;;  %v1587_v26 = vpop.xlane.xlu0 %1586 }
 0x9c0   :  { %v1593_v38 = vmul.f32 0.03125, %v1587_v26  ;;  %v1604_v24 = vmul.f32 %v5861_v12, %v5861_v12  ;;  %v4650_v26 = vld [vmem:[%s6745_s10 + $0x30] sm:$0xff]  }
 0x9c2   :  { %v1599_v40 = vsub.f32 %v5837_v36, %v1593_v38  ;;  %v1618_v60 = vsel %vm151_vm2, %v1604_v24, 0.0  ;;  %v4651_v38 = vld [vmem:[%s6745_s10 + $0x28] sm:$0xff]   ;;  %v4652_v24 = vld [vmem:[%s6745_s10 + $0x20] sm:$0xff]  }
 0x9c3   :  { %1619 = vadd.xlane.f32.xlu1 %v1618_v60  ;;  %v4654_v60 = vld [vmem:[%s6745_s10 + $0x10] sm:$0xff]  }
 0x9c4   :  { %v1605_v50 = vmul.f32 %v1599_v40, %v1599_v40 }
 0x9c6   :  { %v1621_v0 = vsel %vm151_vm2, %v1605_v50, 0.0  ;;  %v4655_v50 = vld [vmem:[%s6745_s10 + $0x8] sm:$0xff]  }
 0x9c7   :  { %1622 = vadd.xlane.f32.xlu0 %v1621_v0  ;;  %v4656_v0 = vld [vmem:[%s6745_s10] sm:$0xff]  }
 0xa3c   :  { %v1608_v42 = vpop.xlane.xlu1 %1607 }
 0xa3d   :  { %v1624_v59 = vmul.f32 0.03125, %v1608_v42 }
 0xa3f   :  { %v1630_v46 = vadd.f32 1e-05, %v1624_v59 }
 0xa40   :  { %v1611_v6 = vpop.xlane.xlu0 %1610 }
 0xa41   :  { %4793 = vrsqrt.f32 %v1630_v46  ;;  %v1625_v47 = vmul.f32 0.03125, %v1611_v6 }
 0xa43   :  { %v1631_v51 = vadd.f32 1e-05, %v1625_v47 }
 0xa44   :  { %v1614_v5 = vpop.xlane.xlu1 %1613 }
 0xa45   :  { %4795 = vrsqrt.f32 %v1631_v51  ;;  %v1626_v37 = vmul.f32 0.03125, %v1614_v5 }
 0xa47   :  { %v1632_v11 = vadd.f32 1e-05, %v1626_v37 }
 0xa48   :  { %v1617_v53 = vpop.xlane.xlu0 %1616 }
 0xa49   :  { %4797 = vrsqrt.f32 %v1632_v11  ;;  %v1627_v10 = vmul.f32 0.03125, %v1617_v53 }
 0xa4b   :  { %v1633_v34 = vadd.f32 1e-05, %v1627_v10 }
 0xa4c   :  { %v1620_v27 = vpop.xlane.xlu1 %1619 }
 0xa4d   :  { %4799 = vrsqrt.f32 %v1633_v34  ;;  %v1628_v39 = vmul.f32 0.03125, %v1620_v27 }
 0xa4e   :  { %v4794_v61 = vpop.eup %4793 }
 0xa4f   :  { %v1642_v14 = vmul.f32 %v4794_v61, %v1594_v22  ;;  %v1634_v18 = vadd.f32 1e-05, %v1628_v39 }
 0xa50   :  { %v1623_v7 = vpop.xlane.xlu0 %1622 }
 0xa51   :  { %4801 = vrsqrt.f32 %v1634_v18  ;;  %v1629_v33 = vmul.f32 0.03125, %v1623_v7  ;;  %v1652_v54 = vmul.f32 %v3785_v45, %v1642_v14 }
 0xa52   :  { %v4796_v31 = vpop.eup %4795 }
 0xa53   :  { %v1643_v13 = vmul.f32 %v4796_v31, %v5843_v58  ;;  %v1635_v41 = vadd.f32 1e-05, %v1629_v33  ;;  %v1662_v22 = vadd.f32 %v3786_v52, %v1652_v54 }
 0xa55   :  { %v1653_v30 = vmul.f32 %v3785_v45, %v1643_v13  ;;  %4803 = vrsqrt.f32 %v1635_v41 }
 0xa56   :  { %v4798_v48 = vpop.eup %4797 }
 0xa57   :  { %v1663_v2 = vadd.f32 %v3786_v52, %v1653_v30  ;;  %v1644_v57 = vmul.f32 %v4798_v48, %v5849_v32 }
 0xa59   :  { %v1668_v49 = vpack.c.bf16 %v1663_v2, %v1662_v22  ;;  %v1654_v15 = vmul.f32 %v3785_v45, %v1644_v57 }
 0xa5a   :  { %v4800_v9 = vpop.eup %4799 }
 0xa5b   :  { %4260 = vmatmul.mubr.msk.bf16.vlgmr.msra.gmra.mxu0 %vm151_vm2, %v1668_v49  ;;  %v1645_v23 = vmul.f32 %v4800_v9, %v5855_v25  ;;  %v1664_v19 = vadd.f32 %v3786_v52, %v1654_v15 }
 0xa5c   :  { %4263 = vmatprep.mubr.msk.bf16.mxu0 %vm5004_vm0, %v5003_v1 }
 0xa5d   :  { %v1655_v58 = vmul.f32 %v3785_v45, %v1645_v23 }
 0xa5e   :  { %v4802_v4 = vpop.eup %4801 }
 0xa5f   :  { %v1665_v55 = vadd.f32 %v3786_v52, %v1655_v58  ;;  %v1646_v29 = vmul.f32 %v4802_v4, %v5861_v12  ;;  %v4649_v12 = vld [vmem:[%s6745_s10 + $0x38] sm:$0xff]  }
 0xa60   :  { %4272 = vmatpush3.bf16.msra.mxu1 %v4649_v12 }
 0xa61   :  { %v1669_v35 = vpack.c.bf16 %v1665_v55, %v1664_v19  ;;  %v1656_v21 = vmul.f32 %v3785_v45, %v1646_v29  ;;  %4273 = vmatprep.subr.bf16.mxu1 %v5003_v1 }
 0xa62   :  { %v4804_v17 = vpop.eup %4803 }
 0xa63   :  { %4264 = vmatmul.mubr.msk.bf16.gmra.mxu0 %vm151_vm2, %v1669_v35  ;;  %v1647_v32 = vmul.f32 %v4804_v17, %v1599_v40  ;;  %v1666_v3 = vadd.f32 %v3786_v52, %v1656_v21  ;;  %v4653_v40 = vld [vmem:[%s6745_s10 + $0x18] sm:$0xff]  }
 0xa64   :  { %4267 = vmatprep.mubr.msk.bf16.mxu0 %vm5004_vm0, %v5003_v1  ;;  %4274 = vmatpush3.bf16.msra.mxu1 %v4650_v26 }
 0xa65   :  { %v1657_v25 = vmul.f32 %v3785_v45, %v1647_v32  ;;  %4275 = vmatprep.subr.bf16.mxu1 %v5003_v1 }
 0xa67   :  { %v1667_v63 = vadd.f32 %v3786_v52, %v1657_v25 }
 0xa68   :  { %4276 = vmatpush3.bf16.msra.mxu1 %v4651_v38 }
 0xa69   :  { %v1670_v62 = vpack.c.bf16 %v1667_v63, %v1666_v3  ;;  %4277 = vmatprep.subr.bf16.mxu1 %v5003_v1 }
 0xa6b   :  { %4268 = vmatmul.mubr.msk.bf16.gmra.mxu0 %vm151_vm2, %v1670_v62 }
 0xa6c   :  { %4303 = vmatprep.mubr.msk.bf16.mxu0 %vm5004_vm0, %v5003_v1  ;;  %4278 = vmatpush3.bf16.msra.mxu1 %v4652_v24 }
 0xa6d   :  { %4279 = vmatprep.subr.bf16.mxu1 %v5003_v1 }
 0xa70   :  { %4280 = vmatpush3.bf16.msra.mxu1 %v4653_v40 }
 0xa71   :  { %4281 = vmatprep.subr.bf16.mxu1 %v5003_v1 }
 0xa74   :  { %4282 = vmatpush3.bf16.msra.mxu1 %v4654_v60 }
 0xa75   :  { %4283 = vmatprep.subr.bf16.mxu1 %v5003_v1 }
 0xa78   :  { %4284 = vmatpush3.bf16.msra.mxu1 %v4655_v50 }
 0xa79   :  { %4285 = vmatprep.subr.bf16.mxu1 %v5003_v1 }
 0xa7c   :  { %4286 = vmatpush3.bf16.msra.mxu1 %v4656_v0 }
 0xa7d   :  { %4333 = vmatprep.subr.bf16.mxu1 %v5003_v1 }
 0xb1b   :  { %v1737_v43 = vpop.f32.mrf.mxu0 }
 0xb1c   :  { %v1738_v42 = vadd.f32 %v3787_v28, %v1737_v43 }
 0xb1d   :  { %v4261_v59 = vpop.f32.mrf.mxu0 }
 0xb1e   :  { %v3793_v46 = vmul.f32 -1.702, %v1738_v42 }
 0xb1f   :  { %v1740_v6 = vpop.f32.mrf.mxu0 }
 0xb20   :  { %v1772_v47 = vmul.f32 1.442695, %v3793_v46  ;;  %v1741_v51 = vadd.f32 %v3787_v28, %v1740_v6 }
 0xb21   :  { %v4262_v5 = vpop.f32.mrf.mxu0 }
 0xb22   :  { %4805 = vpow2.f32 %v1772_v47  ;;  %v3794_v37 = vmul.f32 -1.702, %v1741_v51 }
 0xb23   :  { %v1745_v11 = vpop.f32.mrf.mxu0 }
 0xb24   :  { %v1774_v53 = vmul.f32 1.442695, %v3794_v37  ;;  %v1746_v10 = vadd.f32 %v3787_v28, %v1745_v11 }
 0xb25   :  { %v4265_v34 = vpop.f32.mrf.mxu0 }
 0xb26   :  { %4807 = vpow2.f32 %v1774_v53  ;;  %v3795_v27 = vmul.f32 -1.702, %v1746_v10 }
 0xb27   :  { %v1748_v39 = vpop.f32.mrf.mxu0 }
 0xb28   :  { %v1776_v61 = vmul.f32 1.442695, %v3795_v27  ;;  %v1749_v14 = vadd.f32 %v3787_v28, %v1748_v39 }
 0xb29   :  { %v4266_v18 = vpop.f32.mrf.mxu0 }
 0xb2a   :  { %4809 = vpow2.f32 %v1776_v61  ;;  %v3796_v45 = vmul.f32 -1.702, %v1749_v14 }
 0xb2b   :  { %v1753_v7 = vpop.f32.mrf.mxu0 }
 0xb2c   :  { %v1778_v33 = vmul.f32 1.442695, %v3796_v45  ;;  %v1754_v31 = vadd.f32 %v3787_v28, %v1753_v7 }
 0xb2d   :  { %v4269_v54 = vpop.f32.mrf.mxu0 }
 0xb2e   :  { %4811 = vpow2.f32 %v1778_v33  ;;  %v3797_v13 = vmul.f32 -1.702, %v1754_v31 }
 0xb2f   :  { %v4806_v41 = vpop.eup %4805  ;;  %v1756_v52 = vpop.f32.mrf.mxu0 }
 0xb30   :  { %v1784_v30 = vadd.f32 1.0, %v4806_v41  ;;  %v1780_v48 = vmul.f32 1.442695, %v3797_v13  ;;  %v1757_v22 = vadd.f32 %v3787_v28, %v1756_v52 }
 0xb31   :  { %v4270_v2 = vpop.f32.mrf.mxu0 }
 0xb32   :  { %v3798_v57 = vmul.f32 -1.702, %v1757_v22  ;;  %4813 = vpow2.f32 %v1780_v48 }
 0xb33   :  { %v4808_v49 = vpop.eup %4807  ;;  %4815 = vrcp.f32 %v1784_v30 }
 0xb34   :  { %v1785_v9 = vadd.f32 1.0, %v4808_v49  ;;  %v1782_v23 = vmul.f32 1.442695, %v3798_v57 }
 0xb36   :  { %4817 = vrcp.f32 %v1785_v9 }
 0xb37   :  { %v4810_v15 = vpop.eup %4809  ;;  %4819 = vpow2.f32 %v1782_v23 }
 0xb38   :  { %v1786_v58 = vadd.f32 1.0, %v4810_v15 }
 0xb3a   :  { %4821 = vrcp.f32 %v1786_v58 }
 0xb3b   :  { %v4812_v4 = vpop.eup %4811 }
 0xb3c   :  { %v1787_v19 = vadd.f32 1.0, %v4812_v4 }
 0xb3e   :  { %4823 = vrcp.f32 %v1787_v19 }
 0xb3f   :  { %v4814_v55 = vpop.eup %4813 }
 0xb40   :  { %v4816_v29 = vpop.eup %4815  ;;  %v1788_v35 = vadd.f32 1.0, %v4814_v55 }
 0xb41   :  { %v1802_v21 = vmul.f32 %v4816_v29, %v1738_v42  ;;  %v3807_v42 = vld [vmem:[%s6739_s4 + $0x9] ss:$0 sm:$0xff] }
 0xb42   :  { %4825 = vrcp.f32 %v1788_v35 }
 0xb43   :  { %v4818_v17 = vpop.eup %4817 }
 0xb44   :  { %v4820_v32 = vpop.eup %4819  ;;  %v1803_v25 = vmul.f32 %v4818_v17, %v1741_v51 }
 0xb45   :  { %v1789_v3 = vadd.f32 1.0, %v4820_v32 }
 0xb46   :  { %v1808_v63 = vpack.c.bf16 %v1803_v25, %v1802_v21 }
 0xb47   :  { %4827 = vrcp.f32 %v1789_v3  ;;  %v4822_v62 = vpop.eup %4821 }
 0xb48   :  { %4288 = vmatmul.mubr.bf16.vlgmr.msra.gmra.mxu1 %v1808_v63  ;;  %v1804_v26 = vmul.f32 %v4822_v62, %v1746_v10 }
 0xb49   :  { %4291 = vmatprep.mubr.msk.bf16.mxu1 %vm5004_vm0, %v5003_v1 }
 0xb4b   :  { %v4824_v12 = vpop.eup %4823 }
 0xb4c   :  { %v1805_v38 = vmul.f32 %v4824_v12, %v1749_v14 }
 0xb4e   :  { %v1809_v24 = vpack.c.bf16 %v1805_v38, %v1804_v26 }
 0xb4f   :  { %v4826_v40 = vpop.eup %4825 }
 0xb50   :  { %4292 = vmatmul.mubr.bf16.gmra.mxu1 %v1809_v24  ;;  %v1806_v50 = vmul.f32 %v4826_v40, %v1754_v31 }
 0xb51   :  { %4295 = vmatprep.mubr.msk.bf16.mxu1 %vm5004_vm0, %v5003_v1 }
 0xb54   :  { %v4828_v60 = vpop.eup %4827 }
 0xb55   :  { %v1807_v0 = vmul.f32 %v4828_v60, %v1757_v22 }
 0xb57   :  { %v1810_v28 = vpack.c.bf16 %v1807_v0, %v1806_v50  ;;  %v4657_v0 = vld [vmem:[%s6740_s5 + $0x18] sm:$0xff]  }
 0xb58   :  { %4300 = vmatpush3.bf16.msra.mxu0 %v4657_v0 }
 0xb59   :  { %4296 = vmatmul.mubr.bf16.gmra.mxu1 %v1810_v28  ;;  %v4658_v28 = vld [vmem:[%s6740_s5 + $0x10] sm:$0xff]   ;;  %4301 = vmatprep.subr.bf16.mxu0 %v5003_v1 }
 0xb5a   :  { %4339 = vmatprep.mubr.msk.bf16.mxu1 %vm5004_vm0, %v5003_v1 }
 0xb5c   :  { %4302 = vmatpush3.bf16.msra.mxu0 %v4658_v28 }
 0xb5d   :  { %4315 = vmatprep.subr.bf16.mxu0 %v5003_v1 }
 0xc08   :  { %v1909_v43 = vpop.f32.mrf.mxu1 }
 0xc09   :  { %v1932_v59 = vadd.f32 %v1909_v43, %v5812_v44 }
 0xc0a   :  { %v4289_v46 = vpop.f32.mrf.mxu1 }
 0xc0b   :  { %v5941_v6 = vadd.f32 %v3807_v42, %v1932_v59 }
 0xc0c   :  { %v1912_v47 = vpop.f32.mrf.mxu1 }
 0xc0d   :  { %v1933_v51 = vadd.f32 %v1912_v47, %v5817_v56  ;;  %v1951_v5 = vsel %vm151_vm2, %v5941_v6, 0.0 }
 0xc0e   :  { %1952 = vadd.xlane.f32.xlu1 %v1951_v5  ;;  %v4290_v37 = vpop.f32.mrf.mxu1 }
 0xc0f   :  { %v5946_v11 = vadd.f32 %v3807_v42, %v1933_v51 }
 0xc10   :  { %v1917_v53 = vpop.f32.mrf.mxu1 }
 0xc11   :  { %v1934_v10 = vadd.f32 %v1917_v53, %v5822_v16  ;;  %v1954_v34 = vsel %vm151_vm2, %v5946_v11, 0.0 }
 0xc12   :  { %1955 = vadd.xlane.f32.xlu0 %v1954_v34  ;;  %v4293_v44 = vpop.f32.mrf.mxu1 }
 0xc13   :  { %v5951_v27 = vadd.f32 %v3807_v42, %v1934_v10 }
 0xc14   :  { %v1920_v39 = vpop.f32.mrf.mxu1 }
 0xc15   :  { %v1935_v56 = vadd.f32 %v1920_v39, %v5827_v8  ;;  %v1957_v61 = vsel %vm151_vm2, %v5951_v27, 0.0 }
 0xc16   :  { %1958 = vadd.xlane.f32.xlu1 %v1957_v61  ;;  %v4294_v14 = vpop.f32.mrf.mxu1 }
 0xc17   :  { %v5956_v18 = vadd.f32 %v3807_v42, %v1935_v56 }
 0xc19   :  { %v1925_v45 = vpop.f32.mrf.mxu1  ;;  %v1960_v16 = vsel %vm151_vm2, %v5956_v18, 0.0 }
 0xc1a   :  { %v1936_v7 = vadd.f32 %v1925_v45, %v5832_v20  ;;  %1961 = vadd.xlane.f32.xlu0 %v1960_v16  ;;  %v3808_v45 = vld [vmem:[%s6739_s4 + $0xa] ss:$0 sm:$0xff] }
 0xc1b   :  { %v4297_v33 = vpop.f32.mrf.mxu1 }
 0xc1c   :  { %v5961_v31 = vadd.f32 %v3807_v42, %v1936_v7 }
 0xc1d   :  { %v1928_v54 = vpop.f32.mrf.mxu1 }
 0xc1e   :  { %v1937_v8 = vadd.f32 %v1928_v54, %v5837_v36  ;;  %v1963_v13 = vsel %vm151_vm2, %v5961_v31, 0.0 }
 0xc1f   :  { %1964 = vadd.xlane.f32.xlu1 %v1963_v13  ;;  %v4298_v41 = vpop.f32.mrf.mxu1 }
 0xc20   :  { %v5966_v52 = vadd.f32 %v3807_v42, %v1937_v8 }
 0xc22   :  { %v1966_v30 = vsel %vm151_vm2, %v5966_v52, 0.0 }
 0xc23   :  { %1967 = vadd.xlane.f32.xlu0 %v1966_v30  ;;  %v3809_v30 = vld [vmem:[%s6739_s4 + $0xb] ss:$0 sm:$0xff] }
 0xc97   :  { %v1953_v48 = vpop.xlane.xlu1 %1952 }
 0xc98   :  { %v1969_v20 = vmul.f32 0.03125, %v1953_v48 }
 0xc9a   :  { %v1975_v22 = vsub.f32 %v5941_v6, %v1969_v20 }
 0xc9b   :  { %v1956_v2 = vpop.xlane.xlu0 %1955 }
 0xc9c   :  { %v1970_v57 = vmul.f32 0.03125, %v1956_v2  ;;  %v1981_v49 = vmul.f32 %v1975_v22, %v1975_v22 }
 0xc9e   :  { %v5972_v36 = vsub.f32 %v5946_v11, %v1970_v57  ;;  %v1987_v9 = vsel %vm151_vm2, %v1981_v49, 0.0 }
 0xc9f   :  { %v1959_v23 = vpop.xlane.xlu1 %1958  ;;  %1988 = vadd.xlane.f32.xlu1 %v1987_v9 }
 0xca0   :  { %v1971_v15 = vmul.f32 0.03125, %v1959_v23  ;;  %v1982_v58 = vmul.f32 %v5972_v36, %v5972_v36 }
 0xca2   :  { %v5978_v4 = vsub.f32 %v5951_v27, %v1971_v15  ;;  %v1990_v19 = vsel %vm151_vm2, %v1982_v58, 0.0 }
 0xca3   :  { %v1962_v55 = vpop.xlane.xlu0 %1961  ;;  %1991 = vadd.xlane.f32.xlu0 %v1990_v19 }
 0xca4   :  { %v1972_v29 = vmul.f32 0.03125, %v1962_v55  ;;  %v1983_v35 = vmul.f32 %v5978_v4, %v5978_v4 }
 0xca6   :  { %v5984_v17 = vsub.f32 %v5956_v18, %v1972_v29  ;;  %v1993_v32 = vsel %vm151_vm2, %v1983_v35, 0.0 }
 0xca7   :  { %1994 = vadd.xlane.f32.xlu1 %v1993_v32 }
 0xca8   :  { %v1965_v21 = vpop.xlane.xlu1 %1964  ;;  %v1984_v25 = vmul.f32 %v5984_v17, %v5984_v17 }
 0xca9   :  { %v1973_v3 = vmul.f32 0.03125, %v1965_v21 }
 0xcaa   :  { %v1996_v63 = vsel %vm151_vm2, %v1984_v25, 0.0 }
 0xcab   :  { %v5991_v62 = vsub.f32 %v5961_v31, %v1973_v3  ;;  %1997 = vadd.xlane.f32.xlu0 %v1996_v63 }
 0xcac   :  { %v1968_v12 = vpop.xlane.xlu0 %1967 }
 0xcad   :  { %v1974_v26 = vmul.f32 0.03125, %v1968_v12  ;;  %v1985_v38 = vmul.f32 %v5991_v62, %v5991_v62 }
 0xcaf   :  { %v5996_v24 = vsub.f32 %v5966_v52, %v1974_v26  ;;  %v1999_v40 = vsel %vm151_vm2, %v1985_v38, 0.0 }
 0xcb0   :  { %2000 = vadd.xlane.f32.xlu1 %v1999_v40 }
 0xcb1   :  { %v1986_v60 = vmul.f32 %v5996_v24, %v5996_v24 }
 0xcb3   :  { %v2002_v50 = vsel %vm151_vm2, %v1986_v60, 0.0 }
 0xcb4   :  { %2003 = vadd.xlane.f32.xlu0 %v2002_v50 }
 0xd28   :  { %v1989_v43 = vpop.xlane.xlu1 %1988 }
 0xd29   :  { %v2005_v42 = vmul.f32 0.03125, %v1989_v43 }
 0xd2b   :  { %v2011_v59 = vadd.f32 1e-05, %v2005_v42 }
 0xd2c   :  { %v1992_v46 = vpop.xlane.xlu0 %1991 }
 0xd2d   :  { %4829 = vrsqrt.f32 %v2011_v59  ;;  %v2006_v47 = vmul.f32 0.03125, %v1992_v46 }
 0xd2f   :  { %v2012_v51 = vadd.f32 1e-05, %v2006_v47 }
 0xd30   :  { %v1995_v5 = vpop.xlane.xlu1 %1994 }
 0xd31   :  { %4831 = vrsqrt.f32 %v2012_v51  ;;  %v2007_v37 = vmul.f32 0.03125, %v1995_v5 }
 0xd33   :  { %v2013_v53 = vadd.f32 1e-05, %v2007_v37 }
 0xd34   :  { %v1998_v10 = vpop.xlane.xlu0 %1997 }
 0xd35   :  { %4833 = vrsqrt.f32 %v2013_v53  ;;  %v2008_v34 = vmul.f32 0.03125, %v1998_v10 }
 0xd37   :  { %v2014_v44 = vadd.f32 1e-05, %v2008_v34 }
 0xd39   :  { %4835 = vrsqrt.f32 %v2014_v44  ;;  %v2001_v39 = vpop.xlane.xlu1 %2000 }
 0xd3a   :  { %v4830_v56 = vpop.eup %4829  ;;  %v2009_v61 = vmul.f32 0.03125, %v2001_v39 }
 0xd3b   :  { %v2023_v14 = vmul.f32 %v4830_v56, %v1975_v22 }
 0xd3c   :  { %v2015_v16 = vadd.f32 1e-05, %v2009_v61 }
 0xd3d   :  { %v2004_v7 = vpop.xlane.xlu0 %2003  ;;  %v2033_v8 = vmul.f32 %v3808_v45, %v2023_v14 }
 0xd3e   :  { %v4832_v33 = vpop.eup %4831  ;;  %4837 = vrsqrt.f32 %v2015_v16  ;;  %v2010_v54 = vmul.f32 0.03125, %v2004_v7 }
 0xd3f   :  { %v2024_v13 = vmul.f32 %v4832_v33, %v5972_v36  ;;  %v2043_v22 = vadd.f32 %v3809_v30, %v2033_v8 }
 0xd40   :  { %v2016_v41 = vadd.f32 1e-05, %v2010_v54 }
 0xd41   :  { %v2034_v48 = vmul.f32 %v3808_v45, %v2024_v13 }
 0xd42   :  { %v4834_v20 = vpop.eup %4833  ;;  %4839 = vrsqrt.f32 %v2016_v41 }
 0xd43   :  { %v2044_v2 = vadd.f32 %v3809_v30, %v2034_v48  ;;  %v2025_v57 = vmul.f32 %v4834_v20, %v5978_v4 }
 0xd45   :  { %v2049_v49 = vpack.c.bf16 %v2044_v2, %v2043_v22  ;;  %v2035_v15 = vmul.f32 %v3808_v45, %v2025_v57 }
 0xd46   :  { %v4836_v9 = vpop.eup %4835 }
 0xd47   :  { %4304 = vmatmul.mubr.msk.bf16.vlgmr.msra.gmra.mxu0 %vm151_vm2, %v2049_v49  ;;  %v2026_v23 = vmul.f32 %v4836_v9, %v5984_v17  ;;  %v2045_v19 = vadd.f32 %v3809_v30, %v2035_v15 }
 0xd48   :  { %4307 = vmatprep.mubr.msk.bf16.mxu0 %vm5004_vm0, %v5003_v1 }
 0xd49   :  { %v2036_v36 = vmul.f32 %v3808_v45, %v2026_v23 }
 0xd4b   :  { %v4838_v58 = vpop.eup %4837  ;;  %v2046_v55 = vadd.f32 %v3809_v30, %v2036_v36 }
 0xd4c   :  { %v2027_v29 = vmul.f32 %v4838_v58, %v5991_v62 }
 0xd4d   :  { %v2050_v35 = vpack.c.bf16 %v2046_v55, %v2045_v19 }
 0xd4e   :  { %v2037_v17 = vmul.f32 %v3808_v45, %v2027_v29 }
 0xd4f   :  { %v4840_v32 = vpop.eup %4839  ;;  %4308 = vmatmul.mubr.msk.bf16.gmra.mxu0 %vm151_vm2, %v2050_v35 }
 0xd50   :  { %4311 = vmatprep.mubr.msk.bf16.mxu0 %vm5004_vm0, %v5003_v1  ;;  %v2028_v4 = vmul.f32 %v4840_v32, %v5996_v24  ;;  %v2047_v25 = vadd.f32 %v3809_v30, %v2037_v17  ;;  %v3815_v24 = vld [vmem:[%s6741_s6 + $0x1] ss:$0 sm:$0xff] }
 0xd52   :  { %v2038_v21 = vmul.f32 %v3808_v45, %v2028_v4 }
 0xd54   :  { %v2048_v3 = vadd.f32 %v3809_v30, %v2038_v21 }
 0xd56   :  { %v2051_v63 = vpack.c.bf16 %v2048_v3, %v2047_v25 }
 0xd58   :  { %4312 = vmatmul.mubr.msk.bf16.gmra.mxu0 %vm151_vm2, %v2051_v63 }
 0xd59   :  { %4321 = vmatprep.mubr.msk.bf16.mxu0 %vm5004_vm0, %v5003_v1 }
 0xe07   :  { %v2120_v62 = vpop.f32.mrf.mxu0 }
 0xe08   :  { %v2121_v51 = vadd.f32 %v3815_v24, %v2120_v62 }
 0xe09   :  { %v4305_v12 = vpop.f32.mrf.mxu0 }
 0xe0a   :  { %v6155_v12 = vld [vmem:[%s6738_s3] sm:$0xff] }
 0xe0b   :  { %v2123_v26 = vpop.f32.mrf.mxu0 }
 0xe0c   :  { %v2124_v46 = vadd.f32 %v3815_v24, %v2123_v26 }
 0xe0d   :  { %v4306_v38 = vpop.f32.mrf.mxu0 }
 0xe0e   :  { %v6039_v10 = vpack.c.bf16 %v2124_v46, %v2121_v51 }
 0xe0f   :  { %v2128_v40 = vpop.f32.mrf.mxu0 }
 0xe10   :  { %v2129_v0 = vadd.f32 %v3815_v24, %v2128_v40 }
 0xe11   :  { %v4309_v60 = vpop.f32.mrf.mxu0 }
 0xe13   :  { %v2131_v50 = vpop.f32.mrf.mxu0 }
 0xe14   :  { %v2132_v28 = vadd.f32 %v3815_v24, %v2131_v50 }
 0xe15   :  { %v4310_v43 = vpop.f32.mrf.mxu0 }
 0xe16   :  { %v6033_v42 = vpack.c.bf16 %v2132_v28, %v2129_v0 }
 0xe18   :  { %v2136_v59 = vpop.f32.mrf.mxu0  ;;  %2151 = vrot.lane.b32.xlu0 %v6033_v42, %s5005_s24 }
 0xe19   :  { %v2137_v37 = vadd.f32 %v3815_v24, %v2136_v59  ;;  %v6175_v59 = vld [vmem:[%s6738_s3 + $0x10] sm:$0xff] }
 0xe1a   :  { %v4313_v47 = vpop.f32.mrf.mxu0 }
 0xe1c   :  { %v2139_v5 = vpop.f32.mrf.mxu0  ;;  %2382 = vrot.lane.b32.xlu0 %v6033_v42, %s5006_s25 }
 0xe1d   :  { %v2140_v53 = vadd.f32 %v3815_v24, %v2139_v5  ;;  %v6165_v24 = vld [vmem:[%s6738_s3 + $0x8] sm:$0xff] }
 0xe1e   :  { %v4314_v34 = vpop.f32.mrf.mxu0 }
 0xe1f   :  { %v6041_v44 = vpack.c.bf16 %v2140_v53, %v2137_v37  ;;  %v6185_v37 = vld [vmem:[%s6738_s3 + $0x18] sm:$0xff] }
 0xe20   :  { %2374 = vrot.lane.b32.xlu0 %v6039_v10, %s5008_s27 }
 0xe21   :  { %2153 = vrot.lane.b32.xlu1 %v6041_v44, %s5005_s24 }
 0xe24   :  { %2376 = vrot.lane.b32.xlu0 %v6033_v42, %s5008_s27 }
 0xe25   :  { %2149 = vrot.lane.b32.xlu1 %v6039_v10, %s5005_s24 }
 0xe28   :  { %2378 = vrot.lane.b32.xlu0 %v6041_v44, %s5008_s27 }
 0xe29   :  { %2384 = vrot.lane.b32.xlu1 %v6041_v44, %s5006_s25 }
 0xe2c   :  { %2605 = vrot.lane.b32.xlu0 %v6039_v10, %s5010_s29 }
 0xe2d   :  { %2380 = vrot.lane.b32.xlu1 %v6039_v10, %s5006_s25 }
 0xe30   :  { %2607 = vrot.lane.b32.xlu0 %v6033_v42, %s5010_s29 }
 0xe31   :  { %2615 = vrot.lane.b32.xlu1 %v6041_v44, %s5007_s26 }
 0xe34   :  { %2609 = vrot.lane.b32.xlu0 %v6041_v44, %s5010_s29 }
 0xe35   :  { %2613 = vrot.lane.b32.xlu1 %v6033_v42, %s5007_s26 }
 0xe38   :  { %2836 = vrot.lane.b32.xlu0 %v6039_v10, %s5011_s30 }
 0xe39   :  { %2611 = vrot.lane.b32.xlu1 %v6039_v10, %s5007_s26 }
 0xe3c   :  { %2301 = vrot.lane.b32.xlu0 %v6033_v42, %s5012_s2 }
 0xe3d   :  { %2846 = vrot.lane.b32.xlu1 %v6041_v44, %s5009_s28 }
 0xe40   :  { %2532 = vrot.lane.b32.xlu0 %v6033_v42, %s5013_s13 }
 0xe41   :  { %2844 = vrot.lane.b32.xlu1 %v6033_v42, %s5009_s28 }
 0xe45   :  { %2842 = vrot.lane.b32.xlu1 %v6039_v10, %s5009_s28 }
 0xe49   :  { %2838 = vrot.lane.b32.xlu1 %v6033_v42, %s5011_s30 }
 0xe4d   :  { %2299 = vrot.lane.b32.xlu1 %v6039_v10, %s5012_s2 }
 0xe51   :  { %2303 = vrot.lane.b32.xlu1 %v6041_v44, %s5012_s2 }
 0xe55   :  { %2534 = vrot.lane.b32.xlu1 %v6041_v44, %s5013_s13 }
 0xe8a   :  { %v2152_v39 = vpop.permute.xlu0 %2151 }
 0xe8b   :  { %v2168_v7 = vsel %vm461_vm3, %v2152_v39, 0 }
 0xe8e   :  { %v2383_v14 = vpop.permute.xlu0 %2382 }
 0xe8f   :  { %v2399_v9 = vsel %vm461_vm3, %v2383_v14, 0 }
 0xe92   :  { %v2375_v33 = vpop.permute.xlu0 %2374 }
 0xe93   :  { %v2154_v56 = vpop.permute.xlu1 %2153 }
 0xe94   :  { %v2171_v61 = vsel %vm461_vm3, %v2154_v56, 0 }
 0xe95   :  { %4316 = vmatpush3.bf16.xpose.msra.mxu0 %v2171_v61  ;;  %v6195_v61 = vld [vmem:[%s6738_s3 + $0x20] sm:$0xff] }
 0xe96   :  { %4317 = vmatprep.subr.bf16.mxu0 %v5003_v1  ;;  %v2377_v8 = vpop.permute.xlu0 %2376 }
 0xe97   :  { %v2150_v45 = vpop.permute.xlu1 %2149 }
 0xe98   :  { %v2165_v41 = vsel %vm461_vm3, %v2150_v45, 0 }
 0xe9a   :  { %v2379_v48 = vpop.permute.xlu0 %2378 }
 0xe9b   :  { %v2385_v16 = vpop.permute.xlu1 %2384 }
 0xe9c   :  { %v2402_v22 = vsel %vm461_vm3, %v2385_v16, 0 }
 0xe9d   :  { %4318 = vmatpush3.bf16.xpose.msra.mxu0 %v2168_v7 }
 0xe9e   :  { %4319 = vmatprep.subr.bf16.mxu0 %v5003_v1  ;;  %v2606_v2 = vpop.permute.xlu0 %2605 }
 0xe9f   :  { %v2381_v54 = vpop.permute.xlu1 %2380 }
 0xea0   :  { %v2396_v19 = vsel %vm461_vm3, %v2381_v54, 0 }
 0xea2   :  { %v2608_v23 = vpop.permute.xlu0 %2607 }
 0xea3   :  { %v2616_v13 = vpop.permute.xlu1 %2615 }
 0xea4   :  { %v2633_v32 = vsel %vm461_vm3, %v2616_v13, 0 }
 0xea5   :  { %4320 = vmatpush3.bf16.xpose.msra.mxu0 %v2165_v41 }
 0xea6   :  { %4351 = vmatprep.subr.bf16.mxu0 %v5003_v1  ;;  %v2610_v36 = vpop.permute.xlu0 %2609 }
 0xea7   :  { %v2614_v30 = vpop.permute.xlu1 %2613 }
 0xea8   :  { %v2630_v17 = vsel %vm461_vm3, %v2614_v30, 0 }
 0xeaa   :  { %v2837_v29 = vpop.permute.xlu0 %2836 }
 0xeab   :  { %v2612_v20 = vpop.permute.xlu1 %2611 }
 0xeac   :  { %4322 = vmatmul.mubr.msk.bf16.vlgmr.msra.gmra.mxu0 %vm461_vm3, %v6039_v10  ;;  %v2627_v21 = vsel %vm461_vm3, %v2612_v20, 0 }
 0xead   :  { %4352 = vmatpush3.bf16.xpose.msra.mxu0 %v2402_v22  ;;  %4325 = vmatprep.mubr.msk.bf16.mxu0 %vm5004_vm0, %v5003_v1 }
 0xeae   :  { %4353 = vmatprep.subr.bf16.mxu0 %v5003_v1  ;;  %v2302_v4 = vpop.permute.xlu0 %2301 }
 0xeaf   :  { %v2847_v57 = vpop.permute.xlu1 %2846 }
 0xeb0   :  { %v2864_v25 = vsel %vm461_vm3, %v2847_v57, 0 }
 0xeb3   :  { %v2845_v49 = vpop.permute.xlu1 %2844 }
 0xeb4   :  { %4326 = vmatmul.mubr.msk.bf16.gmra.mxu0 %vm461_vm3, %v6033_v42  ;;  %v2861_v3 = vsel %vm461_vm3, %v2845_v49, 0 }
 0xeb5   :  { %4354 = vmatpush3.bf16.xpose.msra.mxu0 %v2399_v9  ;;  %4329 = vmatprep.mubr.msk.bf16.mxu0 %vm5004_vm0, %v5003_v1 }
 0xeb6   :  { %4355 = vmatprep.subr.bf16.mxu0 %v5003_v1 }
 0xeb7   :  { %v2843_v15 = vpop.permute.xlu1 %2842 }
 0xeb8   :  { %v2858_v63 = vsel %vm461_vm3, %v2843_v15, 0 }
 0xebb   :  { %v2839_v58 = vpop.permute.xlu1 %2838 }
 0xebc   :  { %4330 = vmatmul.mubr.msk.bf16.gmra.mxu0 %vm461_vm3, %v6041_v44 }
 0xebd   :  { %4356 = vmatpush3.bf16.xpose.msra.mxu0 %v2396_v19  ;;  %4357 = vmatprep.mubr.msk.bf16.mxu0 %vm5004_vm0, %v5003_v1 }
 0xebe   :  { %4387 = vmatprep.subr.bf16.mxu0 %v5003_v1 }
 0xebf   :  { %v2300_v55 = vpop.permute.xlu1 %2299 }
 0xec3   :  { %v2304_v35 = vpop.permute.xlu1 %2303 }
 0xec4   :  { %4334 = vmatpush3.bf16.msra.mxu1 %v2304_v35  ;;  %4358 = vmatmul.mubr.msk.bf16.vlgmr.msra.gmra.mxu0 %vm461_vm3, %v2375_v33  ;;  %v6205_v33 = vld [vmem:[%s6738_s3 + $0x28] sm:$0xff] }
 0xec5   :  { %4388 = vmatpush3.bf16.xpose.msra.mxu0 %v2633_v32  ;;  %4335 = vmatprep.subr.bf16.mxu1 %v5003_v1 }
 0xec6   :  { %4361 = vmatprep.mubr.msk.bf16.mxu0 %vm5004_vm0, %v5003_v1  ;;  %4389 = vmatprep.subr.bf16.mxu0 %v5003_v1 }
 0xec8   :  { %4336 = vmatpush3.bf16.msra.mxu1 %v2302_v4 }
 0xec9   :  { %4337 = vmatprep.subr.bf16.mxu1 %v5003_v1 }
 0xecc   :  { %4338 = vmatpush3.bf16.msra.mxu1 %v2300_v55  ;;  %4362 = vmatmul.mubr.msk.bf16.gmra.mxu0 %vm461_vm3, %v2377_v8 }
 0xecd   :  { %4390 = vmatpush3.bf16.xpose.msra.mxu0 %v2630_v17  ;;  %4365 = vmatprep.mubr.msk.bf16.mxu0 %vm5004_vm0, %v5003_v1 }
 0xece   :  { %4391 = vmatprep.subr.bf16.mxu0 %v5003_v1  ;;  %4369 = vmatprep.subr.bf16.mxu1 %v5003_v1 }
 0xed4   :  { %4366 = vmatmul.mubr.msk.bf16.gmra.mxu0 %vm461_vm3, %v2379_v48 }
 0xed5   :  { %4392 = vmatpush3.bf16.xpose.msra.mxu0 %v2627_v21  ;;  %4393 = vmatprep.mubr.msk.bf16.mxu0 %vm5004_vm0, %v5003_v1 }
 0xed6   :  { %4423 = vmatprep.subr.bf16.mxu0 %v5003_v1 }
 0xedc   :  { %4394 = vmatmul.mubr.msk.bf16.vlgmr.msra.gmra.mxu0 %vm461_vm3, %v2606_v2 }
 0xedd   :  { %4424 = vmatpush3.bf16.xpose.msra.mxu0 %v2864_v25  ;;  %4397 = vmatprep.mubr.msk.bf16.mxu0 %vm5004_vm0, %v5003_v1 }
 0xede   :  { %4425 = vmatprep.subr.bf16.mxu0 %v5003_v1 }
 0xee4   :  { %4398 = vmatmul.mubr.msk.bf16.gmra.mxu0 %vm461_vm3, %v2608_v23 }
 0xee5   :  { %4426 = vmatpush3.bf16.xpose.msra.mxu0 %v2861_v3  ;;  %4401 = vmatprep.mubr.msk.bf16.mxu0 %vm5004_vm0, %v5003_v1 }
 0xee6   :  { %4427 = vmatprep.subr.bf16.mxu0 %v5003_v1 }
 0xeec   :  { %4402 = vmatmul.mubr.msk.bf16.gmra.mxu0 %vm461_vm3, %v2610_v36 }
 0xeed   :  { %4428 = vmatpush3.bf16.xpose.msra.mxu0 %v2858_v63  ;;  %4429 = vmatprep.mubr.msk.bf16.mxu0 %vm5004_vm0, %v5003_v1 }
 0xeee   :  { %4459 = vmatprep.subr.bf16.mxu0 %v5003_v1 }
 0xef4   :  { %4430 = vmatmul.mubr.msk.bf16.vlgmr.msra.gmra.mxu0 %vm461_vm3, %v2837_v29 }
 0xef5   :  { %4433 = vmatprep.mubr.msk.bf16.mxu0 %vm5004_vm0, %v5003_v1 }
 0xefc   :  { %4434 = vmatmul.mubr.msk.bf16.gmra.mxu0 %vm461_vm3, %v2839_v58 }
 0xefd   :  { %4437 = vmatprep.mubr.msk.bf16.mxu0 %vm5004_vm0, %v5003_v1 }
 0xf6c   :  { %v2207_v62 = vpop.f32.mrf.mxu0 }
 0xf6d   :  { %v6158_v26 = vadd.f32 %v6155_v12, %v2207_v62 }
 0xf6e   :  { %v4323_v38 = vpop.f32.mrf.mxu0 }
 0xf6f   :  { %v2230_v40 = vsel %vm82_vm1, %v6158_v26, -inf }
 0xf70   :  { %2231 = vmax.xlane.f32.xlu0 %v2230_v40  ;;  %v2210_v60 = vpop.f32.mrf.mxu0 }
 0xf71   :  { %v6168_v50 = vadd.f32 %v6165_v24, %v2210_v60 }
 0xf72   :  { %v4324_v0 = vpop.f32.mrf.mxu0 }
 0xf73   :  { %v2233_v28 = vsel %vm82_vm1, %v6168_v50, -inf }
 0xf74   :  { %2234 = vmax.xlane.f32.xlu1 %v2233_v28  ;;  %v2215_v43 = vpop.f32.mrf.mxu0 }
 0xf75   :  { %v6178_v46 = vadd.f32 %v6175_v59, %v2215_v43 }
 0xf76   :  { %v4327_v47 = vpop.f32.mrf.mxu0 }
 0xf77   :  { %v2236_v51 = vsel %vm82_vm1, %v6178_v46, -inf }
 0xf78   :  { %2237 = vmax.xlane.f32.xlu0 %v2236_v51  ;;  %v2218_v5 = vpop.f32.mrf.mxu0 }
 0xf79   :  { %v6188_v53 = vadd.f32 %v6185_v37, %v2218_v5 }
 0xf7a   :  { %v4328_v34 = vpop.f32.mrf.mxu0 }
 0xf7b   :  { %v2239_v39 = vsel %vm82_vm1, %v6188_v53, -inf }
 0xf7c   :  { %2240 = vmax.xlane.f32.xlu0 %v2239_v39  ;;  %v2223_v56 = vpop.f32.mrf.mxu0 }
 0xf7d   :  { %v6198_v14 = vadd.f32 %v6195_v61, %v2223_v56 }
 0xf7e   :  { %v4331_v45 = vpop.f32.mrf.mxu0 }
 0xf7f   :  { %v2242_v16 = vsel %vm82_vm1, %v6198_v14, -inf }
 0xf80   :  { %2243 = vmax.xlane.f32.xlu1 %v2242_v16  ;;  %v2226_v7 = vpop.f32.mrf.mxu0 }
 0xf81   :  { %v6208_v54 = vadd.f32 %v6205_v33, %v2226_v7 }
 0xf82   :  { %v4332_v8 = vpop.f32.mrf.mxu0 }
 0xf83   :  { %v2245_v13 = vsel %vm82_vm1, %v6208_v54, -inf }
 0xf84   :  { %2246 = vmax.xlane.f32.xlu0 %v2245_v13  ;;  %v2438_v41 = vpop.f32.mrf.mxu0 }
 0xf85   :  { %v6213_v30 = vadd.f32 %v6155_v12, %v2438_v41 }
 0xf86   :  { %v4359_v48 = vpop.f32.mrf.mxu0 }
 0xf87   :  { %v2461_v20 = vsel %vm82_vm1, %v6213_v30, -inf }
 0xf88   :  { %2462 = vmax.xlane.f32.xlu1 %v2461_v20  ;;  %v2441_v22 = vpop.f32.mrf.mxu0 }
 0xf89   :  { %v6218_v2 = vadd.f32 %v6165_v24, %v2441_v22 }
 0xf8a   :  { %v4360_v57 = vpop.f32.mrf.mxu0 }
 0xf8b   :  { %v2464_v49 = vsel %vm82_vm1, %v6218_v2, -inf }
 0xf8c   :  { %2465 = vmax.xlane.f32.xlu0 %v2464_v49  ;;  %v2446_v9 = vpop.f32.mrf.mxu0 }
 0xf8d   :  { %v6223_v23 = vadd.f32 %v6175_v59, %v2446_v9 }
 0xf8e   :  { %v4363_v15 = vpop.f32.mrf.mxu0 }
 0xf8f   :  { %v2467_v36 = vsel %vm82_vm1, %v6223_v23, -inf }
 0xf90   :  { %2468 = vmax.xlane.f32.xlu1 %v2467_v36  ;;  %v2449_v58 = vpop.f32.mrf.mxu0 }
 0xf91   :  { %v6228_v19 = vadd.f32 %v6185_v37, %v2449_v58 }
 0xf92   :  { %v4364_v55 = vpop.f32.mrf.mxu0 }
 0xf93   :  { %v2470_v29 = vsel %vm82_vm1, %v6228_v19, -inf }
 0xf94   :  { %2471 = vmax.xlane.f32.xlu0 %v2470_v29  ;;  %v2454_v35 = vpop.f32.mrf.mxu0 }
 0xf95   :  { %v6233_v32 = vadd.f32 %v6195_v61, %v2454_v35 }
 0xf96   :  { %v4367_v4 = vpop.f32.mrf.mxu0 }
 0xf97   :  { %v2473_v17 = vsel %vm82_vm1, %v6233_v32, -inf }
 0xf98   :  { %2474 = vmax.xlane.f32.xlu1 %v2473_v17  ;;  %v2457_v21 = vpop.f32.mrf.mxu0 }
 0xf99   :  { %v6238_v25 = vadd.f32 %v6205_v33, %v2457_v21 }
 0xf9a   :  { %v4368_v3 = vpop.f32.mrf.mxu0 }
 0xf9b   :  { %v2476_v63 = vsel %vm82_vm1, %v6238_v25, -inf }
 0xf9c   :  { %2477 = vmax.xlane.f32.xlu0 %v2476_v63  ;;  %v2669_v62 = vpop.f32.mrf.mxu0 }
 0xf9d   :  { %v6243_v38 = vadd.f32 %v6155_v12, %v2669_v62 }
 0xf9e   :  { %v4395_v40 = vpop.f32.mrf.mxu0 }
 0xf9f   :  { %v2692_v60 = vsel %vm82_vm1, %v6243_v38, -inf  ;;  %v6298_v40 = vpop.permute.xlu0 %2532 }
 0xfa0   :  { %2693 = vmax.xlane.f32.xlu1 %v2692_v60  ;;  %v2672_v0 = vpop.f32.mrf.mxu0  ;;  %v6300_v60 = vpop.permute.xlu1 %2534 }
 0xfa1   :  { %v6248_v28 = vadd.f32 %v6165_v24, %v2672_v0 }
 0xfa2   :  { %v4396_v43 = vpop.f32.mrf.mxu0 }
 0xfa3   :  { %v2695_v47 = vsel %vm82_vm1, %v6248_v28, -inf }
 0xfa4   :  { %2696 = vmax.xlane.f32.xlu0 %v2695_v47  ;;  %v2677_v51 = vpop.f32.mrf.mxu0 }
 0xfa5   :  { %v6253_v5 = vadd.f32 %v6175_v59, %v2677_v51 }
 0xfa6   :  { %v4399_v34 = vpop.f32.mrf.mxu0 }
 0xfa7   :  { %v2698_v39 = vsel %vm82_vm1, %v6253_v5, -inf }
 0xfa8   :  { %2699 = vmax.xlane.f32.xlu1 %v2698_v39  ;;  %v2680_v56 = vpop.f32.mrf.mxu0 }
 0xfa9   :  { %v6264_v36 = vadd.f32 %v6185_v37, %v2680_v56 }
 0xfaa   :  { %v4400_v45 = vpop.f32.mrf.mxu0 }
 0xfab   :  { %v2701_v35 = vsel %vm82_vm1, %v6264_v36, -inf }
 0xfac   :  { %v2685_v16 = vpop.f32.mrf.mxu0 }
 0xfad   :  { %v6267_v58 = vadd.f32 %v6195_v61, %v2685_v16 }
 0xfae   :  { %v4403_v7 = vpop.f32.mrf.mxu0 }
 0xfaf   :  { %v2704_v4 = vsel %vm82_vm1, %v6267_v58, -inf }
 0xfb0   :  { %v2688_v8 = vpop.f32.mrf.mxu0 }
 0xfb1   :  { %v6270_v55 = vadd.f32 %v6205_v33, %v2688_v8 }
 0xfb2   :  { %v4404_v13 = vpop.f32.mrf.mxu0 }
 0xfb3   :  { %v2707_v3 = vsel %vm82_vm1, %v6270_v55, -inf }
 0xfb4   :  { %v2900_v41 = vpop.f32.mrf.mxu0 }
 0xfb5   :  { %v6273_v29 = vadd.f32 %v6155_v12, %v2900_v41 }
 0xfb6   :  { %v4431_v48 = vpop.f32.mrf.mxu0 }
 0xfb7   :  { %v2923_v12 = vsel %vm82_vm1, %v6273_v29, -inf }
 0xfb8   :  { %v2903_v20 = vpop.f32.mrf.mxu0 }
 0xfb9   :  { %2530 = vrot.lane.b32.xlu1 %v6039_v10, %s5013_s13  ;;  %v6280_v17 = vadd.f32 %v6165_v24, %v2903_v20 }
 0xfba   :  { %2765 = vrot.lane.b32.xlu0 %v6041_v44, %s5014_s14  ;;  %v4432_v22 = vpop.f32.mrf.mxu0 }
 0xfbb   :  { %v2926_v62 = vsel %vm82_vm1, %v6280_v17, -inf }
 0xfbc   :  { %v2908_v57 = vpop.f32.mrf.mxu0 }
 0xfbd   :  { %v6283_v21 = vadd.f32 %v6175_v59, %v2908_v57 }
 0xfbe   :  { %2763 = vrot.lane.b32.xlu0 %v6033_v42, %s5014_s14  ;;  %v4435_v49 = vpop.f32.mrf.mxu0 }
 0xfbf   :  { %v2929_v24 = vsel %vm82_vm1, %v6283_v21, -inf }
 0xfc0   :  { %v2911_v9 = vpop.f32.mrf.mxu0 }
 0xfc1   :  { %v6290_v63 = vadd.f32 %v6185_v37, %v2911_v9 }
 0xfc2   :  { %v4436_v15 = vpop.f32.mrf.mxu0 }
 0xfc3   :  { %v2932_v59 = vsel %vm82_vm1, %v6290_v63, -inf }
 0xfdd   :  { %2702 = vmax.xlane.f32.xlu0 %v2701_v35  ;;  %2705 = vmax.xlane.f32.xlu1 %v2704_v4 }
 0xfe1   :  { %2708 = vmax.xlane.f32.xlu0 %v2707_v3  ;;  %2924 = vmax.xlane.f32.xlu1 %v2923_v12 }
 0xfe5   :  { %2927 = vmax.xlane.f32.xlu0 %v2926_v62  ;;  %2930 = vmax.xlane.f32.xlu1 %v2929_v24 }
 0xfe9   :  { %2933 = vmax.xlane.f32.xlu0 %v2932_v59 }
 0xff9   :  { %v2232_v0 = vpop.xlane.xlu0 %2231 }
 0xffa   :  { %v2248_v37 = vsub.f32 %v6158_v26, %v2232_v0 }
 0xffc   :  { %v2254_v43 = vmul.f32 1.442695, %v2248_v37 }
 0xffd   :  { %v2235_v47 = vpop.xlane.xlu1 %2234 }
 0xffe   :  { %4841 = vpow2.f32 %v2254_v43  ;;  %v2249_v51 = vsub.f32 %v6168_v50, %v2235_v47 }
0x1000   :  { %v2256_v34 = vmul.f32 1.442695, %v2249_v51 }
0x1001   :  { %v2238_v39 = vpop.xlane.xlu0 %2237 }
0x1002   :  { %4843 = vpow2.f32 %v2256_v34  ;;  %v2250_v56 = vsub.f32 %v6178_v46, %v2238_v39 }
0x1004   :  { %v2258_v45 = vmul.f32 1.442695, %v2250_v56 }
0x1005   :  { %v2241_v16 = vpop.xlane.xlu0 %2240 }
0x1006   :  { %4845 = vpow2.f32 %v2258_v45  ;;  %v2251_v7 = vsub.f32 %v6188_v53, %v2241_v16 }
0x1008   :  { %v2260_v8 = vmul.f32 1.442695, %v2251_v7 }
0x1009   :  { %v2244_v13 = vpop.xlane.xlu1 %2243 }
0x100a   :  { %4847 = vpow2.f32 %v2260_v8  ;;  %v2252_v26 = vsub.f32 %v6198_v14, %v2244_v13 }
0x100b   :  { %v6307_v41 = vpop.eup %4841 }
0x100c   :  { %v2262_v48 = vmul.f32 1.442695, %v2252_v26  ;;  %v2266_v50 = vsel %vm82_vm1, %v6307_v41, 0.0 }
0x100d   :  { %v2247_v20 = vpop.xlane.xlu0 %2246  ;;  %2267 = vadd.xlane.f32.xlu1 %v2266_v50 }
0x100e   :  { %4849 = vpow2.f32 %v2262_v48  ;;  %v2253_v46 = vsub.f32 %v6208_v54, %v2247_v20 }
0x100f   :  { %v6312_v22 = vpop.eup %4843 }
0x1010   :  { %v2264_v57 = vmul.f32 1.442695, %v2253_v46  ;;  %v2269_v53 = vsel %vm82_vm1, %v6312_v22, 0.0 }
0x1011   :  { %v2463_v49 = vpop.xlane.xlu1 %2462  ;;  %2270 = vadd.xlane.f32.xlu0 %v2269_v53 }
0x1012   :  { %4851 = vpow2.f32 %v2264_v57  ;;  %v2479_v14 = vsub.f32 %v6213_v30, %v2463_v49 }
0x1013   :  { %v6317_v9 = vpop.eup %4845 }
0x1014   :  { %v2485_v15 = vmul.f32 1.442695, %v2479_v14  ;;  %v2272_v35 = vsel %vm82_vm1, %v6317_v9, 0.0 }
0x1015   :  { %v2466_v4 = vpop.xlane.xlu0 %2465  ;;  %2273 = vadd.xlane.f32.xlu1 %v2272_v35 }
0x1016   :  { %4853 = vpow2.f32 %v2485_v15  ;;  %v2480_v54 = vsub.f32 %v6218_v2, %v2466_v4 }
0x1017   :  { %v6322_v3 = vpop.eup %4847 }
0x1018   :  { %v2487_v12 = vmul.f32 1.442695, %v2480_v54  ;;  %v2275_v62 = vsel %vm82_vm1, %v6322_v3, 0.0 }
0x1019   :  { %v2469_v24 = vpop.xlane.xlu1 %2468  ;;  %2276 = vadd.xlane.f32.xlu0 %v2275_v62 }
0x101a   :  { %4855 = vpow2.f32 %v2487_v12  ;;  %v2481_v30 = vsub.f32 %v6223_v23, %v2469_v24 }
0x101b   :  { %v6327_v59 = vpop.eup %4849 }
0x101c   :  { %v2489_v0 = vmul.f32 1.442695, %v2481_v30  ;;  %v2278_v37 = vsel %vm82_vm1, %v6327_v59, 0.0 }
0x101d   :  { %v2472_v43 = vpop.xlane.xlu0 %2471  ;;  %2279 = vadd.xlane.f32.xlu1 %v2278_v37 }
0x101e   :  { %4857 = vpow2.f32 %v2489_v0  ;;  %v2482_v2 = vsub.f32 %v6228_v19, %v2472_v43 }
0x101f   :  { %v6332_v47 = vpop.eup %4851 }
0x1020   :  { %v2491_v51 = vmul.f32 1.442695, %v2482_v2  ;;  %v2281_v34 = vsel %vm82_vm1, %v6332_v47, 0.0 }
0x1021   :  { %v2475_v39 = vpop.xlane.xlu1 %2474  ;;  %2282 = vadd.xlane.f32.xlu0 %v2281_v34 }
0x1022   :  { %4859 = vpow2.f32 %v2491_v51  ;;  %v2483_v23 = vsub.f32 %v6233_v32, %v2475_v39 }
0x1023   :  { %v6337_v56 = vpop.eup %4853 }
0x1024   :  { %v2493_v45 = vmul.f32 1.442695, %v2483_v23  ;;  %v2497_v16 = vsel %vm82_vm1, %v6337_v56, 0.0 }
0x1025   :  { %v2478_v7 = vpop.xlane.xlu0 %2477  ;;  %2498 = vadd.xlane.f32.xlu1 %v2497_v16 }
0x1026   :  { %4861 = vpow2.f32 %v2493_v45  ;;  %v2484_v19 = vsub.f32 %v6238_v25, %v2478_v7 }
0x1027   :  { %v6342_v8 = vpop.eup %4855 }
0x1028   :  { %v2495_v13 = vmul.f32 1.442695, %v2484_v19  ;;  %v2500_v26 = vsel %vm82_vm1, %v6342_v8, 0.0 }
0x1029   :  { %v2694_v48 = vpop.xlane.xlu1 %2693  ;;  %2501 = vadd.xlane.f32.xlu0 %v2500_v26 }
0x102a   :  { %4863 = vpow2.f32 %v2495_v13  ;;  %v2710_v32 = vsub.f32 %v6243_v38, %v2694_v48 }
0x102b   :  { %v6347_v50 = vpop.eup %4857 }
0x102c   :  { %v2716_v20 = vmul.f32 1.442695, %v2710_v32  ;;  %v2503_v46 = vsel %vm82_vm1, %v6347_v50, 0.0 }
0x102d   :  { %2504 = vadd.xlane.f32.xlu0 %v2503_v46  ;;  %v2697_v4 = vpop.xlane.xlu0 %2696 }
0x102e   :  { %4865 = vpow2.f32 %v2716_v20  ;;  %v2711_v54 = vsub.f32 %v6248_v28, %v2697_v4 }
0x102f   :  { %v6351_v25 = vpop.eup %4859 }
0x1030   :  { %v2506_v57 = vsel %vm82_vm1, %v6351_v25, 0.0  ;;  %v2718_v62 = vmul.f32 1.442695, %v2711_v54 }
0x1031   :  { %2507 = vadd.xlane.f32.xlu0 %v2506_v57  ;;  %v2700_v12 = vpop.xlane.xlu1 %2699  ;;  %v6373_v30 = vpop.permute.xlu0 %2765 }
0x1032   :  { %v2712_v24 = vsub.f32 %v6253_v5, %v2700_v12  ;;  %4867 = vpow2.f32 %v2718_v62 }
0x1033   :  { %v6355_v53 = vpop.eup %4861 }
0x1034   :  { %v2509_v49 = vsel %vm82_vm1, %v6355_v53, 0.0  ;;  %v2720_v0 = vmul.f32 1.442695, %v2712_v24 }
0x1035   :  { %2510 = vadd.xlane.f32.xlu0 %v2509_v49  ;;  %v6375_v37 = vpop.permute.xlu0 %2763  ;;  %v6377_v43 = vpop.permute.xlu1 %2530 }
0x1036   :  { %4869 = vpow2.f32 %v2720_v0 }
0x1037   :  { %v6359_v38 = vpop.eup %4863 }
0x1038   :  { %v2512_v14 = vsel %vm82_vm1, %v6359_v38, 0.0 }
0x1039   :  { %2513 = vadd.xlane.f32.xlu0 %v2512_v14 }
0x103b   :  { %v6363_v15 = vpop.eup %4865 }
0x103c   :  { %v2728_v35 = vsel %vm82_vm1, %v6363_v15, 0.0 }
0x103d   :  { %2729 = vadd.xlane.f32.xlu1 %v2728_v35 }
0x103f   :  { %v6381_v45 = vpop.eup %4867 }
0x1040   :  { %v2731_v26 = vsel %vm82_vm1, %v6381_v45, 0.0 }
0x1043   :  { %v6387_v48 = vpop.eup %4869 }
0x104e   :  { %2761 = vrot.lane.b32.xlu1 %v6039_v10, %s5014_s14 }
0x104f   :  { %2996 = vrot.lane.b32.xlu0 %v6041_v44, %s5015_s15 }
0x1066   :  { %v2703_v2 = vpop.xlane.xlu0 %2702  ;;  %v2706_v51 = vpop.xlane.xlu1 %2705 }
0x1067   :  { %v2713_v34 = vsub.f32 %v6264_v36, %v2703_v2  ;;  %v2714_v39 = vsub.f32 %v6267_v58, %v2706_v51 }
0x1069   :  { %v2722_v28 = vmul.f32 1.442695, %v2713_v34  ;;  %v2724_v23 = vmul.f32 1.442695, %v2714_v39 }
0x106a   :  { %v2709_v5 = vpop.xlane.xlu0 %2708  ;;  %v2925_v16 = vpop.xlane.xlu1 %2924 }
0x106b   :  { %4871 = vpow2.f32 %v2722_v28  ;;  %v2715_v7 = vsub.f32 %v6270_v55, %v2709_v5  ;;  %v2941_v19 = vsub.f32 %v6273_v29, %v2925_v16  ;;  %v2734_v29 = vsel %vm82_vm1, %v6387_v48, 0.0 }
0x106c   :  { %4873 = vpow2.f32 %v2724_v23 }
0x106d   :  { %v2726_v13 = vmul.f32 1.442695, %v2715_v7  ;;  %v2947_v36 = vmul.f32 1.442695, %v2941_v19 }
0x106e   :  { %v2928_v58 = vpop.xlane.xlu0 %2927  ;;  %v2931_v32 = vpop.xlane.xlu1 %2930  ;;  %2732 = vadd.xlane.f32.xlu0 %v2731_v26 }
0x106f   :  { %4875 = vpow2.f32 %v2726_v13  ;;  %v2942_v20 = vsub.f32 %v6280_v17, %v2928_v58  ;;  %v2943_v46 = vsub.f32 %v6283_v21, %v2931_v32 }
0x1070   :  { %4877 = vpow2.f32 %v2947_v36 }
0x1071   :  { %v2949_v57 = vmul.f32 1.442695, %v2942_v20  ;;  %v2951_v55 = vmul.f32 1.442695, %v2943_v46 }
0x1072   :  { %2735 = vadd.xlane.f32.xlu0 %v2734_v29  ;;  %v2934_v51 = vpop.xlane.xlu0 %2933 }
0x1073   :  { %4879 = vpow2.f32 %v2949_v57  ;;  %v2944_v23 = vsub.f32 %v6290_v63, %v2934_v51 }
0x1074   :  { %4881 = vpow2.f32 %v2951_v55 }
0x1075   :  { %v2953_v16 = vmul.f32 1.442695, %v2944_v23 }
0x1078   :  { %v6393_v49 = vpop.eup %4871 }
0x1079   :  { %v6395_v14 = vpop.eup %4873  ;;  %v2737_v35 = vsel %vm82_vm1, %v6393_v49, 0.0 }
0x107a   :  { %2738 = vadd.xlane.f32.xlu1 %v2737_v35  ;;  %v2740_v17 = vsel %vm82_vm1, %v6395_v14, 0.0 }
0x107b   :  { %2741 = vadd.xlane.f32.xlu0 %v2740_v17 }
0x107c   :  { %v6401_v21 = vpop.eup %4875 }
0x107d   :  { %v2743_v4 = vsel %vm82_vm1, %v6401_v21, 0.0  ;;  %v6405_v54 = vpop.eup %4877 }
0x107e   :  { %v2959_v0 = vsel %vm82_vm1, %v6405_v54, 0.0 }
0x107f   :  { %2744 = vadd.xlane.f32.xlu0 %v2743_v4 }
0x1080   :  { %v6407_v12 = vpop.eup %4879 }
0x1081   :  { %v2962_v62 = vsel %vm82_vm1, %v6407_v12, 0.0  ;;  %v6411_v24 = vpop.eup %4881 }
0x1082   :  { %2963 = vadd.xlane.f32.xlu1 %v2962_v62  ;;  %v2965_v2 = vsel %vm82_vm1, %v6411_v24, 0.0 }
0x1083   :  { %2960 = vadd.xlane.f32.xlu0 %v2959_v0 }
0x1086   :  { %2966 = vadd.xlane.f32.xlu1 %v2965_v2 }
0x1096   :  { %v2268_v34 = vpop.xlane.xlu1 %2267 }
0x1097   :  { %2992 = vrot.lane.b32.xlu1 %v6039_v10, %s5015_s15  ;;  %4883 = vrcp.f32 %v2268_v34 }
0x1099   :  { %2994 = vrot.lane.b32.xlu0 %v6033_v42, %s5015_s15 }
0x109a   :  { %v2271_v39 = vpop.xlane.xlu0 %2270 }
0x109b   :  { %4885 = vrcp.f32 %v2271_v39 }
0x109e   :  { %v2274_v28 = vpop.xlane.xlu1 %2273 }
0x109f   :  { %4887 = vrcp.f32 %v2274_v28 }
0x10a2   :  { %v2277_v5 = vpop.xlane.xlu0 %2276 }
0x10a3   :  { %4889 = vrcp.f32 %v2277_v5 }
0x10a4   :  { %v4884_v7 = vpop.eup %4883  ;;  %4891 = vpow2.f32 %v2953_v16 }
0x10a5   :  { %v2290_v26 = vmul.f32 %v4884_v7, %v6307_v41 }
0x10a6   :  { %v2280_v19 = vpop.xlane.xlu1 %2279 }
0x10a7   :  { %4893 = vrcp.f32 %v2280_v19 }
0x10a8   :  { %v4886_v13 = vpop.eup %4885 }
0x10a9   :  { %v2291_v10 = vmul.f32 %v4886_v13, %v6312_v22 }
0x10aa   :  { %v2283_v36 = vpop.xlane.xlu0 %2282 }
0x10ab   :  { %v2296_v42 = vpack.c.bf16 %v2291_v10, %v2290_v26  ;;  %4895 = vrcp.f32 %v2283_v36 }
0x10ac   :  { %v4888_v58 = vpop.eup %4887 }
0x10ad   :  { %4340 = vmatmul.mubr.msk.bf16.vlgmr.msra.gmra.mxu1 %vm82_vm1, %v2296_v42  ;;  %v2292_v41 = vmul.f32 %v4888_v58, %v6317_v9 }
0x10ae   :  { %4370 = vmatpush3.bf16.msra.mxu1 %v6300_v60  ;;  %v2499_v63 = vpop.xlane.xlu1 %2498  ;;  %4343 = vmatprep.mubr.msk.bf16.mxu1 %vm5004_vm0, %v5003_v1 }
0x10af   :  { %4371 = vmatprep.subr.bf16.mxu1 %v5003_v1  ;;  %4897 = vrcp.f32 %v2499_v63 }
0x10b0   :  { %v4890_v32 = vpop.eup %4889 }
0x10b1   :  { %v2293_v22 = vmul.f32 %v4890_v32, %v6322_v3  ;;  %v6433_v60 = vpop.eup %4891 }
0x10b2   :  { %4372 = vmatpush3.bf16.msra.mxu1 %v6298_v40  ;;  %v2502_v20 = vpop.xlane.xlu0 %2501  ;;  %v2968_v9 = vsel %vm82_vm1, %v6433_v60, 0.0 }
0x10b3   :  { %4899 = vrcp.f32 %v2502_v20  ;;  %4373 = vmatprep.subr.bf16.mxu1 %v5003_v1  ;;  %v2297_v46 = vpack.c.bf16 %v2293_v22, %v2292_v41 }
0x10b4   :  { %v4894_v57 = vpop.eup %4893 }
0x10b5   :  { %4344 = vmatmul.mubr.msk.bf16.gmra.mxu1 %vm82_vm1, %v2297_v46  ;;  %v2294_v3 = vmul.f32 %v4894_v57, %v6327_v59 }
0x10b6   :  { %4374 = vmatpush3.bf16.msra.mxu1 %v6377_v43  ;;  %v2505_v55 = vpop.xlane.xlu0 %2504  ;;  %4347 = vmatprep.mubr.msk.bf16.mxu1 %vm5004_vm0, %v5003_v1 }
0x10b7   :  { %4405 = vmatprep.subr.bf16.mxu1 %v5003_v1  ;;  %4901 = vrcp.f32 %v2505_v55 }
0x10b8   :  { %v4896_v40 = vpop.eup %4895  ;;  %2969 = vadd.xlane.f32.xlu0 %v2968_v9 }
0x10b9   :  { %v2295_v29 = vmul.f32 %v4896_v40, %v6332_v47 }
0x10ba   :  { %v2508_v35 = vpop.xlane.xlu0 %2507 }
0x10bb   :  { %4903 = vrcp.f32 %v2508_v35  ;;  %v2298_v17 = vpack.c.bf16 %v2295_v29, %v2294_v3 }
0x10bc   :  { %v4898_v43 = vpop.eup %4897 }
0x10bd   :  { %4348 = vmatmul.mubr.msk.bf16.gmra.mxu1 %vm82_vm1, %v2298_v17  ;;  %v2521_v0 = vmul.f32 %v4898_v43, %v6337_v56 }
0x10be   :  { %v2511_v4 = vpop.xlane.xlu0 %2510  ;;  %4375 = vmatprep.mubr.msk.bf16.mxu1 %vm5004_vm0, %v5003_v1 }
0x10bf   :  { %4905 = vrcp.f32 %v2511_v4 }
0x10c0   :  { %v4900_v62 = vpop.eup %4899 }
0x10c1   :  { %v2522_v2 = vmul.f32 %v4900_v62, %v6342_v8 }
0x10c2   :  { %v2514_v51 = vpop.xlane.xlu0 %2513 }
0x10c3   :  { %v2527_v59 = vpack.c.bf16 %v2522_v2, %v2521_v0  ;;  %4907 = vrcp.f32 %v2514_v51 }
0x10c4   :  { %v4902_v47 = vpop.eup %4901 }
0x10c5   :  { %4376 = vmatmul.mubr.msk.bf16.vlgmr.msra.gmra.mxu1 %vm82_vm1, %v2527_v59  ;;  %v2523_v56 = vmul.f32 %v4902_v47, %v6347_v50 }
0x10c6   :  { %4406 = vmatpush3.bf16.msra.mxu1 %v6373_v30  ;;  %4379 = vmatprep.mubr.msk.bf16.mxu1 %vm5004_vm0, %v5003_v1  ;;  %v2730_v34 = vpop.xlane.xlu1 %2729  ;;  %v2997_v16 = vpop.permute.xlu0 %2996 }
0x10c7   :  { %4407 = vmatprep.subr.bf16.mxu1 %v5003_v1  ;;  %4909 = vrcp.f32 %v2730_v34 }
0x10c8   :  { %v4904_v39 = vpop.eup %4903 }
0x10c9   :  { %v2524_v8 = vmul.f32 %v4904_v39, %v6351_v25 }
0x10ca   :  { %4408 = vmatpush3.bf16.msra.mxu1 %v6375_v37  ;;  %v2762_v23 = vpop.permute.xlu1 %2761 }
0x10cb   :  { %4409 = vmatprep.subr.bf16.mxu1 %v5003_v1  ;;  %v2528_v28 = vpack.c.bf16 %v2524_v8, %v2523_v56 }
0x10cc   :  { %v4906_v30 = vpop.eup %4905 }
0x10cd   :  { %4380 = vmatmul.mubr.msk.bf16.gmra.mxu1 %vm82_vm1, %v2528_v28  ;;  %v2525_v25 = vmul.f32 %v4906_v30, %v6355_v53 }
0x10ce   :  { %2840 = vrot.lane.b32.xlu0 %v6041_v44, %s5011_s30  ;;  %4410 = vmatpush3.bf16.msra.mxu1 %v2762_v23 }
0x10cf   :  { %4383 = vmatprep.mubr.msk.bf16.mxu1 %vm5004_vm0, %v5003_v1  ;;  %4441 = vmatprep.subr.bf16.mxu1 %v5003_v1 }
0x10d0   :  { %v4908_v50 = vpop.eup %4907 }
0x10d1   :  { %v2526_v37 = vmul.f32 %v4908_v50, %v6359_v38 }
0x10d3   :  { %v2529_v5 = vpack.c.bf16 %v2526_v37, %v2525_v25 }
0x10d4   :  { %v4910_v19 = vpop.eup %4909 }
0x10d5   :  { %4384 = vmatmul.mubr.msk.bf16.gmra.mxu1 %vm82_vm1, %v2529_v5  ;;  %v2752_v53 = vmul.f32 %v4910_v19, %v6363_v15 }
0x10d6   :  { %4411 = vmatprep.mubr.msk.bf16.mxu1 %vm5004_vm0, %v5003_v1 }
0x10f7   :  { %v2733_v44 = vpop.xlane.xlu0 %2732 }
0x10f8   :  { %4911 = vrcp.f32 %v2733_v44 }
0x10fb   :  { %v2736_v7 = vpop.xlane.xlu0 %2735 }
0x10fc   :  { %4913 = vrcp.f32 %v2736_v7 }
0x1103   :  { %v2739_v13 = vpop.xlane.xlu1 %2738 }
0x1104   :  { %4915 = vrcp.f32 %v2739_v13  ;;  %v2742_v26 = vpop.xlane.xlu0 %2741 }
0x1105   :  { %v4912_v10 = vpop.eup %4911 }
0x1106   :  { %v2753_v38 = vmul.f32 %v4912_v10, %v6381_v45 }
0x1108   :  { %v2758_v36 = vpack.c.bf16 %v2753_v38, %v2752_v53  ;;  %v2745_v42 = vpop.xlane.xlu0 %2744 }
0x1109   :  { %4917 = vrcp.f32 %v2745_v42  ;;  %v4914_v32 = vpop.eup %4913 }
0x110a   :  { %4919 = vrcp.f32 %v2742_v26  ;;  %4412 = vmatmul.mubr.msk.bf16.vlgmr.msra.gmra.mxu1 %vm82_vm1, %v2758_v36  ;;  %v2754_v22 = vmul.f32 %v4914_v32, %v6387_v48 }
0x110b   :  { %4442 = vmatpush3.bf16.msra.mxu1 %v2997_v16  ;;  %v2964_v58 = vpop.xlane.xlu1 %2963  ;;  %4415 = vmatprep.mubr.msk.bf16.mxu1 %vm5004_vm0, %v5003_v1 }
0x110c   :  { %v2961_v63 = vpop.xlane.xlu0 %2960  ;;  %4443 = vmatprep.subr.bf16.mxu1 %v5003_v1  ;;  %4921 = vrcp.f32 %v2964_v58 }
0x110d   :  { %4923 = vrcp.f32 %v2961_v63 }
0x110f   :  { %v2967_v41 = vpop.xlane.xlu1 %2966 }
0x1110   :  { %v2995_v15 = vpop.permute.xlu0 %2994  ;;  %4925 = vrcp.f32 %v2967_v41 }
0x1111   :  { %v4916_v45 = vpop.eup %4915  ;;  %4444 = vmatpush3.bf16.msra.mxu1 %v2995_v15  ;;  %v4659_v15 = vld [vmem:[%s6742_s7 + $0x18] sm:$0xff]  }
0x1112   :  { %4445 = vmatprep.subr.bf16.mxu1 %v5003_v1  ;;  %v2755_v20 = vmul.f32 %v4916_v45, %v6393_v49  ;;  %4460 = vmatpush3.bf16.msra.mxu0 %v4659_v15 }
0x1113   :  { %v2993_v46 = vpop.permute.xlu1 %2992  ;;  %4461 = vmatprep.subr.bf16.mxu0 %v5003_v1 }
0x1114   :  { %v2759_v57 = vpack.c.bf16 %v2755_v20, %v2754_v22 }
0x1115   :  { %4446 = vmatpush3.bf16.msra.mxu1 %v2993_v46 }
0x1116   :  { %v4918_v55 = vpop.eup %4917  ;;  %4416 = vmatmul.mubr.msk.bf16.gmra.mxu1 %vm82_vm1, %v2759_v57  ;;  %4475 = vmatprep.subr.bf16.mxu1 %v5003_v1 }
0x1117   :  { %v4920_v9 = vpop.eup %4919  ;;  %4419 = vmatprep.mubr.msk.bf16.mxu1 %vm5004_vm0, %v5003_v1  ;;  %v2757_v40 = vmul.f32 %v4918_v55, %v6401_v21 }
0x1118   :  { %v2756_v3 = vmul.f32 %v4920_v9, %v6395_v14 }
0x1119   :  { %v4922_v29 = vpop.eup %4921 }
0x111a   :  { %v2760_v48 = vpack.c.bf16 %v2757_v40, %v2756_v3  ;;  %v4924_v35 = vpop.eup %4923  ;;  %v2984_v49 = vmul.f32 %v4922_v29, %v6407_v12  ;;  %v4660_v40 = vld [vmem:[%s6742_s7 + $0x10] sm:$0xff]  }
0x111b   :  { %v2983_v17 = vmul.f32 %v4924_v35, %v6405_v54  ;;  %4462 = vmatpush3.bf16.msra.mxu0 %v4660_v40 }
0x111c   :  { %4491 = vmatprep.subr.bf16.mxu0 %v5003_v1 }
0x111d   :  { %v2989_v43 = vpack.c.bf16 %v2984_v49, %v2983_v17  ;;  %v4926_v4 = vpop.eup %4925 }
0x111e   :  { %4420 = vmatmul.mubr.msk.bf16.gmra.mxu1 %vm82_vm1, %v2760_v48  ;;  %v2985_v12 = vmul.f32 %v4926_v4, %v6411_v24 }
0x111f   :  { %4447 = vmatprep.mubr.msk.bf16.mxu1 %vm5004_vm0, %v5003_v1 }
0x1126   :  { %4448 = vmatmul.mubr.msk.bf16.vlgmr.msra.gmra.mxu1 %vm82_vm1, %v2989_v43 }
0x1127   :  { %4451 = vmatprep.mubr.msk.bf16.mxu1 %vm5004_vm0, %v5003_v1 }
0x1141   :  { %v2970_v14 = vpop.xlane.xlu0 %2969 }
0x1142   :  { %4927 = vrcp.f32 %v2970_v14 }
0x1145   :  { %v2841_v21 = vpop.permute.xlu0 %2840 }
0x1146   :  { %4438 = vmatmul.mubr.msk.bf16.gmra.mxu0 %vm461_vm3, %v2841_v21 }
0x1147   :  { %4463 = vmatprep.mubr.msk.bf16.mxu0 %vm5004_vm0, %v5003_v1 }
0x114f   :  { %v4928_v62 = vpop.eup %4927 }
0x1150   :  { %v2986_v54 = vmul.f32 %v4928_v62, %v6433_v60 }
0x1152   :  { %v2990_v0 = vpack.c.bf16 %v2986_v54, %v2985_v12 }
0x1154   :  { %4452 = vmatmul.mubr.msk.bf16.gmra.mxu1 %vm82_vm1, %v2990_v0 }
0x1155   :  { %4455 = vmatprep.mubr.msk.bf16.mxu1 %vm5004_vm0, %v5003_v1 }
0x116d   :  { %v6500_v2 = vpop.f32.mrf.mxu1 }
0x116f   :  { %v4341_v51 = vpop.f32.mrf.mxu1 }
0x1171   :  { %v6502_v59 = vpop.f32.mrf.mxu1 }
0x1173   :  { %v4342_v47 = vpop.f32.mrf.mxu1 }
0x1175   :  { %v6504_v34 = vpop.f32.mrf.mxu1 }
0x1177   :  { %v4345_v39 = vpop.f32.mrf.mxu1 }
0x1179   :  { %v6506_v56 = vpop.f32.mrf.mxu1 }
0x117b   :  { %v4346_v24 = vpop.f32.mrf.mxu1 }
0x117d   :  { %v6508_v8 = vpop.f32.mrf.mxu1 }
0x117f   :  { %v4349_v60 = vpop.f32.mrf.mxu1 }
0x1181   :  { %v6510_v28 = vpop.f32.mrf.mxu1 }
0x1183   :  { %v4350_v23 = vpop.f32.mrf.mxu1 }
0x1185   :  { %v2582_v30 = vpop.f32.mrf.mxu1 }
0x1187   :  { %v4377_v50 = vpop.f32.mrf.mxu1 }
0x1189   :  { %v2585_v25 = vpop.f32.mrf.mxu1 }
0x118a   :  { %v4595_v37 = vpack.i.bf16 %v2585_v25, %v2582_v30 }
0x118b   :  { %v4378_v5 = vpop.f32.mrf.mxu1 }
0x118c   :  { %4596 = vrot.lane.b32.xlu0 %v4595_v37, %s5016_s1 }
0x118d   :  { %v2590_v16 = vpop.f32.mrf.mxu1 }
0x118f   :  { %v4381_v44 = vpop.f32.mrf.mxu1 }
0x1191   :  { %v2593_v7 = vpop.f32.mrf.mxu1 }
0x1192   :  { %v4600_v19 = vpack.i.bf16 %v2593_v7, %v2590_v16 }
0x1193   :  { %v4382_v13 = vpop.f32.mrf.mxu1 }
0x1194   :  { %4601 = vrot.lane.b32.xlu1 %v4600_v19, %s5016_s1 }
0x1195   :  { %v6514_v26 = vpop.f32.mrf.mxu1 }
0x1197   :  { %v4385_v10 = vpop.f32.mrf.mxu1 }
0x1199   :  { %v6516_v53 = vpop.f32.mrf.mxu1 }
0x119a   :  { %v4625_v38 = vpack.i.bf16 %v6516_v53, %v6514_v26 }
0x119b   :  { %v4386_v36 = vpop.f32.mrf.mxu1 }
0x11ca   :  { %v2813_v42 = vpop.f32.mrf.mxu1 }
0x11cc   :  { %v4413_v58 = vpop.f32.mrf.mxu1 }
0x11ce   :  { %v2816_v63 = vpop.f32.mrf.mxu1 }
0x11cf   :  { %v4605_v32 = vpack.i.bf16 %v2816_v63, %v2813_v42 }
0x11d0   :  { %v4414_v41 = vpop.f32.mrf.mxu1 }
0x11d1   :  { %4606 = vrot.lane.b32.xlu0 %v4605_v32, %s5017_s20 }
0x11d6   :  { %v2821_v45 = vpop.f32.mrf.mxu1 }
0x11d8   :  { %v4417_v22 = vpop.f32.mrf.mxu1 }
0x11da   :  { %v2824_v20 = vpop.f32.mrf.mxu1 }
0x11db   :  { %v4610_v46 = vpack.i.bf16 %v2824_v20, %v2821_v45 }
0x11dc   :  { %v4418_v57 = vpop.f32.mrf.mxu1 }
0x11dd   :  { %4611 = vrot.lane.b32.xlu0 %v4610_v46, %s5017_s20 }
0x11de   :  { %v6526_v55 = vpop.f32.mrf.mxu1 }
0x11e0   :  { %v4421_v9 = vpop.f32.mrf.mxu1 }
0x11e2   :  { %v6531_v3 = vpop.f32.mrf.mxu1 }
0x11e3   :  { %v4630_v29 = vpack.i.bf16 %v6531_v3, %v6526_v55  ;;  %v6618_v55 = vld [vmem:[%s6739_s4 + $0xc] ss:$0 sm:$0xff] }
0x11e4   :  { %v4422_v48 = vpop.f32.mrf.mxu1 }
0x11e6   :  { %v3044_v35 = vpop.f32.mrf.mxu1 }
0x11e8   :  { %v4449_v49 = vpop.f32.mrf.mxu1 }
0x11ea   :  { %v3047_v17 = vpop.f32.mrf.mxu1 }
0x11eb   :  { %v4615_v43 = vpack.i.bf16 %v3047_v17, %v3044_v35 }
0x11ec   :  { %v4450_v14 = vpop.f32.mrf.mxu1 }
0x11ed   :  { %4616 = vrot.lane.b32.xlu0 %v4615_v43, %s5018_s21 }
0x11fe   :  { %v4597_v50 = vpop.permute.xlu0 %4596 }
0x11ff   :  { %v4599_v37 = vunpack.i.h.bf16 %v4597_v50  ;;  %v4598_v5 = vunpack.i.l.bf16 %v4597_v50 }
0x1201   :  { %v3140_v19 = vsel %vm461_vm3, %v6502_v59, %v4599_v37  ;;  %v3139_v13 = vsel %vm461_vm3, %v6500_v2, %v4598_v5 }
0x1206   :  { %v2916_v21 = vpop.f32.mrf.mxu0  ;;  %v4602_v59 = vpop.permute.xlu1 %4601 }
0x1207   :  { %v2917_v4 = vadd.f32 %v6195_v61, %v2916_v21  ;;  %v4604_v41 = vunpack.i.h.bf16 %v4602_v59  ;;  %v4603_v15 = vunpack.i.l.bf16 %v4602_v59 }
0x1208   :  { %v4439_v62 = vpop.f32.mrf.mxu0 }
0x1209   :  { %v2935_v54 = vsel %vm82_vm1, %v2917_v4, -inf  ;;  %v3142_v20 = vsel %vm461_vm3, %v6506_v56, %v4604_v41  ;;  %v3141_v46 = vsel %vm461_vm3, %v6504_v34, %v4603_v15 }
0x120a   :  { %v2919_v12 = vpop.f32.mrf.mxu0 }
0x120b   :  { %v2920_v23 = vadd.f32 %v6205_v33, %v2919_v12 }
0x120c   :  { %v4440_v0 = vpop.f32.mrf.mxu0  ;;  %2936 = vmax.xlane.f32.xlu0 %v2935_v54 }
0x120d   :  { %v2938_v30 = vsel %vm82_vm1, %v2920_v23, -inf }
0x1214   :  { %v3052_v51 = vpop.f32.mrf.mxu1 }
0x1216   :  { %v4453_v47 = vpop.f32.mrf.mxu1 }
0x1218   :  { %v3055_v39 = vpop.f32.mrf.mxu1 }
0x1219   :  { %v4620_v24 = vpack.i.bf16 %v3055_v39, %v3052_v51  ;;  %v6569_v39 = vld [vmem:[%s6739_s4 + $0xe] ss:$0 sm:$0xff] }
0x121a   :  { %v4454_v60 = vpop.f32.mrf.mxu1 }
0x121b   :  { %4621 = vrot.lane.b32.xlu1 %v4620_v24, %s5018_s21 }
0x123f   :  { %2939 = vmax.xlane.f32.xlu1 %v2938_v30 }
0x1243   :  { %v4607_v61 = vpop.permute.xlu0 %4606 }
0x1244   :  { %v4609_v16 = vunpack.i.h.bf16 %v4607_v61  ;;  %v4608_v44 = vunpack.i.l.bf16 %v4607_v61 }
0x1246   :  { %v3145_v33 = vsel %vm1452_vm4, %v3139_v13, %v4608_v44  ;;  %v3146_v42 = vsel %vm1452_vm4, %v3140_v19, %v4609_v16 }
0x124f   :  { %v4612_v25 = vpop.permute.xlu0 %4611 }
0x1250   :  { %v4614_v2 = vunpack.i.h.bf16 %v4612_v25  ;;  %v4613_v45 = vunpack.i.l.bf16 %v4612_v25 }
0x1252   :  { %v3148_v40 = vsel %vm1452_vm4, %v3142_v20, %v4614_v2  ;;  %v3147_v48 = vsel %vm1452_vm4, %v3141_v46, %v4613_v45 }
0x125f   :  { %v4617_v7 = vpop.permute.xlu0 %4616 }
0x1260   :  { %v4619_v10 = vunpack.i.h.bf16 %v4617_v7  ;;  %v4618_v36 = vunpack.i.l.bf16 %v4617_v7 }
0x1262   :  { %v3151_v58 = vsel %vm1459_vm5, %v3145_v33, %v4618_v36  ;;  %v3152_v63 = vsel %vm1459_vm5, %v3146_v42, %v4619_v10 }
0x1263   :  { %v3157_v32 = vpack.c.bf16 %v3152_v63, %v3151_v58 }
0x1265   :  { %4464 = vmatmul.mubr.msk.bf16.vlgmr.msra.gmra.mxu0 %vm151_vm2, %v3157_v32 }
0x1266   :  { %4467 = vmatprep.mubr.msk.bf16.mxu0 %vm5004_vm0, %v5003_v1 }
0x128d   :  { %v4622_v22 = vpop.permute.xlu1 %4621 }
0x128e   :  { %v4624_v57 = vunpack.i.h.bf16 %v4622_v22  ;;  %v4623_v9 = vunpack.i.l.bf16 %v4622_v22 }
0x1290   :  { %v3153_v35 = vsel %vm1459_vm5, %v3147_v48, %v4623_v9  ;;  %v3154_v49 = vsel %vm1459_vm5, %v3148_v40, %v4624_v57  ;;  %v4661_v40 = vld [vmem:[%s6743_s8 + $0x18] sm:$0xff]   ;;  %v4662_v48 = vld [vmem:[%s6743_s8 + $0x10] sm:$0xff]  }
0x1291   :  { %v3158_v17 = vpack.c.bf16 %v3154_v49, %v3153_v35  ;;  %4476 = vmatpush3.bf16.msra.mxu1 %v4661_v40  ;;  %v4663_v40 = vld [vmem:[%s6745_s10 + $0x78] sm:$0xff]  }
0x1292   :  { %4477 = vmatprep.subr.bf16.mxu1 %v5003_v1  ;;  %4492 = vmatpush3.bf16.msra.mxu0 %v4663_v40 }
0x1293   :  { %4468 = vmatmul.mubr.msk.bf16.gmra.mxu0 %vm151_vm2, %v3158_v17  ;;  %4493 = vmatprep.subr.bf16.mxu0 %v5003_v1 }
0x1294   :  { %4471 = vmatprep.mubr.msk.bf16.mxu0 %vm5004_vm0, %v5003_v1 }
0x1295   :  { %v2937_v56 = vpop.xlane.xlu0 %2936  ;;  %4478 = vmatpush3.bf16.msra.mxu1 %v4662_v48 }
0x1296   :  { %v2945_v43 = vsub.f32 %v2917_v4, %v2937_v56  ;;  %4519 = vmatprep.subr.bf16.mxu1 %v5003_v1 }
0x1298   :  { %v2955_v14 = vmul.f32 1.442695, %v2945_v43 }
0x129a   :  { %4929 = vpow2.f32 %v2955_v14 }
0x12a7   :  { %v4930_v34 = vpop.eup %4929 }
0x12a8   :  { %v2971_v21 = vsel %vm82_vm1, %v4930_v34, 0.0 }
0x12a9   :  { %2972 = vadd.xlane.f32.xlu0 %v2971_v21 }
0x12c8   :  { %v2940_v62 = vpop.xlane.xlu1 %2939 }
0x12c9   :  { %v2946_v12 = vsub.f32 %v2920_v23, %v2940_v62 }
0x12cb   :  { %v2957_v54 = vmul.f32 1.442695, %v2946_v12 }
0x12cd   :  { %4931 = vpow2.f32 %v2957_v54 }
0x12da   :  { %v4932_v0 = vpop.eup %4931 }
0x12db   :  { %v2974_v51 = vsel %vm82_vm1, %v4932_v0, 0.0 }
0x12dc   :  { %2975 = vadd.xlane.f32.xlu0 %v2974_v51 }
0x1325   :  { %v3220_v47 = vpop.f32.mrf.mxu0 }
0x1326   :  { %v3243_v4 = vadd.f32 %v3220_v47, %v5941_v6 }
0x1327   :  { %v4465_v24 = vpop.f32.mrf.mxu0 }
0x1328   :  { %v6573_v60 = vadd.f32 %v6569_v39, %v3243_v4 }
0x1329   :  { %v3223_v30 = vpop.f32.mrf.mxu0 }
0x132a   :  { %v3244_v23 = vadd.f32 %v3223_v30, %v5946_v11  ;;  %v3262_v50 = vsel %vm151_vm2, %v6573_v60, 0.0 }
0x132b   :  { %3263 = vadd.xlane.f32.xlu1 %v3262_v50  ;;  %v4466_v61 = vpop.f32.mrf.mxu0 }
0x132c   :  { %v3255_v25 = vadd.f32 %v6569_v39, %v3244_v23 }
0x132e   :  { %v3265_v37 = vsel %vm151_vm2, %v3255_v25, 0.0 }
0x132f   :  { %3266 = vadd.xlane.f32.xlu0 %v3265_v37  ;;  %v6624_v37 = vld [vmem:[%s6739_s4 + $0xd] ss:$0 sm:$0xff] }
0x1332   :  { %v2973_v33 = vpop.xlane.xlu0 %2972 }
0x1333   :  { %4933 = vrcp.f32 %v2973_v33 }
0x1340   :  { %v4934_v42 = vpop.eup %4933 }
0x1341   :  { %v2987_v63 = vmul.f32 %v4934_v42, %v4930_v34 }
0x1353   :  { %v3228_v5 = vpop.f32.mrf.mxu0 }
0x1354   :  { %v3245_v6 = vadd.f32 %v3228_v5, %v5951_v27 }
0x1355   :  { %v4469_v16 = vpop.f32.mrf.mxu0 }
0x1356   :  { %v3256_v44 = vadd.f32 %v6569_v39, %v3245_v6 }
0x1357   :  { %v3231_v7 = vpop.f32.mrf.mxu0 }
0x1358   :  { %v3246_v19 = vadd.f32 %v3231_v7, %v5956_v18  ;;  %v3268_v11 = vsel %vm151_vm2, %v3256_v44, 0.0 }
0x1359   :  { %3269 = vadd.xlane.f32.xlu1 %v3268_v11  ;;  %v4470_v13 = vpop.f32.mrf.mxu0 }
0x135a   :  { %v6585_v10 = vadd.f32 %v6569_v39, %v3246_v19 }
0x135c   :  { %v3271_v36 = vsel %vm151_vm2, %v6585_v10, 0.0 }
0x135d   :  { %3272 = vadd.xlane.f32.xlu0 %v3271_v36 }
0x1365   :  { %v2976_v27 = vpop.xlane.xlu0 %2975 }
0x1366   :  { %4935 = vrcp.f32 %v2976_v27 }
0x1373   :  { %v4936_v58 = vpop.eup %4935 }
0x1374   :  { %v2988_v32 = vmul.f32 %v4936_v58, %v4932_v0 }
0x1376   :  { %v2991_v18 = vpack.c.bf16 %v2988_v32, %v2987_v63 }
0x1378   :  { %4456 = vmatmul.mubr.msk.bf16.gmra.mxu1 %vm82_vm1, %v2991_v18 }
0x1379   :  { %4479 = vmatprep.mubr.msk.bf16.mxu1 %vm5004_vm0, %v5003_v1 }
0x13b4   :  { %v3264_v59 = vpop.xlane.xlu1 %3263 }
0x13b5   :  { %v3280_v41 = vmul.f32 0.03125, %v3264_v59 }
0x13b7   :  { %v3286_v15 = vsub.f32 %v6573_v60, %v3280_v41 }
0x13b8   :  { %v3267_v2 = vpop.xlane.xlu0 %3266 }
0x13b9   :  { %v3281_v45 = vmul.f32 0.03125, %v3267_v2  ;;  %v3292_v22 = vmul.f32 %v3286_v15, %v3286_v15 }
0x13bb   :  { %v3287_v20 = vsub.f32 %v3255_v25, %v3281_v45  ;;  %v3298_v46 = vsel %vm151_vm2, %v3292_v22, 0.0 }
0x13bc   :  { %3299 = vadd.xlane.f32.xlu1 %v3298_v46 }
0x13bd   :  { %v3293_v57 = vmul.f32 %v3287_v20, %v3287_v20 }
0x13bf   :  { %v3301_v9 = vsel %vm151_vm2, %v3293_v57, 0.0 }
0x13c0   :  { %3302 = vadd.xlane.f32.xlu0 %v3301_v9 }
0x13e2   :  { %v3270_v35 = vpop.xlane.xlu1 %3269 }
0x13e3   :  { %v3282_v49 = vmul.f32 0.03125, %v3270_v35 }
0x13e5   :  { %v3288_v17 = vsub.f32 %v3256_v44, %v3282_v49 }
0x13e6   :  { %v3273_v56 = vpop.xlane.xlu0 %3272 }
0x13e7   :  { %v3283_v43 = vmul.f32 0.03125, %v3273_v56  ;;  %v3294_v14 = vmul.f32 %v3288_v17, %v3288_v17 }
0x13e9   :  { %v3289_v34 = vsub.f32 %v6585_v10, %v3283_v43  ;;  %v3304_v21 = vsel %vm151_vm2, %v3294_v14, 0.0 }
0x13ea   :  { %3305 = vadd.xlane.f32.xlu1 %v3304_v21 }
0x13eb   :  { %v3295_v62 = vmul.f32 %v3289_v34, %v3289_v34 }
0x13ed   :  { %v3307_v12 = vsel %vm151_vm2, %v3295_v62, 0.0  ;;  %v4666_v62 = vld [vmem:[%s6745_s10 + $0x60] sm:$0xff]  }
0x13ee   :  { %3308 = vadd.xlane.f32.xlu0 %v3307_v12  ;;  %v4667_v12 = vld [vmem:[%s6745_s10 + $0x58] sm:$0xff]  }
0x13fb   :  { %4626 = vrot.lane.b32.xlu1 %v4625_v38, %s5016_s1 }
0x1404   :  { %4631 = vrot.lane.b32.xlu0 %v4630_v29, %s5017_s20 }
0x1438   :  { %v3060_v54 = vpop.f32.mrf.mxu1 }
0x143a   :  { %v4457_v0 = vpop.f32.mrf.mxu1 }
0x143b   :  { %v4669_v0 = vld [vmem:[%s6745_s10 + $0x48] sm:$0xff]  }
0x143c   :  { %v3063_v51 = vpop.f32.mrf.mxu1 }
0x143d   :  { %v4635_v47 = vpack.i.bf16 %v3063_v51, %v3060_v54  ;;  %v4668_v54 = vld [vmem:[%s6745_s10 + $0x50] sm:$0xff]   ;;  %v4670_v51 = vld [vmem:[%s6745_s10 + $0x40] sm:$0xff]  }
0x143e   :  { %v4458_v4 = vpop.f32.mrf.mxu1 }
0x143f   :  { %4636 = vrot.lane.b32.xlu1 %v4635_v47, %s5018_s21  ;;  %v6684_v47 = vld [vmem:[%s6744_s9 + $0x1] ss:$0 sm:$0xff] }
0x1445   :  { %v3300_v24 = vpop.xlane.xlu1 %3299 }
0x1446   :  { %v3316_v30 = vmul.f32 0.03125, %v3300_v24 }
0x1448   :  { %v3322_v23 = vadd.f32 1e-05, %v3316_v30 }
0x1449   :  { %v3303_v50 = vpop.xlane.xlu0 %3302 }
0x144a   :  { %4937 = vrsqrt.f32 %v3322_v23  ;;  %v3317_v61 = vmul.f32 0.03125, %v3303_v50 }
0x144c   :  { %v3323_v26 = vadd.f32 1e-05, %v3317_v61 }
0x144e   :  { %4939 = vrsqrt.f32 %v3323_v26 }
0x1457   :  { %v4938_v53 = vpop.eup %4937 }
0x1458   :  { %v3334_v38 = vmul.f32 %v4938_v53, %v3286_v15 }
0x145a   :  { %v3344_v29 = vmul.f32 %v6618_v55, %v3334_v38 }
0x145b   :  { %v4940_v3 = vpop.eup %4939 }
0x145c   :  { %v3335_v25 = vmul.f32 %v4940_v3, %v3287_v20  ;;  %v3354_v6 = vadd.f32 %v6624_v37, %v3344_v29 }
0x145e   :  { %v3345_v5 = vmul.f32 %v6618_v55, %v3335_v25 }
0x1460   :  { %v3355_v16 = vadd.f32 %v6624_v37, %v3345_v5 }
0x1462   :  { %v3360_v44 = vpack.c.bf16 %v3355_v16, %v3354_v6 }
0x1464   :  { %4480 = vmatmul.mubr.msk.bf16.vlgmr.msra.gmra.mxu1 %vm151_vm2, %v3360_v44 }
0x1465   :  { %4483 = vmatprep.mubr.msk.bf16.mxu1 %vm5004_vm0, %v5003_v1 }
0x1473   :  { %v3306_v7 = vpop.xlane.xlu1 %3305 }
0x1474   :  { %v3318_v19 = vmul.f32 0.03125, %v3306_v7 }
0x1476   :  { %v3324_v11 = vadd.f32 1e-05, %v3318_v19 }
0x1477   :  { %v3309_v13 = vpop.xlane.xlu0 %3308  ;;  %v4627_v2 = vpop.permute.xlu1 %4626 }
0x1478   :  { %4941 = vrsqrt.f32 %v3324_v11  ;;  %v3319_v36 = vmul.f32 0.03125, %v3309_v13  ;;  %v4629_v22 = vunpack.i.h.bf16 %v4627_v2  ;;  %v4628_v20 = vunpack.i.l.bf16 %v4627_v2 }
0x147a   :  { %v3325_v33 = vadd.f32 1e-05, %v3319_v36  ;;  %v3144_v48 = vsel %vm461_vm3, %v6510_v28, %v4629_v22  ;;  %v3143_v35 = vsel %vm461_vm3, %v6508_v8, %v4628_v20  ;;  %v4664_v28 = vld [vmem:[%s6745_s10 + $0x70] sm:$0xff]   ;;  %v4665_v8 = vld [vmem:[%s6745_s10 + $0x68] sm:$0xff]  }
0x147b   :  { %v4632_v45 = vpop.permute.xlu0 %4631  ;;  %4494 = vmatpush3.bf16.msra.mxu0 %v4664_v28 }
0x147c   :  { %4943 = vrsqrt.f32 %v3325_v33  ;;  %v4634_v46 = vunpack.i.h.bf16 %v4632_v45  ;;  %v4633_v57 = vunpack.i.l.bf16 %v4632_v45  ;;  %4495 = vmatprep.subr.bf16.mxu0 %v5003_v1 }
0x147e   :  { %v3150_v56 = vsel %vm1452_vm4, %v3144_v48, %v4634_v46  ;;  %v3149_v43 = vsel %vm1452_vm4, %v3143_v35, %v4633_v57 }
0x147f   :  { %4496 = vmatpush3.bf16.msra.mxu0 %v4665_v8 }
0x1480   :  { %4497 = vmatprep.subr.bf16.mxu0 %v5003_v1 }
0x1483   :  { %4498 = vmatpush3.bf16.msra.mxu0 %v4666_v62 }
0x1484   :  { %4499 = vmatprep.subr.bf16.mxu0 %v5003_v1 }
0x1485   :  { %v4942_v27 = vpop.eup %4941 }
0x1486   :  { %v3336_v42 = vmul.f32 %v4942_v27, %v3288_v17 }
0x1487   :  { %4500 = vmatpush3.bf16.msra.mxu0 %v4667_v12 }
0x1488   :  { %v3346_v32 = vmul.f32 %v6618_v55, %v3336_v42  ;;  %4501 = vmatprep.subr.bf16.mxu0 %v5003_v1 }
0x1489   :  { %v4944_v58 = vpop.eup %4943 }
0x148a   :  { %v3337_v63 = vmul.f32 %v4944_v58, %v3289_v34  ;;  %v3356_v59 = vadd.f32 %v6624_v37, %v3346_v32 }
0x148b   :  { %4502 = vmatpush3.bf16.msra.mxu0 %v4668_v54 }
0x148c   :  { %v3347_v18 = vmul.f32 %v6618_v55, %v3337_v63  ;;  %4503 = vmatprep.subr.bf16.mxu0 %v5003_v1 }
0x148e   :  { %v3357_v41 = vadd.f32 %v6624_v37, %v3347_v18 }
0x148f   :  { %4504 = vmatpush3.bf16.msra.mxu0 %v4669_v0 }
0x1490   :  { %v3361_v15 = vpack.c.bf16 %v3357_v41, %v3356_v59  ;;  %4505 = vmatprep.subr.bf16.mxu0 %v5003_v1 }
0x1492   :  { %4484 = vmatmul.mubr.msk.bf16.gmra.mxu1 %vm151_vm2, %v3361_v15 }
0x1493   :  { %4487 = vmatprep.mubr.msk.bf16.mxu1 %vm5004_vm0, %v5003_v1  ;;  %4506 = vmatpush3.bf16.msra.mxu0 %v4670_v51 }
0x14b1   :  { %v4637_v9 = vpop.permute.xlu1 %4636 }
0x14b2   :  { %v4639_v49 = vunpack.i.h.bf16 %v4637_v9  ;;  %v4638_v17 = vunpack.i.l.bf16 %v4637_v9 }
0x14b4   :  { %v3155_v14 = vsel %vm1459_vm5, %v3149_v43, %v4638_v17  ;;  %v3156_v34 = vsel %vm1459_vm5, %v3150_v56, %v4639_v49 }
0x14b5   :  { %v3159_v21 = vpack.c.bf16 %v3156_v34, %v3155_v14 }
0x14b7   :  { %4472 = vmatmul.mubr.msk.bf16.gmra.mxu0 %vm151_vm2, %v3159_v21 }
0x14b8   :  { %4507 = vmatprep.mubr.msk.bf16.mxu0 %vm5004_vm0, %v5003_v1 }
0x1524   :  { %v3431_v4 = vpop.f32.mrf.mxu1 }
0x1525   :  { %v3432_v24 = vadd.f32 %v6684_v47, %v3431_v4 }
0x1526   :  { %v4481_v30 = vpop.f32.mrf.mxu1 }
0x1527   :  { %v3868_v23 = vmul.f32 -1.702, %v3432_v24 }
0x1528   :  { %v3434_v50 = vpop.f32.mrf.mxu1 }
0x1529   :  { %v3466_v61 = vmul.f32 1.442695, %v3868_v23  ;;  %v3435_v26 = vadd.f32 %v6684_v47, %v3434_v50 }
0x152a   :  { %v4482_v53 = vpop.f32.mrf.mxu1 }
0x152b   :  { %4945 = vpow2.f32 %v3466_v61  ;;  %v3869_v38 = vmul.f32 -1.702, %v3435_v26 }
0x152d   :  { %v3468_v3 = vmul.f32 1.442695, %v3869_v38 }
0x152f   :  { %4947 = vpow2.f32 %v3468_v3  ;;  %v3898_v3 = vld [vmem:[%s6739_s4 + $0xf] ss:$0 sm:$0xff] }
0x1538   :  { %v4946_v29 = vpop.eup %4945 }
0x1539   :  { %v3478_v25 = vadd.f32 1.0, %v4946_v29 }
0x153b   :  { %4949 = vrcp.f32 %v3478_v25 }
0x153c   :  { %v4948_v5 = vpop.eup %4947 }
0x153d   :  { %v3479_v6 = vadd.f32 1.0, %v4948_v5 }
0x153f   :  { %4951 = vrcp.f32 %v3479_v6 }
0x1548   :  { %v4950_v16 = vpop.eup %4949 }
0x1549   :  { %v3496_v7 = vmul.f32 %v4950_v16, %v3432_v24 }
0x154c   :  { %v4952_v44 = vpop.eup %4951 }
0x154d   :  { %v3497_v19 = vmul.f32 %v4952_v44, %v3435_v26 }
0x154f   :  { %v3502_v11 = vpack.c.bf16 %v3497_v19, %v3496_v7 }
0x1551   :  { %4508 = vmatmul.mubr.bf16.vlgmr.msra.gmra.mxu0 %v3502_v11 }
0x1552   :  { %v3439_v13 = vpop.f32.mrf.mxu1  ;;  %4511 = vmatprep.mubr.msk.bf16.mxu0 %vm5004_vm0, %v5003_v1 }
0x1553   :  { %v3440_v36 = vadd.f32 %v6684_v47, %v3439_v13 }
0x1554   :  { %v4485_v33 = vpop.f32.mrf.mxu1 }
0x1555   :  { %v3870_v27 = vmul.f32 -1.702, %v3440_v36 }
0x1556   :  { %v3442_v42 = vpop.f32.mrf.mxu1 }
0x1557   :  { %v3470_v58 = vmul.f32 1.442695, %v3870_v27  ;;  %v3443_v63 = vadd.f32 %v6684_v47, %v3442_v42 }
0x1558   :  { %v4486_v32 = vpop.f32.mrf.mxu1 }
0x1559   :  { %4953 = vpow2.f32 %v3470_v58  ;;  %v3871_v18 = vmul.f32 -1.702, %v3443_v63 }
0x155b   :  { %v3472_v59 = vmul.f32 1.442695, %v3871_v18 }
0x155d   :  { %4955 = vpow2.f32 %v3472_v59 }
0x1566   :  { %v4954_v41 = vpop.eup %4953 }
0x1567   :  { %v3480_v15 = vadd.f32 1.0, %v4954_v41 }
0x1569   :  { %4957 = vrcp.f32 %v3480_v15 }
0x156a   :  { %v4956_v2 = vpop.eup %4955 }
0x156b   :  { %v3481_v45 = vadd.f32 1.0, %v4956_v2 }
0x156d   :  { %4959 = vrcp.f32 %v3481_v45 }
0x1576   :  { %v4958_v20 = vpop.eup %4957 }
0x1577   :  { %v3236_v22 = vpop.f32.mrf.mxu0  ;;  %v3498_v48 = vmul.f32 %v4958_v20, %v3440_v36 }
0x1578   :  { %v3247_v46 = vadd.f32 %v3236_v22, %v5961_v31 }
0x1579   :  { %v4473_v57 = vpop.f32.mrf.mxu0 }
0x157a   :  { %v4960_v9 = vpop.eup %4959  ;;  %v3258_v40 = vadd.f32 %v6569_v39, %v3247_v46 }
0x157b   :  { %v3499_v35 = vmul.f32 %v4960_v9, %v3443_v63  ;;  %v3239_v49 = vpop.f32.mrf.mxu0 }
0x157c   :  { %v3248_v17 = vadd.f32 %v3239_v49, %v5966_v52  ;;  %v3274_v56 = vsel %vm151_vm2, %v3258_v40, 0.0 }
0x157d   :  { %v3503_v43 = vpack.c.bf16 %v3499_v35, %v3498_v48  ;;  %3275 = vadd.xlane.f32.xlu1 %v3274_v56  ;;  %v4474_v14 = vpop.f32.mrf.mxu0  ;;  %v3899_v35 = vld [vmem:[%s6739_s4 + $0x2] ss:$0 sm:$0xff]  ;;  %v3900_v56 = vld [vmem:[%s6739_s4 + $0x3] ss:$0 sm:$0xff]  ;;  %s5019_s4 = smov [#allocation2]  }
0x157e   :  { %v3259_v34 = vadd.f32 %v6569_v39, %v3248_v17 }
0x157f   :  { %4512 = vmatmul.mubr.bf16.gmra.mxu0 %v3503_v43 }
0x1580   :  { %v3277_v21 = vsel %vm151_vm2, %v3259_v34, 0.0  ;;  %4515 = vmatprep.mubr.msk.bf16.mxu0 %vm5004_vm0, %v5003_v1 }
0x1581   :  { %3278 = vadd.xlane.f32.xlu0 %v3277_v21 }
0x1606   :  { %v3276_v31 = vpop.xlane.xlu1 %3275 }
0x1607   :  { %v3284_v28 = vmul.f32 0.03125, %v3276_v31 }
0x1609   :  { %v3290_v8 = vsub.f32 %v3258_v40, %v3284_v28 }
0x160a   :  { %v3279_v62 = vpop.xlane.xlu0 %3278 }
0x160b   :  { %v3285_v12 = vmul.f32 0.03125, %v3279_v62  ;;  %v3296_v52 = vmul.f32 %v3290_v8, %v3290_v8 }
0x160d   :  { %v3291_v54 = vsub.f32 %v3259_v34, %v3285_v12  ;;  %v3310_v0 = vsel %vm151_vm2, %v3296_v52, 0.0 }
0x160e   :  { %3311 = vadd.xlane.f32.xlu0 %v3310_v0 }
0x160f   :  { %v3297_v51 = vmul.f32 %v3291_v54, %v3291_v54 }
0x1611   :  { %v3313_v39 = vsel %vm151_vm2, %v3297_v51, 0.0  ;;  %v3604_v4 = vpop.f32.mrf.mxu0 }
0x1612   :  { %3314 = vadd.xlane.f32.xlu1 %v3313_v39  ;;  %v3623_v53 = vadd.f32 %v3604_v4, %v6573_v60 }
0x1613   :  { %v4509_v24 = vpop.f32.mrf.mxu0 }
0x1614   :  { %v3630_v5 = vadd.f32 %v3898_v3, %v3623_v53 }
0x1615   :  { %v3607_v30 = vpop.f32.mrf.mxu0 }
0x1617   :  { %v4510_v23 = vpop.f32.mrf.mxu0 }
0x163f   :  { %v3611_v50 = vpop.f32.mrf.mxu0 }
0x1641   :  { %v4513_v61 = vpop.f32.mrf.mxu0 }
0x1643   :  { %v3613_v26 = vpop.f32.mrf.mxu0 }
0x1644   :  { %v3624_v38 = vadd.f32 %v3613_v26, %v6585_v10 }
0x1645   :  { %v4514_v29 = vpop.f32.mrf.mxu0 }
0x1646   :  { %v3631_v25 = vadd.f32 %v3898_v3, %v3624_v38 }
0x1648   :  { %v3633_v6 = vrot.slane %v3631_v25, 7 }
0x164a   :  { %v3636_v16 = vsel %vm3635_vm6, %v3630_v5, %v3633_v6 }
0x164b   :  { %v3640_v44 = vsel %vm3639_vm7, %v3636_v16, 0.0 }
0x164c   :  { %3641 = vadd.xlane.f32.xlu0 %v3640_v44 }
0x1697   :  { %v3312_v7 = vpop.xlane.xlu0 %3311 }
0x1698   :  { %v3320_v19 = vmul.f32 0.03125, %v3312_v7 }
0x169a   :  { %v3326_v11 = vadd.f32 1e-05, %v3320_v19 }
0x169b   :  { %v3315_v60 = vpop.xlane.xlu1 %3314 }
0x169c   :  { %4961 = vrsqrt.f32 %v3326_v11  ;;  %v3321_v10 = vmul.f32 0.03125, %v3315_v60 }
0x169e   :  { %v3327_v13 = vadd.f32 1e-05, %v3321_v10 }
0x16a0   :  { %4963 = vrsqrt.f32 %v3327_v13 }
0x16a9   :  { %v4962_v36 = vpop.eup %4961 }
0x16aa   :  { %v3338_v33 = vmul.f32 %v4962_v36, %v3290_v8 }
0x16ac   :  { %v3348_v58 = vmul.f32 %v6618_v55, %v3338_v33 }
0x16ad   :  { %v4964_v27 = vpop.eup %4963 }
0x16ae   :  { %v3339_v42 = vmul.f32 %v4964_v27, %v3291_v54  ;;  %v3358_v32 = vadd.f32 %v6624_v37, %v3348_v58 }
0x16b0   :  { %v3349_v63 = vmul.f32 %v6618_v55, %v3339_v42  ;;  %v4671_v55 = vld [vmem:[%s6746_s11 + $0x8] sm:$0xff]  }
0x16b1   :  { %4520 = vmatpush3.bf16.msra.mxu1 %v4671_v55 }
0x16b2   :  { %v3359_v18 = vadd.f32 %v6624_v37, %v3349_v63  ;;  %4521 = vmatprep.subr.bf16.mxu1 %v5003_v1  ;;  %v4672_v37 = vld [vmem:[%s6746_s11] sm:$0xff]   ;;  %s3731_s11 = sshll.u32 %s5019_s4, 4  ;;  %s3732_s11 = int_to_ptr.vmem [resolvable:$true] %s3731_s11 }
0x16b3   :  { %s4981_s6 = scalar_lea.vmem %s3732_s11, 32  ;;  %p4986_p1 = scmp.lt.s32.totalorder %s3732_s11, %s3732_s11 }
0x16b4   :  { %v3362_v59 = vpack.c.bf16 %v3359_v18, %v3358_v32  ;;  %p4982_p0 = scmp.ne.s32.totalorder %s3732_s11, %s4981_s6  ;;  %p4987_p2 = scmp.lt.s32.totalorder %s4981_s6, %s4981_s6 }
0x16b5   :  { %4522 = vmatpush3.bf16.msra.mxu1 %v4672_v37 }
0x16b6   :  { %4488 = vmatmul.mubr.msk.bf16.gmra.mxu1 %vm151_vm2, %v3362_v59  ;;  %p4988_p3 = por %p4987_p2, %p4986_p1 }
0x16b7   :  { %4523 = vmatprep.mubr.msk.bf16.mxu1 %vm5004_vm0, %v5003_v1 }
0x16b8   :  { %p4989_p4 = pnand %p4988_p3, %p4982_p0 }
0x16d5   :  { %v3642_v41 = vpop.xlane.xlu0 %3641 }
0x16d6   :  { %v3643_v15 = vmul.f32 0.03125, %v3642_v41 }
0x16d8   :  { %v3644_v2 = vsub.f32 %v3636_v16, %v3643_v15 }
0x16da   :  { %v3645_v45 = vmul.f32 %v3644_v2, %v3644_v2 }
0x16dc   :  { %v3646_v22 = vsel %vm3639_vm7, %v3645_v45, 0.0 }
0x16dd   :  { %3647 = vadd.xlane.f32.xlu1 %v3646_v22 }
0x1766   :  { %v3648_v20 = vpop.xlane.xlu1 %3647 }
0x1767   :  { %v3649_v46 = vmul.f32 0.03125, %v3648_v20 }
0x1769   :  { %v3650_v57 = vadd.f32 1e-05, %v3649_v46 }
0x176b   :  { %4965 = vrsqrt.f32 %v3650_v57 }
0x1776   :  { %v3447_v9 = vpop.f32.mrf.mxu1 }
0x1777   :  { %v3448_v40 = vadd.f32 %v6684_v47, %v3447_v9 }
0x1778   :  { %v4966_v48 = vpop.eup %4965  ;;  %v4489_v49 = vpop.f32.mrf.mxu1 }
0x1779   :  { %v3652_v17 = vmul.f32 %v4966_v48, %v3644_v2  ;;  %v3872_v1 = vmul.f32 -1.702, %v3448_v40 }
0x177a   :  { %v3450_v43 = vpop.f32.mrf.mxu1 }
0x177b   :  { %v3657_v14 = vmul.f32 %v3899_v35, %v3652_v17  ;;  %v3474_v34 = vmul.f32 1.442695, %v3872_v1  ;;  %v3451_v21 = vadd.f32 %v6684_v47, %v3450_v43 }
0x177c   :  { %v4490_v31 = vpop.f32.mrf.mxu1 }
0x177d   :  { %v3662_v28 = vadd.f32 %v3900_v56, %v3657_v14  ;;  %4967 = vpow2.f32 %v3474_v34  ;;  %v3873_v8 = vmul.f32 -1.702, %v3451_v21 }
0x177f   :  { %v3663_v62 = vpack.c.bf16 %v3662_v28, %v3662_v28  ;;  %v3476_v12 = vmul.f32 1.442695, %v3873_v8 }
0x1781   :  { %4969 = vpow2.f32 %v3476_v12  ;;  %4524 = vmatmul.mubr.msk.bf16.vlgmr.msra.gmra.mxu1 %vm151_vm2, %v3663_v62 }
0x178a   :  { %v4968_v52 = vpop.eup %4967 }
0x178b   :  { %v3482_v54 = vadd.f32 1.0, %v4968_v52 }
0x178d   :  { %4971 = vrcp.f32 %v3482_v54 }
0x178e   :  { %v4970_v0 = vpop.eup %4969 }
0x178f   :  { %v3483_v51 = vadd.f32 1.0, %v4970_v0 }
0x1791   :  { %4973 = vrcp.f32 %v3483_v51 }
0x179a   :  { %v4972_v39 = vpop.eup %4971 }
0x179b   :  { %v3500_v24 = vmul.f32 %v4972_v39, %v3448_v40 }
0x179e   :  { %v4974_v4 = vpop.eup %4973 }
0x179f   :  { %v3501_v30 = vmul.f32 %v4974_v4, %v3451_v21 }
0x17a1   :  { %v3504_v47 = vpack.c.bf16 %v3501_v30, %v3500_v24 }
0x17a3   :  { %4516 = vmatmul.mubr.bf16.gmra.mxu0 %v3504_v47 }
0x1841   :  { %v3717_v23 = vpop.f32.mrf.mxu1 }
0x1842   :  { %3724 = vst.msk [vmem:[#allocation2] sm:$0x3] %vm3723_vm8, %v3717_v23 }
0x1843   :  { %v4525_v50 = vpop.f32.mrf.mxu1 }
0x1844   :  { %4992 = shalt.err (!%p4989_p4)
}
0x1845   :  { %3734 = dma.vmem_to_hbm [thread:$0]  %s3732_s11, 32, %s6747_s12, [#allocation3]   ;;  %v3720_v61 = vpop.f32.mrf.mxu1 }
0x1847   :  { %v4526_v26 = vpop.f32.mrf.mxu1 }
0x1863   :  { %v3618_v53 = vpop.f32.mrf.mxu0 }
0x1865   :  { %v4517_v38 = vpop.f32.mrf.mxu0 }
0x1867   :  { %v3620_v3 = vpop.f32.mrf.mxu0 }
0x1869   :  { %v4518_v29 = vpop.f32.mrf.mxu0 }
0x186a   :  { %5001 = dma.done.wait [#allocation3], 32  }
0x186b   :  { %5002 = vsyncadd [#allocation3], 4294967264 }
0x186c   :  { %3738 = vsyncpa [#allocation3], 1 }

</bundles_post_ra>
